<compile_context>
chip_gen: v7x
topology: tpu7x:2x2x1
jax: 0.10.0
libtpu: 0.0.40
codegen_flags: <defaults>
</compile_context>

<pallas_src>
import jax
import jax.numpy as jnp
from jax import lax
from jax.experimental import pallas as pl
from jax.experimental.pallas import tpu as pltpu

LN_EPS = 1e-5
BN_EPS = 1e-5
N_MATS_PER_ENC = 9      # Wqk1, Wv1, Wt1, Wqk2, Wv2, Wt2, Wout_a, Wout_b, Wffn
N_VECS_GLOBAL = 5       # embed bias, ln2_g, ln2_b, head_w, head_b
N_VECS_PER_ENC = 8      # bv1, bt1, bv2, bt2, out_b, ffn_b, ln_g, ln_b


# ----------------------------- reference-only helper -----------------------------

def distance_expansion(d, size):
    """DistanceExpansion.forward: (B, N, K) -> (B, N, K*size). Used by the reference."""
    starter = jnp.arange(size, dtype=jnp.float32) / float(size)
    out = (1.0 - (d[..., None] - starter)) ** 2
    return out.reshape(d.shape[0], d.shape[1], d.shape[2] * size)


# ----------------------------- fused Pallas kernel -----------------------------

def _build_fused_call(B, N, D, F, n_enc, n_vecs, bb):
    """One pallas_call: embeddings -> stacked encoders -> weighted pooling -> ln2 -> head.

    bb = crystals processed per grid step (B // bb grid steps)."""
    G = B // bb

    def _ln(z, g, b):
        # Independent E[x] / E[x^2] reductions (overlap on the XLU) instead of a
        # serialized mean -> (x - mu)^2 -> mean chain.
        m1 = jnp.mean(z, axis=-1, keepdims=True)
        m2 = jnp.mean(z * z, axis=-1, keepdims=True)
        var = jnp.maximum(m2 - m1 * m1, 0.0)
        return (z - m1) * lax.rsqrt(var + LN_EPS) * g + b

    def _mish(h):
        # h * tanh(softplus(h)) with a single exponential:
        #   y = 1 + exp(h);  tanh(log y) = (y^2 - 1)/(y^2 + 1) = 1 - 2/(y^2 + 1)
        y = 1.0 + jnp.exp(h)
        y2 = y * y
        return h * (1.0 - 2.0 / (y2 + 1.0))

    def kernel(comp_ref, feat_ref, wdd_ref, mats_ref, vecs_ref, o_ref):
        wdd = wdd_ref[...]                                   # (F, D)

        def vrow(i):                                         # (1, D) bias/LN row
            return vecs_ref[i]

        def sa(xin, wqk, wv, wt, bv, bt):
            # energy[n, m] = xin[n] @ Wqk @ xin[m]   (Wqk = q_w^T @ k_w, exact fold)
            qk = jnp.dot(xin, wqk, preferred_element_type=jnp.float32)        # (N, D)
            energy = lax.dot_general(qk, xin, (((1,), (1,)), ((), ())),
                                     preferred_element_type=jnp.float32)      # (N, N)
            v = jnp.dot(xin, wv, preferred_element_type=jnp.float32) + bv     # (N, D)
            e = jnp.exp(energy - jnp.max(energy, axis=-1, keepdims=True))
            a = e / jnp.sum(e, axis=-1, keepdims=True)                 # exact softmax
            attn = a / (1e-9 + jnp.sum(a, axis=0, keepdims=True))     # exact col renorm
            # TODO(synk): for large N, tile this with a flash-style online-softmax KV
            # loop sized against v7x's 64 MiB VMEM (set vmem_limit_bytes explicitly);
            # unnecessary at N=8 (<1 MiB live).
            # x_r[m, d] = sum_n attn[n, m] * v[n, d]
            x_r = lax.dot_general(attn, v, (((0,), (0,)), ((), ())),
                                  preferred_element_type=jnp.float32)         # (N, D)
            # trans_conv with eval-mode BatchNorm folded into wt/bt, then ReLU+residual
            t = jnp.dot(xin - x_r, wt, preferred_element_type=jnp.float32) + bt
            return xin + jnp.maximum(t, 0.0)

        for c in range(bb):                                  # tiny static crystal loop
            comp = comp_ref[c]                               # (N, D) pre-embedded comp
            feat = feat_ref[c]                               # (N, F) = [d | d^2 | w]
            w = feat[:, F - 1:F]                             # (N, 1) PDD weights

            # comp_embedding + pdd_embedding (quadratic-in-d refactor, one K=F matmul;
            # the weight column multiplies a zero row of wdd)
            x = comp + jnp.dot(feat, wdd, preferred_element_type=jnp.float32) + vrow(0)
            x_init = x

            for e_i in range(n_enc):
                mb = e_i * N_MATS_PER_ENC
                vb = N_VECS_GLOBAL + e_i * N_VECS_PER_ENC
                wqk1, wv1, wt1 = mats_ref[mb], mats_ref[mb + 1], mats_ref[mb + 2]
                wqk2, wv2, wt2 = mats_ref[mb + 3], mats_ref[mb + 4], mats_ref[mb + 5]
                wout_a, wout_b, wffn = (mats_ref[mb + 6], mats_ref[mb + 7],
                                        mats_ref[mb + 8])
                bv1, bt1 = vrow(vb), vrow(vb + 1)
                bv2, bt2 = vrow(vb + 2), vrow(vb + 3)
                bout, bffn = vrow(vb + 4), vrow(vb + 5)
                g, b = vrow(vb + 6), vrow(vb + 7)

                xn = _ln(x, g, b)                            # encoder.ln
                x1 = sa(xn, wqk1, wv1, wt1, bv1, bt1)
                x2 = sa(x1, wqk2, wv2, wt2, bv2, bt2)
                # concat([x1, x2], -1) @ out^T  ==  x1 @ out^T[:D] + x2 @ out^T[D:]
                out1 = (x
                        + jnp.dot(x1, wout_a, preferred_element_type=jnp.float32)
                        + jnp.dot(x2, wout_b, preferred_element_type=jnp.float32)
                        + bout)
                out2 = _ln(out1, g, b)
                h = jnp.dot(out2, wffn, preferred_element_type=jnp.float32) + bffn
                out2 = _mish(h)
                x = _ln(out1 + out2, g, b)

            pooled = jnp.sum(w * (x + x_init), axis=0, keepdims=True)     # (1, D)
            pooled = _ln(pooled, vrow(1), vrow(2))                        # PST.ln2
            y = jnp.sum(pooled * vrow(3), axis=-1, keepdims=True) + vrow(4)[:, :1]
            # lane-dense padded store (sliced back to (B, 1) in the wrapper)
            o_ref[c] = jnp.broadcast_to(y, (1, 128))

    return pl.pallas_call(
        kernel,
        out_shape=jax.ShapeDtypeStruct((B, 1, 128), jnp.float32),
        grid=(G,),
        in_specs=[pl.BlockSpec((bb, N, D), lambda i: (i, 0, 0)),   # embedded comp rows
                  pl.BlockSpec((bb, N, F), lambda i: (i, 0, 0)),   # [d, d^2, w]
                  pl.BlockSpec((F, D), lambda i: (0, 0)),          # PDD quad weights
                  pl.BlockSpec((n_enc * N_MATS_PER_ENC, D, D),
                               lambda i: (0, 0, 0)),               # encoder D x D mats
                  pl.BlockSpec((n_vecs, 1, D), lambda i: (0, 0, 0))],  # bias/LN rows
        out_specs=pl.BlockSpec((bb, 1, 128), lambda i: (i, 0, 0)),
        compiler_params=pltpu.CompilerParams(dimension_semantics=("parallel",)),
    )


def _crystals_per_step(B):
    """Single-TensorCore chips (v5e/v6e): one grid step, loop crystals inside.
    Multi-core chips (v7x 2 TCs, v4/v5p megacore): keep B on the grid."""
    try:
        kind = jax.devices()[0].device_kind.lower()
    except Exception:
        return 1
    single_core = any(t in kind for t in ("v5 lite", "v5e", "v6 lite", "v6e", "lite"))
    return B if single_core else 1
    # TODO(synk): for large B on v7x, pack ceil(B/2) crystals per step instead of 1.


def pst_forward(str_fea, comp_fea, packed):
    """PeriodicSetTransformer.forward((str_fea, comp_fea, cell_fea)) -> (B, 1)."""
    B, N, _ = str_fea.shape
    D = packed["atab_emb"].shape[-1]
    n_enc = packed["enc_mats"].shape[0] // N_MATS_PER_ENC
    n_vecs = packed["vecs"].shape[0]

    # Gather from the PRE-EMBEDDED atom table (rows are atom_table @ comp_w^T):
    # D=32-wide gather instead of 200-wide, and no comp matmul in the kernel.
    # TODO(synk): the id -> row gather stays in XLA; it could move in-kernel via
    # scalar-prefetched ids + the 12 KiB table as a const VMEM operand.
    comp_emb = jnp.take(packed["atab_emb"], comp_fea, axis=0)          # (B, N, D)

    d = str_fea[:, :, 1:]                                              # (B, N, K)
    feat = jnp.concatenate([d, d * d, str_fea[:, :, :1]], axis=-1)     # (B, N, 2K+1)
    F = feat.shape[-1]

    bb = _crystals_per_step(B)
    call = _build_fused_call(B, N, D, F, n_enc, n_vecs, bb)
    y_pad = call(comp_emb, feat, packed["wdd"], packed["enc_mats"], packed["vecs"])
    return y_pad[:, 0, :1]                                             # (B, 1)


# ----------------------------- parameters -----------------------------

def init_params(key, *, embed_dim, num_heads, n_encoders, str_fea_len,
                expansion_size, atom_dim):
    assert num_heads == 2, "Point_Transformer_Last concatenates exactly 2 SA outputs"
    D, Dh = embed_dim, embed_dim // 2
    ks = iter(jax.random.split(key, 16 + 32 * n_encoders))

    def nrm(shape, scale=0.1):
        return scale * jax.random.normal(next(ks), shape, jnp.float32)

    def sa_params():
        return dict(q_w=nrm((Dh, D)), k_w=nrm((Dh, D)),
                    v_w=nrm((D, D)), v_b=nrm((D,)),
                    t_w=nrm((D, D)), t_b=nrm((D,)),
                    bn_g=1.0 + nrm((D,)), bn_b=nrm((D,)),
                    bn_rm=nrm((D,)), bn_rv=1.0 + jnp.abs(nrm((D,))))

    encoders = [dict(sa1=sa_params(), sa2=sa_params(),
                     out_w=nrm((D, num_heads * D)), out_b=nrm((D,)),
                     ffn_w=nrm((D, D)), ffn_b=nrm((D,)),
                     ln_g=1.0 + nrm((D,)), ln_b=nrm((D,)))
                for _ in range(n_encoders)]

    return dict(comp_w=nrm((D, atom_dim)), comp_b=nrm((D,)),
                pdd_w=nrm((D, (str_fea_len - 1) * expansion_size)), pdd_b=nrm((D,)),
                encoders=encoders,
                ln2_g=1.0 + nrm((D,)), ln2_b=nrm((D,)),
                out_w=nrm((1, D)), out_b=nrm((1,)))


def pack_params(raw, atom_table, expansion_size):
    """Fold embeddings / eval-BN / q*k, transpose weights, pack operands for the kernel."""
    D = raw["comp_w"].shape[0]
    S = expansion_size
    E = raw["pdd_w"].shape[1]
    K = E // S

    # Composition embedding folded into the atom table (exact).
    atab_emb = atom_table @ raw["comp_w"].T                           # (n_types, D)

    # PDD embedding refactor: (1-(d-s))^2 = c^2 - 2c d + d^2 with c = 1 + s/S, so
    # strexp @ pdd_w^T == C0 + d @ W1 + d^2 @ W2 (exact).
    pw = raw["pdd_w"].reshape(D, K, S)
    c = 1.0 + jnp.arange(S, dtype=jnp.float32) / float(S)
    W1 = jnp.einsum("dks,s->kd", pw, -2.0 * c)                        # (K, D)
    W2 = jnp.transpose(jnp.sum(pw, axis=2))                           # (K, D)
    C0 = jnp.einsum("dks,s->d", pw, c * c)                            # (D,)
    wdd = jnp.concatenate([W1, W2, jnp.zeros((1, D), jnp.float32)], axis=0)  # (2K+1, D)

    def fold_sa(sp):
        scale = sp["bn_g"] / jnp.sqrt(sp["bn_rv"] + BN_EPS)
        shift = sp["bn_b"] - sp["bn_rm"] * scale
        wqk = sp["q_w"].T @ sp["k_w"]                                 # (D, D), exact
        return (wqk, sp["v_w"].T, sp["t_w"].T * scale[None, :],
                sp["v_b"], sp["t_b"] * scale + shift)

    mats = []
    rows = [raw["comp_b"] + raw["pdd_b"] + C0,                        # 0: embed bias
            raw["ln2_g"], raw["ln2_b"], raw["out_w"][0],              # 1..3
            jnp.zeros((D,), jnp.float32).at[0].set(raw["out_b"][0])]  # 4: head bias
    for enc in raw["encoders"]:
        wqk1, wv1, wt1, bv1, bt1 = fold_sa(enc["sa1"])
        wqk2, wv2, wt2, bv2, bt2 = fold_sa(enc["sa2"])
        out_t = enc["out_w"].T                                        # (2D, D)
        mats += [wqk1, wv1, wt1, wqk2, wv2, wt2, out_t[:D], out_t[D:], enc["ffn_w"].T]
        rows += [bv1, bt1, bv2, bt2, enc["out_b"], enc["ffn_b"], enc["ln_g"], enc["ln_b"]]

    return dict(atab_emb=atab_emb, wdd=wdd,
                enc_mats=jnp.stack(mats),                             # (n_enc*9, D, D)
                vecs=jnp.stack(rows)[:, None, :])                     # (n_vecs, 1, D)


# ----------------------------- pure-JAX reference (mirrors PyTorch) -----------------------------

def reference_forward(str_fea, comp_fea, atom_table, raw, expansion_size):
    weights = str_fea[:, :, :1]
    comp_features = jnp.take(atom_table, comp_fea, axis=0) @ raw["comp_w"].T + raw["comp_b"]
    str_features = (distance_expansion(str_fea[:, :, 1:], expansion_size)
                    @ raw["pdd_w"].T + raw["pdd_b"])
    x = comp_features + str_features
    x_init = x

    def ln(z, g, b):
        mu = jnp.mean(z, -1, keepdims=True)
        var = jnp.mean((z - mu) ** 2, -1, keepdims=True)
        return (z - mu) / jnp.sqrt(var + LN_EPS) * g + b

    def sa(xc, sp):                                     # xc: (B, D, N) channels-first
        x_q = jnp.einsum("hd,bdn->bnh", sp["q_w"], xc)
        x_k = jnp.einsum("hd,bdn->bhn", sp["k_w"], xc)
        x_v = jnp.einsum("ed,bdn->ben", sp["v_w"], xc) + sp["v_b"][None, :, None]
        energy = jnp.einsum("bnh,bhm->bnm", x_q, x_k)
        attn = jax.nn.softmax(energy, axis=-1)
        attn = attn / (1e-9 + jnp.sum(attn, axis=1, keepdims=True))
        x_r = jnp.einsum("bdn,bnm->bdm", x_v, attn)
        t = jnp.einsum("ed,bdn->ben", sp["t_w"], xc - x_r) + sp["t_b"][None, :, None]
        t = ((t - sp["bn_rm"][None, :, None])
             / jnp.sqrt(sp["bn_rv"][None, :, None] + BN_EPS)
             * sp["bn_g"][None, :, None] + sp["bn_b"][None, :, None])
        return xc + jnp.maximum(t, 0.0)

    for enc in raw["encoders"]:
        xn = ln(x, enc["ln_g"], enc["ln_b"])
        xc = jnp.transpose(xn, (0, 2, 1))
        x1 = sa(xc, enc["sa1"])
        x2 = sa(x1, enc["sa2"])
        att = jnp.transpose(jnp.concatenate([x1, x2], axis=1), (0, 2, 1))
        out1 = x + att @ enc["out_w"].T + enc["out_b"]
        out2 = ln(out1, enc["ln_g"], enc["ln_b"])
        h = out2 @ enc["ffn_w"].T + enc["ffn_b"]
        out2 = h * jnp.tanh(jax.nn.softplus(h))          # Mish
        x = ln(out1 + out2, enc["ln_g"], enc["ln_b"])

    pooled = jnp.sum(weights * (x + x_init), axis=1)     # weighted pooling
    pooled = ln(pooled, raw["ln2_g"], raw["ln2_b"])      # PST.ln2
    return pooled @ raw["out_w"].T + raw["out_b"]        # (B, 1)


# ----------------------------- self-test -----------------------------

if __name__ == "__main__":
    B, N = 2, 8                  # crystals, points per PDD
    D = 32                       # embed_dim
    NUM_HEADS = 2
    N_ENCODERS = 3               # module default
    STR_FEA_LEN = 11             # col 0 = PDD weight, 10 distance columns
    EXPANSION_SIZE = 10          # -> pdd embedding input width 100
    ATOM_DIM = 200               # mat2vec encoding width
    N_ATOM_TYPES = 92

    key = jax.random.PRNGKey(0)
    k_d, k_w, k_c, k_t, k_p = jax.random.split(key, 5)

    pdd_w = jax.nn.softmax(jax.random.normal(k_w, (B, N)), axis=-1)
    dists = jax.random.uniform(k_d, (B, N, STR_FEA_LEN - 1), minval=0.0, maxval=2.0)
    str_fea = jnp.concatenate([pdd_w[..., None], dists], axis=-1)
    comp_fea = jax.random.randint(k_c, (B, N), 0, N_ATOM_TYPES)
    # TODO(synk): AtomFeaturizer is backed by mat2vec.csv; a deterministic in-script
    # table stands in for it here.
    atom_table = 0.1 * jax.random.normal(k_t, (N_ATOM_TYPES, ATOM_DIM), jnp.float32)

    raw = init_params(k_p, embed_dim=D, num_heads=NUM_HEADS, n_encoders=N_ENCODERS,
                      str_fea_len=STR_FEA_LEN, expansion_size=EXPANSION_SIZE,
                      atom_dim=ATOM_DIM)
    packed = pack_params(raw, atom_table, EXPANSION_SIZE)

    forward = jax.jit(pst_forward)
    y = jax.block_until_ready(forward(str_fea, comp_fea, packed))
    y_ref = jax.block_until_ready(
        reference_forward(str_fea, comp_fea, atom_table, raw, EXPANSION_SIZE))

    assert y.shape == (B, 1), y.shape
    # All folds (atom-table embed, quadratic PDD, Wqk, BN) are exact algebra; remaining
    # differences are f32 reassociation only (typically ~1e-5).
    assert jnp.allclose(y, y_ref, atol=2e-3, rtol=2e-3), (y, y_ref)
    print("KERNEL_OK")
</pallas_src>

<mosaic_0001>
module attributes {stable_mosaic.version = 11 : i64} {
  func.func @kernel(%arg0: i32, %arg1: memref<1x8x32xf32, #tpu.memory_space<vmem>>, %arg2: memref<1x8x21xf32, #tpu.memory_space<vmem>>, %arg3: memref<21x32xf32, #tpu.memory_space<vmem>>, %arg4: memref<27x32x32xf32, #tpu.memory_space<vmem>>, %arg5: memref<29x1x32xf32, #tpu.memory_space<vmem>>, %arg6: memref<1x1x128xf32, #tpu.memory_space<vmem>>) attributes {dimension_semantics = [#tpu.dimension_semantics<parallel>], iteration_bounds = array<i64: 2>, scalar_prefetch = 0 : i64, scratch_operands = 0 : i64, tpu.core_type = #tpu.core_type<tc>, window_params = [{transform_indices = @transform_0, window_bounds = array<i64: 1, 8, 32>}, {transform_indices = @transform_1, window_bounds = array<i64: 1, 8, 21>}, {pipeline_mode = #tpu.pipeline_mode<synchronous>, transform_indices = @transform_2, window_bounds = array<i64: 21, 32>}, {pipeline_mode = #tpu.pipeline_mode<synchronous>, transform_indices = @transform_3, window_bounds = array<i64: 27, 32, 32>}, {pipeline_mode = #tpu.pipeline_mode<synchronous>, transform_indices = @transform_4, window_bounds = array<i64: 29, 1, 32>}, {transform_indices = @transform_5, window_bounds = array<i64: 1, 1, 128>}]} {
    %c0 = arith.constant 0 : index
    %c0_0 = arith.constant 0 : index
    %0 = vector.load %arg3[%c0, %c0_0] : memref<21x32xf32, #tpu.memory_space<vmem>>, vector<21x32xf32>
    %c0_1 = arith.constant 0 : index
    %c0_2 = arith.constant 0 : index
    %c0_3 = arith.constant 0 : index
    %1 = vector.load %arg1[%c0_1, %c0_2, %c0_3] : memref<1x8x32xf32, #tpu.memory_space<vmem>>, vector<1x8x32xf32>
    %2 = vector.shape_cast %1 : vector<1x8x32xf32> to vector<8x32xf32>
    %c0_4 = arith.constant 0 : index
    %c0_5 = arith.constant 0 : index
    %c0_6 = arith.constant 0 : index
    %3 = vector.load %arg2[%c0_4, %c0_5, %c0_6] : memref<1x8x21xf32, #tpu.memory_space<vmem>>, vector<1x8x21xf32>
    %4 = vector.shape_cast %3 : vector<1x8x21xf32> to vector<8x21xf32>
    %5 = vector.extract_strided_slice %4 {offsets = [0, 20], sizes = [8, 1], strides = [1, 1]} : vector<8x21xf32> to vector<8x1xf32>
    %cst = arith.constant dense<0.000000e+00> : vector<8x32xf32>
    %6 = tpu.matmul %4, %0, %cst {dimension_numbers = #tpu.dot_dimension_numbers<[1], [0], [0], [1], [0, 0, 1, 1], [], []>} : vector<8x21xf32>, vector<21x32xf32>, vector<8x32xf32> -> vector<8x32xf32>
    %7 = arith.addf %2, %6 : vector<8x32xf32>
    %c0_7 = arith.constant 0 : index
    %c0_8 = arith.constant 0 : index
    %c0_9 = arith.constant 0 : index
    %8 = vector.load %arg5[%c0_7, %c0_8, %c0_9] : memref<29x1x32xf32, #tpu.memory_space<vmem>>, vector<1x1x32xf32>
    %9 = vector.shape_cast %8 : vector<1x1x32xf32> to vector<1x32xf32>
    %10 = vector.broadcast %9 : vector<1x32xf32> to vector<8x32xf32>
    %11 = arith.addf %7, %10 : vector<8x32xf32>
    %c0_10 = arith.constant 0 : index
    %c0_11 = arith.constant 0 : index
    %c0_12 = arith.constant 0 : index
    %12 = vector.load %arg4[%c0_10, %c0_11, %c0_12] : memref<27x32x32xf32, #tpu.memory_space<vmem>>, vector<1x32x32xf32>
    %13 = vector.shape_cast %12 : vector<1x32x32xf32> to vector<32x32xf32>
    %c1 = arith.constant 1 : index
    %c0_13 = arith.constant 0 : index
    %c0_14 = arith.constant 0 : index
    %14 = vector.load %arg4[%c1, %c0_13, %c0_14] : memref<27x32x32xf32, #tpu.memory_space<vmem>>, vector<1x32x32xf32>
    %15 = vector.shape_cast %14 : vector<1x32x32xf32> to vector<32x32xf32>
    %c2 = arith.constant 2 : index
    %c0_15 = arith.constant 0 : index
    %c0_16 = arith.constant 0 : index
    %16 = vector.load %arg4[%c2, %c0_15, %c0_16] : memref<27x32x32xf32, #tpu.memory_space<vmem>>, vector<1x32x32xf32>
    %17 = vector.shape_cast %16 : vector<1x32x32xf32> to vector<32x32xf32>
    %c3 = arith.constant 3 : index
    %c0_17 = arith.constant 0 : index
    %c0_18 = arith.constant 0 : index
    %18 = vector.load %arg4[%c3, %c0_17, %c0_18] : memref<27x32x32xf32, #tpu.memory_space<vmem>>, vector<1x32x32xf32>
    %19 = vector.shape_cast %18 : vector<1x32x32xf32> to vector<32x32xf32>
    %c4 = arith.constant 4 : index
    %c0_19 = arith.constant 0 : index
    %c0_20 = arith.constant 0 : index
    %20 = vector.load %arg4[%c4, %c0_19, %c0_20] : memref<27x32x32xf32, #tpu.memory_space<vmem>>, vector<1x32x32xf32>
    %21 = vector.shape_cast %20 : vector<1x32x32xf32> to vector<32x32xf32>
    %c5 = arith.constant 5 : index
    %c0_21 = arith.constant 0 : index
    %c0_22 = arith.constant 0 : index
    %22 = vector.load %arg4[%c5, %c0_21, %c0_22] : memref<27x32x32xf32, #tpu.memory_space<vmem>>, vector<1x32x32xf32>
    %23 = vector.shape_cast %22 : vector<1x32x32xf32> to vector<32x32xf32>
    %c6 = arith.constant 6 : index
    %c0_23 = arith.constant 0 : index
    %c0_24 = arith.constant 0 : index
    %24 = vector.load %arg4[%c6, %c0_23, %c0_24] : memref<27x32x32xf32, #tpu.memory_space<vmem>>, vector<1x32x32xf32>
    %25 = vector.shape_cast %24 : vector<1x32x32xf32> to vector<32x32xf32>
    %c7 = arith.constant 7 : index
    %c0_25 = arith.constant 0 : index
    %c0_26 = arith.constant 0 : index
    %26 = vector.load %arg4[%c7, %c0_25, %c0_26] : memref<27x32x32xf32, #tpu.memory_space<vmem>>, vector<1x32x32xf32>
    %27 = vector.shape_cast %26 : vector<1x32x32xf32> to vector<32x32xf32>
    %c8 = arith.constant 8 : index
    %c0_27 = arith.constant 0 : index
    %c0_28 = arith.constant 0 : index
    %28 = vector.load %arg4[%c8, %c0_27, %c0_28] : memref<27x32x32xf32, #tpu.memory_space<vmem>>, vector<1x32x32xf32>
    %29 = vector.shape_cast %28 : vector<1x32x32xf32> to vector<32x32xf32>
    %c5_29 = arith.constant 5 : index
    %c0_30 = arith.constant 0 : index
    %c0_31 = arith.constant 0 : index
    %30 = vector.load %arg5[%c5_29, %c0_30, %c0_31] : memref<29x1x32xf32, #tpu.memory_space<vmem>>, vector<1x1x32xf32>
    %31 = vector.shape_cast %30 : vector<1x1x32xf32> to vector<1x32xf32>
    %c6_32 = arith.constant 6 : index
    %c0_33 = arith.constant 0 : index
    %c0_34 = arith.constant 0 : index
    %32 = vector.load %arg5[%c6_32, %c0_33, %c0_34] : memref<29x1x32xf32, #tpu.memory_space<vmem>>, vector<1x1x32xf32>
    %33 = vector.shape_cast %32 : vector<1x1x32xf32> to vector<1x32xf32>
    %c7_35 = arith.constant 7 : index
    %c0_36 = arith.constant 0 : index
    %c0_37 = arith.constant 0 : index
    %34 = vector.load %arg5[%c7_35, %c0_36, %c0_37] : memref<29x1x32xf32, #tpu.memory_space<vmem>>, vector<1x1x32xf32>
    %35 = vector.shape_cast %34 : vector<1x1x32xf32> to vector<1x32xf32>
    %c8_38 = arith.constant 8 : index
    %c0_39 = arith.constant 0 : index
    %c0_40 = arith.constant 0 : index
    %36 = vector.load %arg5[%c8_38, %c0_39, %c0_40] : memref<29x1x32xf32, #tpu.memory_space<vmem>>, vector<1x1x32xf32>
    %37 = vector.shape_cast %36 : vector<1x1x32xf32> to vector<1x32xf32>
    %c9 = arith.constant 9 : index
    %c0_41 = arith.constant 0 : index
    %c0_42 = arith.constant 0 : index
    %38 = vector.load %arg5[%c9, %c0_41, %c0_42] : memref<29x1x32xf32, #tpu.memory_space<vmem>>, vector<1x1x32xf32>
    %39 = vector.shape_cast %38 : vector<1x1x32xf32> to vector<1x32xf32>
    %c10 = arith.constant 10 : index
    %c0_43 = arith.constant 0 : index
    %c0_44 = arith.constant 0 : index
    %40 = vector.load %arg5[%c10, %c0_43, %c0_44] : memref<29x1x32xf32, #tpu.memory_space<vmem>>, vector<1x1x32xf32>
    %41 = vector.shape_cast %40 : vector<1x1x32xf32> to vector<1x32xf32>
    %c11 = arith.constant 11 : index
    %c0_45 = arith.constant 0 : index
    %c0_46 = arith.constant 0 : index
    %42 = vector.load %arg5[%c11, %c0_45, %c0_46] : memref<29x1x32xf32, #tpu.memory_space<vmem>>, vector<1x1x32xf32>
    %43 = vector.shape_cast %42 : vector<1x1x32xf32> to vector<1x32xf32>
    %c12 = arith.constant 12 : index
    %c0_47 = arith.constant 0 : index
    %c0_48 = arith.constant 0 : index
    %44 = vector.load %arg5[%c12, %c0_47, %c0_48] : memref<29x1x32xf32, #tpu.memory_space<vmem>>, vector<1x1x32xf32>
    %45 = vector.shape_cast %44 : vector<1x1x32xf32> to vector<1x32xf32>
    %cst_49 = arith.constant dense<0.000000e+00> : vector<8xf32>
    %46 = vector.multi_reduction <add>, %11, %cst_49 [1] : vector<8x32xf32> to vector<8xf32>
    %47 = vector.shape_cast %46 : vector<8xf32> to vector<8x1xf32>
    %cst_50 = arith.constant 3.200000e+01 : f32
    %48 = vector.broadcast %cst_50 : f32 to vector<8x1xf32>
    %49 = arith.divf %47, %48 : vector<8x1xf32>
    %50 = arith.mulf %11, %11 : vector<8x32xf32>
    %cst_51 = arith.constant dense<0.000000e+00> : vector<8xf32>
    %51 = vector.multi_reduction <add>, %50, %cst_51 [1] : vector<8x32xf32> to vector<8xf32>
    %52 = vector.shape_cast %51 : vector<8xf32> to vector<8x1xf32>
    %cst_52 = arith.constant 3.200000e+01 : f32
    %53 = vector.broadcast %cst_52 : f32 to vector<8x1xf32>
    %54 = arith.divf %52, %53 : vector<8x1xf32>
    %55 = arith.mulf %49, %49 : vector<8x1xf32>
    %56 = arith.subf %54, %55 : vector<8x1xf32>
    %cst_53 = arith.constant 0.000000e+00 : f32
    %57 = vector.broadcast %cst_53 : f32 to vector<8x1xf32>
    %58 = arith.maximumf %56, %57 : vector<8x1xf32>
    %59 = vector.broadcast %49 : vector<8x1xf32> to vector<8x32xf32>
    %60 = arith.subf %11, %59 : vector<8x32xf32>
    %cst_54 = arith.constant 9.99999974E-6 : f32
    %61 = vector.broadcast %cst_54 : f32 to vector<8x1xf32>
    %62 = arith.addf %58, %61 : vector<8x1xf32>
    %63 = math.rsqrt %62 : vector<8x1xf32>
    %64 = vector.broadcast %63 : vector<8x1xf32> to vector<8x32xf32>
    %65 = arith.mulf %60, %64 : vector<8x32xf32>
    %66 = vector.broadcast %43 : vector<1x32xf32> to vector<8x32xf32>
    %67 = arith.mulf %65, %66 : vector<8x32xf32>
    %68 = vector.broadcast %45 : vector<1x32xf32> to vector<8x32xf32>
    %69 = arith.addf %67, %68 : vector<8x32xf32>
    %cst_55 = arith.constant dense<0.000000e+00> : vector<8x32xf32>
    %70 = tpu.matmul %69, %13, %cst_55 {dimension_numbers = #tpu.dot_dimension_numbers<[1], [0], [0], [1], [0, 0, 1, 1], [], []>} : vector<8x32xf32>, vector<32x32xf32>, vector<8x32xf32> -> vector<8x32xf32>
    %cst_56 = arith.constant dense<0.000000e+00> : vector<8x8xf32>
    %71 = tpu.matmul %70, %69, %cst_56 {dimension_numbers = #tpu.dot_dimension_numbers<[1], [1], [0], [0], [0, 0, 1, 0], [], []>} : vector<8x32xf32>, vector<8x32xf32>, vector<8x8xf32> -> vector<8x8xf32>
    %cst_57 = arith.constant dense<0.000000e+00> : vector<8x32xf32>
    %72 = tpu.matmul %69, %15, %cst_57 {dimension_numbers = #tpu.dot_dimension_numbers<[1], [0], [0], [1], [0, 0, 1, 1], [], []>} : vector<8x32xf32>, vector<32x32xf32>, vector<8x32xf32> -> vector<8x32xf32>
    %73 = vector.broadcast %31 : vector<1x32xf32> to vector<8x32xf32>
    %74 = arith.addf %72, %73 : vector<8x32xf32>
    %cst_58 = arith.constant dense<0xFF800000> : vector<8xf32>
    %75 = vector.multi_reduction <maximumf>, %71, %cst_58 [1] : vector<8x8xf32> to vector<8xf32>
    %76 = vector.shape_cast %75 : vector<8xf32> to vector<8x1xf32>
    %77 = vector.broadcast %76 : vector<8x1xf32> to vector<8x8xf32>
    %78 = arith.subf %71, %77 : vector<8x8xf32>
    %79 = math.exp %78 : vector<8x8xf32>
    %cst_59 = arith.constant dense<0.000000e+00> : vector<8xf32>
    %80 = vector.multi_reduction <add>, %79, %cst_59 [1] : vector<8x8xf32> to vector<8xf32>
    %81 = vector.shape_cast %80 : vector<8xf32> to vector<8x1xf32>
    %82 = vector.broadcast %81 : vector<8x1xf32> to vector<8x8xf32>
    %83 = arith.divf %79, %82 : vector<8x8xf32>
    %cst_60 = arith.constant dense<0.000000e+00> : vector<8xf32>
    %84 = vector.multi_reduction <add>, %83, %cst_60 [0] : vector<8x8xf32> to vector<8xf32>
    %85 = vector.shape_cast %84 : vector<8xf32> to vector<1x8xf32>
    %cst_61 = arith.constant 9.99999971E-10 : f32
    %86 = vector.broadcast %cst_61 : f32 to vector<1x8xf32>
    %87 = arith.addf %86, %85 : vector<1x8xf32>
    %88 = vector.broadcast %87 : vector<1x8xf32> to vector<8x8xf32>
    %89 = arith.divf %83, %88 : vector<8x8xf32>
    %cst_62 = arith.constant dense<0.000000e+00> : vector<8x32xf32>
    %90 = tpu.matmul %89, %74, %cst_62 {dimension_numbers = #tpu.dot_dimension_numbers<[0], [0], [1], [1], [0, 1, 1, 1], [], []>} : vector<8x8xf32>, vector<8x32xf32>, vector<8x32xf32> -> vector<8x32xf32>
    %91 = arith.subf %69, %90 : vector<8x32xf32>
    %cst_63 = arith.constant dense<0.000000e+00> : vector<8x32xf32>
    %92 = tpu.matmul %91, %17, %cst_63 {dimension_numbers = #tpu.dot_dimension_numbers<[1], [0], [0], [1], [0, 0, 1, 1], [], []>} : vector<8x32xf32>, vector<32x32xf32>, vector<8x32xf32> -> vector<8x32xf32>
    %93 = vector.broadcast %33 : vector<1x32xf32> to vector<8x32xf32>
    %94 = arith.addf %92, %93 : vector<8x32xf32>
    %cst_64 = arith.constant 0.000000e+00 : f32
    %95 = vector.broadcast %cst_64 : f32 to vector<8x32xf32>
    %96 = arith.maximumf %94, %95 : vector<8x32xf32>
    %97 = arith.addf %69, %96 : vector<8x32xf32>
    %cst_65 = arith.constant dense<0.000000e+00> : vector<8x32xf32>
    %98 = tpu.matmul %97, %19, %cst_65 {dimension_numbers = #tpu.dot_dimension_numbers<[1], [0], [0], [1], [0, 0, 1, 1], [], []>} : vector<8x32xf32>, vector<32x32xf32>, vector<8x32xf32> -> vector<8x32xf32>
    %cst_66 = arith.constant dense<0.000000e+00> : vector<8x8xf32>
    %99 = tpu.matmul %98, %97, %cst_66 {dimension_numbers = #tpu.dot_dimension_numbers<[1], [1], [0], [0], [0, 0, 1, 0], [], []>} : vector<8x32xf32>, vector<8x32xf32>, vector<8x8xf32> -> vector<8x8xf32>
    %cst_67 = arith.constant dense<0.000000e+00> : vector<8x32xf32>
    %100 = tpu.matmul %97, %21, %cst_67 {dimension_numbers = #tpu.dot_dimension_numbers<[1], [0], [0], [1], [0, 0, 1, 1], [], []>} : vector<8x32xf32>, vector<32x32xf32>, vector<8x32xf32> -> vector<8x32xf32>
    %101 = vector.broadcast %35 : vector<1x32xf32> to vector<8x32xf32>
    %102 = arith.addf %100, %101 : vector<8x32xf32>
    %cst_68 = arith.constant dense<0xFF800000> : vector<8xf32>
    %103 = vector.multi_reduction <maximumf>, %99, %cst_68 [1] : vector<8x8xf32> to vector<8xf32>
    %104 = vector.shape_cast %103 : vector<8xf32> to vector<8x1xf32>
    %105 = vector.broadcast %104 : vector<8x1xf32> to vector<8x8xf32>
    %106 = arith.subf %99, %105 : vector<8x8xf32>
    %107 = math.exp %106 : vector<8x8xf32>
    %cst_69 = arith.constant dense<0.000000e+00> : vector<8xf32>
    %108 = vector.multi_reduction <add>, %107, %cst_69 [1] : vector<8x8xf32> to vector<8xf32>
    %109 = vector.shape_cast %108 : vector<8xf32> to vector<8x1xf32>
    %110 = vector.broadcast %109 : vector<8x1xf32> to vector<8x8xf32>
    %111 = arith.divf %107, %110 : vector<8x8xf32>
    %cst_70 = arith.constant dense<0.000000e+00> : vector<8xf32>
    %112 = vector.multi_reduction <add>, %111, %cst_70 [0] : vector<8x8xf32> to vector<8xf32>
    %113 = vector.shape_cast %112 : vector<8xf32> to vector<1x8xf32>
    %cst_71 = arith.constant 9.99999971E-10 : f32
    %114 = vector.broadcast %cst_71 : f32 to vector<1x8xf32>
    %115 = arith.addf %114, %113 : vector<1x8xf32>
    %116 = vector.broadcast %115 : vector<1x8xf32> to vector<8x8xf32>
    %117 = arith.divf %111, %116 : vector<8x8xf32>
    %cst_72 = arith.constant dense<0.000000e+00> : vector<8x32xf32>
    %118 = tpu.matmul %117, %102, %cst_72 {dimension_numbers = #tpu.dot_dimension_numbers<[0], [0], [1], [1], [0, 1, 1, 1], [], []>} : vector<8x8xf32>, vector<8x32xf32>, vector<8x32xf32> -> vector<8x32xf32>
    %119 = arith.subf %97, %118 : vector<8x32xf32>
    %cst_73 = arith.constant dense<0.000000e+00> : vector<8x32xf32>
    %120 = tpu.matmul %119, %23, %cst_73 {dimension_numbers = #tpu.dot_dimension_numbers<[1], [0], [0], [1], [0, 0, 1, 1], [], []>} : vector<8x32xf32>, vector<32x32xf32>, vector<8x32xf32> -> vector<8x32xf32>
    %121 = vector.broadcast %37 : vector<1x32xf32> to vector<8x32xf32>
    %122 = arith.addf %120, %121 : vector<8x32xf32>
    %cst_74 = arith.constant 0.000000e+00 : f32
    %123 = vector.broadcast %cst_74 : f32 to vector<8x32xf32>
    %124 = arith.maximumf %122, %123 : vector<8x32xf32>
    %125 = arith.addf %97, %124 : vector<8x32xf32>
    %cst_75 = arith.constant dense<0.000000e+00> : vector<8x32xf32>
    %126 = tpu.matmul %97, %25, %cst_75 {dimension_numbers = #tpu.dot_dimension_numbers<[1], [0], [0], [1], [0, 0, 1, 1], [], []>} : vector<8x32xf32>, vector<32x32xf32>, vector<8x32xf32> -> vector<8x32xf32>
    %127 = arith.addf %11, %126 : vector<8x32xf32>
    %cst_76 = arith.constant dense<0.000000e+00> : vector<8x32xf32>
    %128 = tpu.matmul %125, %27, %cst_76 {dimension_numbers = #tpu.dot_dimension_numbers<[1], [0], [0], [1], [0, 0, 1, 1], [], []>} : vector<8x32xf32>, vector<32x32xf32>, vector<8x32xf32> -> vector<8x32xf32>
    %129 = arith.addf %127, %128 : vector<8x32xf32>
    %130 = vector.broadcast %39 : vector<1x32xf32> to vector<8x32xf32>
    %131 = arith.addf %129, %130 : vector<8x32xf32>
    %cst_77 = arith.constant dense<0.000000e+00> : vector<8xf32>
    %132 = vector.multi_reduction <add>, %131, %cst_77 [1] : vector<8x32xf32> to vector<8xf32>
    %133 = vector.shape_cast %132 : vector<8xf32> to vector<8x1xf32>
    %cst_78 = arith.constant 3.200000e+01 : f32
    %134 = vector.broadcast %cst_78 : f32 to vector<8x1xf32>
    %135 = arith.divf %133, %134 : vector<8x1xf32>
    %136 = arith.mulf %131, %131 : vector<8x32xf32>
    %cst_79 = arith.constant dense<0.000000e+00> : vector<8xf32>
    %137 = vector.multi_reduction <add>, %136, %cst_79 [1] : vector<8x32xf32> to vector<8xf32>
    %138 = vector.shape_cast %137 : vector<8xf32> to vector<8x1xf32>
    %cst_80 = arith.constant 3.200000e+01 : f32
    %139 = vector.broadcast %cst_80 : f32 to vector<8x1xf32>
    %140 = arith.divf %138, %139 : vector<8x1xf32>
    %141 = arith.mulf %135, %135 : vector<8x1xf32>
    %142 = arith.subf %140, %141 : vector<8x1xf32>
    %cst_81 = arith.constant 0.000000e+00 : f32
    %143 = vector.broadcast %cst_81 : f32 to vector<8x1xf32>
    %144 = arith.maximumf %142, %143 : vector<8x1xf32>
    %145 = vector.broadcast %135 : vector<8x1xf32> to vector<8x32xf32>
    %146 = arith.subf %131, %145 : vector<8x32xf32>
    %cst_82 = arith.constant 9.99999974E-6 : f32
    %147 = vector.broadcast %cst_82 : f32 to vector<8x1xf32>
    %148 = arith.addf %144, %147 : vector<8x1xf32>
    %149 = math.rsqrt %148 : vector<8x1xf32>
    %150 = vector.broadcast %149 : vector<8x1xf32> to vector<8x32xf32>
    %151 = arith.mulf %146, %150 : vector<8x32xf32>
    %152 = vector.broadcast %43 : vector<1x32xf32> to vector<8x32xf32>
    %153 = arith.mulf %151, %152 : vector<8x32xf32>
    %154 = vector.broadcast %45 : vector<1x32xf32> to vector<8x32xf32>
    %155 = arith.addf %153, %154 : vector<8x32xf32>
    %cst_83 = arith.constant dense<0.000000e+00> : vector<8x32xf32>
    %156 = tpu.matmul %155, %29, %cst_83 {dimension_numbers = #tpu.dot_dimension_numbers<[1], [0], [0], [1], [0, 0, 1, 1], [], []>} : vector<8x32xf32>, vector<32x32xf32>, vector<8x32xf32> -> vector<8x32xf32>
    %157 = vector.broadcast %41 : vector<1x32xf32> to vector<8x32xf32>
    %158 = arith.addf %156, %157 : vector<8x32xf32>
    %159 = math.exp %158 : vector<8x32xf32>
    %cst_84 = arith.constant 1.000000e+00 : f32
    %160 = vector.broadcast %cst_84 : f32 to vector<8x32xf32>
    %161 = arith.addf %160, %159 : vector<8x32xf32>
    %162 = arith.mulf %161, %161 : vector<8x32xf32>
    %cst_85 = arith.constant 1.000000e+00 : f32
    %163 = vector.broadcast %cst_85 : f32 to vector<8x32xf32>
    %164 = arith.addf %162, %163 : vector<8x32xf32>
    %cst_86 = arith.constant 2.000000e+00 : f32
    %165 = vector.broadcast %cst_86 : f32 to vector<8x32xf32>
    %166 = arith.divf %165, %164 : vector<8x32xf32>
    %cst_87 = arith.constant 1.000000e+00 : f32
    %167 = vector.broadcast %cst_87 : f32 to vector<8x32xf32>
    %168 = arith.subf %167, %166 : vector<8x32xf32>
    %169 = arith.mulf %158, %168 : vector<8x32xf32>
    %170 = arith.addf %131, %169 : vector<8x32xf32>
    %cst_88 = arith.constant dense<0.000000e+00> : vector<8xf32>
    %171 = vector.multi_reduction <add>, %170, %cst_88 [1] : vector<8x32xf32> to vector<8xf32>
    %172 = vector.shape_cast %171 : vector<8xf32> to vector<8x1xf32>
    %cst_89 = arith.constant 3.200000e+01 : f32
    %173 = vector.broadcast %cst_89 : f32 to vector<8x1xf32>
    %174 = arith.divf %172, %173 : vector<8x1xf32>
    %175 = arith.mulf %170, %170 : vector<8x32xf32>
    %cst_90 = arith.constant dense<0.000000e+00> : vector<8xf32>
    %176 = vector.multi_reduction <add>, %175, %cst_90 [1] : vector<8x32xf32> to vector<8xf32>
    %177 = vector.shape_cast %176 : vector<8xf32> to vector<8x1xf32>
    %cst_91 = arith.constant 3.200000e+01 : f32
    %178 = vector.broadcast %cst_91 : f32 to vector<8x1xf32>
    %179 = arith.divf %177, %178 : vector<8x1xf32>
    %180 = arith.mulf %174, %174 : vector<8x1xf32>
    %181 = arith.subf %179, %180 : vector<8x1xf32>
    %cst_92 = arith.constant 0.000000e+00 : f32
    %182 = vector.broadcast %cst_92 : f32 to vector<8x1xf32>
    %183 = arith.maximumf %181, %182 : vector<8x1xf32>
    %184 = vector.broadcast %174 : vector<8x1xf32> to vector<8x32xf32>
    %185 = arith.subf %170, %184 : vector<8x32xf32>
    %cst_93 = arith.constant 9.99999974E-6 : f32
    %186 = vector.broadcast %cst_93 : f32 to vector<8x1xf32>
    %187 = arith.addf %183, %186 : vector<8x1xf32>
    %188 = math.rsqrt %187 : vector<8x1xf32>
    %189 = vector.broadcast %188 : vector<8x1xf32> to vector<8x32xf32>
    %190 = arith.mulf %185, %189 : vector<8x32xf32>
    %191 = vector.broadcast %43 : vector<1x32xf32> to vector<8x32xf32>
    %192 = arith.mulf %190, %191 : vector<8x32xf32>
    %193 = vector.broadcast %45 : vector<1x32xf32> to vector<8x32xf32>
    %194 = arith.addf %192, %193 : vector<8x32xf32>
    %c9_94 = arith.constant 9 : index
    %c0_95 = arith.constant 0 : index
    %c0_96 = arith.constant 0 : index
    %195 = vector.load %arg4[%c9_94, %c0_95, %c0_96] : memref<27x32x32xf32, #tpu.memory_space<vmem>>, vector<1x32x32xf32>
    %196 = vector.shape_cast %195 : vector<1x32x32xf32> to vector<32x32xf32>
    %c10_97 = arith.constant 10 : index
    %c0_98 = arith.constant 0 : index
    %c0_99 = arith.constant 0 : index
    %197 = vector.load %arg4[%c10_97, %c0_98, %c0_99] : memref<27x32x32xf32, #tpu.memory_space<vmem>>, vector<1x32x32xf32>
    %198 = vector.shape_cast %197 : vector<1x32x32xf32> to vector<32x32xf32>
    %c11_100 = arith.constant 11 : index
    %c0_101 = arith.constant 0 : index
    %c0_102 = arith.constant 0 : index
    %199 = vector.load %arg4[%c11_100, %c0_101, %c0_102] : memref<27x32x32xf32, #tpu.memory_space<vmem>>, vector<1x32x32xf32>
    %200 = vector.shape_cast %199 : vector<1x32x32xf32> to vector<32x32xf32>
    %c12_103 = arith.constant 12 : index
    %c0_104 = arith.constant 0 : index
    %c0_105 = arith.constant 0 : index
    %201 = vector.load %arg4[%c12_103, %c0_104, %c0_105] : memref<27x32x32xf32, #tpu.memory_space<vmem>>, vector<1x32x32xf32>
    %202 = vector.shape_cast %201 : vector<1x32x32xf32> to vector<32x32xf32>
    %c13 = arith.constant 13 : index
    %c0_106 = arith.constant 0 : index
    %c0_107 = arith.constant 0 : index
    %203 = vector.load %arg4[%c13, %c0_106, %c0_107] : memref<27x32x32xf32, #tpu.memory_space<vmem>>, vector<1x32x32xf32>
    %204 = vector.shape_cast %203 : vector<1x32x32xf32> to vector<32x32xf32>
    %c14 = arith.constant 14 : index
    %c0_108 = arith.constant 0 : index
    %c0_109 = arith.constant 0 : index
    %205 = vector.load %arg4[%c14, %c0_108, %c0_109] : memref<27x32x32xf32, #tpu.memory_space<vmem>>, vector<1x32x32xf32>
    %206 = vector.shape_cast %205 : vector<1x32x32xf32> to vector<32x32xf32>
    %c15 = arith.constant 15 : index
    %c0_110 = arith.constant 0 : index
    %c0_111 = arith.constant 0 : index
    %207 = vector.load %arg4[%c15, %c0_110, %c0_111] : memref<27x32x32xf32, #tpu.memory_space<vmem>>, vector<1x32x32xf32>
    %208 = vector.shape_cast %207 : vector<1x32x32xf32> to vector<32x32xf32>
    %c16 = arith.constant 16 : index
    %c0_112 = arith.constant 0 : index
    %c0_113 = arith.constant 0 : index
    %209 = vector.load %arg4[%c16, %c0_112, %c0_113] : memref<27x32x32xf32, #tpu.memory_space<vmem>>, vector<1x32x32xf32>
    %210 = vector.shape_cast %209 : vector<1x32x32xf32> to vector<32x32xf32>
    %c17 = arith.constant 17 : index
    %c0_114 = arith.constant 0 : index
    %c0_115 = arith.constant 0 : index
    %211 = vector.load %arg4[%c17, %c0_114, %c0_115] : memref<27x32x32xf32, #tpu.memory_space<vmem>>, vector<1x32x32xf32>
    %212 = vector.shape_cast %211 : vector<1x32x32xf32> to vector<32x32xf32>
    %c13_116 = arith.constant 13 : index
    %c0_117 = arith.constant 0 : index
    %c0_118 = arith.constant 0 : index
    %213 = vector.load %arg5[%c13_116, %c0_117, %c0_118] : memref<29x1x32xf32, #tpu.memory_space<vmem>>, vector<1x1x32xf32>
    %214 = vector.shape_cast %213 : vector<1x1x32xf32> to vector<1x32xf32>
    %c14_119 = arith.constant 14 : index
    %c0_120 = arith.constant 0 : index
    %c0_121 = arith.constant 0 : index
    %215 = vector.load %arg5[%c14_119, %c0_120, %c0_121] : memref<29x1x32xf32, #tpu.memory_space<vmem>>, vector<1x1x32xf32>
    %216 = vector.shape_cast %215 : vector<1x1x32xf32> to vector<1x32xf32>
    %c15_122 = arith.constant 15 : index
    %c0_123 = arith.constant 0 : index
    %c0_124 = arith.constant 0 : index
    %217 = vector.load %arg5[%c15_122, %c0_123, %c0_124] : memref<29x1x32xf32, #tpu.memory_space<vmem>>, vector<1x1x32xf32>
    %218 = vector.shape_cast %217 : vector<1x1x32xf32> to vector<1x32xf32>
    %c16_125 = arith.constant 16 : index
    %c0_126 = arith.constant 0 : index
    %c0_127 = arith.constant 0 : index
    %219 = vector.load %arg5[%c16_125, %c0_126, %c0_127] : memref<29x1x32xf32, #tpu.memory_space<vmem>>, vector<1x1x32xf32>
    %220 = vector.shape_cast %219 : vector<1x1x32xf32> to vector<1x32xf32>
    %c17_128 = arith.constant 17 : index
    %c0_129 = arith.constant 0 : index
    %c0_130 = arith.constant 0 : index
    %221 = vector.load %arg5[%c17_128, %c0_129, %c0_130] : memref<29x1x32xf32, #tpu.memory_space<vmem>>, vector<1x1x32xf32>
    %222 = vector.shape_cast %221 : vector<1x1x32xf32> to vector<1x32xf32>
    %c18 = arith.constant 18 : index
    %c0_131 = arith.constant 0 : index
    %c0_132 = arith.constant 0 : index
    %223 = vector.load %arg5[%c18, %c0_131, %c0_132] : memref<29x1x32xf32, #tpu.memory_space<vmem>>, vector<1x1x32xf32>
    %224 = vector.shape_cast %223 : vector<1x1x32xf32> to vector<1x32xf32>
    %c19 = arith.constant 19 : index
    %c0_133 = arith.constant 0 : index
    %c0_134 = arith.constant 0 : index
    %225 = vector.load %arg5[%c19, %c0_133, %c0_134] : memref<29x1x32xf32, #tpu.memory_space<vmem>>, vector<1x1x32xf32>
    %226 = vector.shape_cast %225 : vector<1x1x32xf32> to vector<1x32xf32>
    %c20 = arith.constant 20 : index
    %c0_135 = arith.constant 0 : index
    %c0_136 = arith.constant 0 : index
    %227 = vector.load %arg5[%c20, %c0_135, %c0_136] : memref<29x1x32xf32, #tpu.memory_space<vmem>>, vector<1x1x32xf32>
    %228 = vector.shape_cast %227 : vector<1x1x32xf32> to vector<1x32xf32>
    %cst_137 = arith.constant dense<0.000000e+00> : vector<8xf32>
    %229 = vector.multi_reduction <add>, %194, %cst_137 [1] : vector<8x32xf32> to vector<8xf32>
    %230 = vector.shape_cast %229 : vector<8xf32> to vector<8x1xf32>
    %cst_138 = arith.constant 3.200000e+01 : f32
    %231 = vector.broadcast %cst_138 : f32 to vector<8x1xf32>
    %232 = arith.divf %230, %231 : vector<8x1xf32>
    %233 = arith.mulf %194, %194 : vector<8x32xf32>
    %cst_139 = arith.constant dense<0.000000e+00> : vector<8xf32>
    %234 = vector.multi_reduction <add>, %233, %cst_139 [1] : vector<8x32xf32> to vector<8xf32>
    %235 = vector.shape_cast %234 : vector<8xf32> to vector<8x1xf32>
    %cst_140 = arith.constant 3.200000e+01 : f32
    %236 = vector.broadcast %cst_140 : f32 to vector<8x1xf32>
    %237 = arith.divf %235, %236 : vector<8x1xf32>
    %238 = arith.mulf %232, %232 : vector<8x1xf32>
    %239 = arith.subf %237, %238 : vector<8x1xf32>
    %cst_141 = arith.constant 0.000000e+00 : f32
    %240 = vector.broadcast %cst_141 : f32 to vector<8x1xf32>
    %241 = arith.maximumf %239, %240 : vector<8x1xf32>
    %242 = vector.broadcast %232 : vector<8x1xf32> to vector<8x32xf32>
    %243 = arith.subf %194, %242 : vector<8x32xf32>
    %cst_142 = arith.constant 9.99999974E-6 : f32
    %244 = vector.broadcast %cst_142 : f32 to vector<8x1xf32>
    %245 = arith.addf %241, %244 : vector<8x1xf32>
    %246 = math.rsqrt %245 : vector<8x1xf32>
    %247 = vector.broadcast %246 : vector<8x1xf32> to vector<8x32xf32>
    %248 = arith.mulf %243, %247 : vector<8x32xf32>
    %249 = vector.broadcast %226 : vector<1x32xf32> to vector<8x32xf32>
    %250 = arith.mulf %248, %249 : vector<8x32xf32>
    %251 = vector.broadcast %228 : vector<1x32xf32> to vector<8x32xf32>
    %252 = arith.addf %250, %251 : vector<8x32xf32>
    %cst_143 = arith.constant dense<0.000000e+00> : vector<8x32xf32>
    %253 = tpu.matmul %252, %196, %cst_143 {dimension_numbers = #tpu.dot_dimension_numbers<[1], [0], [0], [1], [0, 0, 1, 1], [], []>} : vector<8x32xf32>, vector<32x32xf32>, vector<8x32xf32> -> vector<8x32xf32>
    %cst_144 = arith.constant dense<0.000000e+00> : vector<8x8xf32>
    %254 = tpu.matmul %253, %252, %cst_144 {dimension_numbers = #tpu.dot_dimension_numbers<[1], [1], [0], [0], [0, 0, 1, 0], [], []>} : vector<8x32xf32>, vector<8x32xf32>, vector<8x8xf32> -> vector<8x8xf32>
    %cst_145 = arith.constant dense<0.000000e+00> : vector<8x32xf32>
    %255 = tpu.matmul %252, %198, %cst_145 {dimension_numbers = #tpu.dot_dimension_numbers<[1], [0], [0], [1], [0, 0, 1, 1], [], []>} : vector<8x32xf32>, vector<32x32xf32>, vector<8x32xf32> -> vector<8x32xf32>
    %256 = vector.broadcast %214 : vector<1x32xf32> to vector<8x32xf32>
    %257 = arith.addf %255, %256 : vector<8x32xf32>
    %cst_146 = arith.constant dense<0xFF800000> : vector<8xf32>
    %258 = vector.multi_reduction <maximumf>, %254, %cst_146 [1] : vector<8x8xf32> to vector<8xf32>
    %259 = vector.shape_cast %258 : vector<8xf32> to vector<8x1xf32>
    %260 = vector.broadcast %259 : vector<8x1xf32> to vector<8x8xf32>
    %261 = arith.subf %254, %260 : vector<8x8xf32>
    %262 = math.exp %261 : vector<8x8xf32>
    %cst_147 = arith.constant dense<0.000000e+00> : vector<8xf32>
    %263 = vector.multi_reduction <add>, %262, %cst_147 [1] : vector<8x8xf32> to vector<8xf32>
    %264 = vector.shape_cast %263 : vector<8xf32> to vector<8x1xf32>
    %265 = vector.broadcast %264 : vector<8x1xf32> to vector<8x8xf32>
    %266 = arith.divf %262, %265 : vector<8x8xf32>
    %cst_148 = arith.constant dense<0.000000e+00> : vector<8xf32>
    %267 = vector.multi_reduction <add>, %266, %cst_148 [0] : vector<8x8xf32> to vector<8xf32>
    %268 = vector.shape_cast %267 : vector<8xf32> to vector<1x8xf32>
    %cst_149 = arith.constant 9.99999971E-10 : f32
    %269 = vector.broadcast %cst_149 : f32 to vector<1x8xf32>
    %270 = arith.addf %269, %268 : vector<1x8xf32>
    %271 = vector.broadcast %270 : vector<1x8xf32> to vector<8x8xf32>
    %272 = arith.divf %266, %271 : vector<8x8xf32>
    %cst_150 = arith.constant dense<0.000000e+00> : vector<8x32xf32>
    %273 = tpu.matmul %272, %257, %cst_150 {dimension_numbers = #tpu.dot_dimension_numbers<[0], [0], [1], [1], [0, 1, 1, 1], [], []>} : vector<8x8xf32>, vector<8x32xf32>, vector<8x32xf32> -> vector<8x32xf32>
    %274 = arith.subf %252, %273 : vector<8x32xf32>
    %cst_151 = arith.constant dense<0.000000e+00> : vector<8x32xf32>
    %275 = tpu.matmul %274, %200, %cst_151 {dimension_numbers = #tpu.dot_dimension_numbers<[1], [0], [0], [1], [0, 0, 1, 1], [], []>} : vector<8x32xf32>, vector<32x32xf32>, vector<8x32xf32> -> vector<8x32xf32>
    %276 = vector.broadcast %216 : vector<1x32xf32> to vector<8x32xf32>
    %277 = arith.addf %275, %276 : vector<8x32xf32>
    %cst_152 = arith.constant 0.000000e+00 : f32
    %278 = vector.broadcast %cst_152 : f32 to vector<8x32xf32>
    %279 = arith.maximumf %277, %278 : vector<8x32xf32>
    %280 = arith.addf %252, %279 : vector<8x32xf32>
    %cst_153 = arith.constant dense<0.000000e+00> : vector<8x32xf32>
    %281 = tpu.matmul %280, %202, %cst_153 {dimension_numbers = #tpu.dot_dimension_numbers<[1], [0], [0], [1], [0, 0, 1, 1], [], []>} : vector<8x32xf32>, vector<32x32xf32>, vector<8x32xf32> -> vector<8x32xf32>
    %cst_154 = arith.constant dense<0.000000e+00> : vector<8x8xf32>
    %282 = tpu.matmul %281, %280, %cst_154 {dimension_numbers = #tpu.dot_dimension_numbers<[1], [1], [0], [0], [0, 0, 1, 0], [], []>} : vector<8x32xf32>, vector<8x32xf32>, vector<8x8xf32> -> vector<8x8xf32>
    %cst_155 = arith.constant dense<0.000000e+00> : vector<8x32xf32>
    %283 = tpu.matmul %280, %204, %cst_155 {dimension_numbers = #tpu.dot_dimension_numbers<[1], [0], [0], [1], [0, 0, 1, 1], [], []>} : vector<8x32xf32>, vector<32x32xf32>, vector<8x32xf32> -> vector<8x32xf32>
    %284 = vector.broadcast %218 : vector<1x32xf32> to vector<8x32xf32>
    %285 = arith.addf %283, %284 : vector<8x32xf32>
    %cst_156 = arith.constant dense<0xFF800000> : vector<8xf32>
    %286 = vector.multi_reduction <maximumf>, %282, %cst_156 [1] : vector<8x8xf32> to vector<8xf32>
    %287 = vector.shape_cast %286 : vector<8xf32> to vector<8x1xf32>
    %288 = vector.broadcast %287 : vector<8x1xf32> to vector<8x8xf32>
    %289 = arith.subf %282, %288 : vector<8x8xf32>
    %290 = math.exp %289 : vector<8x8xf32>
    %cst_157 = arith.constant dense<0.000000e+00> : vector<8xf32>
    %291 = vector.multi_reduction <add>, %290, %cst_157 [1] : vector<8x8xf32> to vector<8xf32>
    %292 = vector.shape_cast %291 : vector<8xf32> to vector<8x1xf32>
    %293 = vector.broadcast %292 : vector<8x1xf32> to vector<8x8xf32>
    %294 = arith.divf %290, %293 : vector<8x8xf32>
    %cst_158 = arith.constant dense<0.000000e+00> : vector<8xf32>
    %295 = vector.multi_reduction <add>, %294, %cst_158 [0] : vector<8x8xf32> to vector<8xf32>
    %296 = vector.shape_cast %295 : vector<8xf32> to vector<1x8xf32>
    %cst_159 = arith.constant 9.99999971E-10 : f32
    %297 = vector.broadcast %cst_159 : f32 to vector<1x8xf32>
    %298 = arith.addf %297, %296 : vector<1x8xf32>
    %299 = vector.broadcast %298 : vector<1x8xf32> to vector<8x8xf32>
    %300 = arith.divf %294, %299 : vector<8x8xf32>
    %cst_160 = arith.constant dense<0.000000e+00> : vector<8x32xf32>
    %301 = tpu.matmul %300, %285, %cst_160 {dimension_numbers = #tpu.dot_dimension_numbers<[0], [0], [1], [1], [0, 1, 1, 1], [], []>} : vector<8x8xf32>, vector<8x32xf32>, vector<8x32xf32> -> vector<8x32xf32>
    %302 = arith.subf %280, %301 : vector<8x32xf32>
    %cst_161 = arith.constant dense<0.000000e+00> : vector<8x32xf32>
    %303 = tpu.matmul %302, %206, %cst_161 {dimension_numbers = #tpu.dot_dimension_numbers<[1], [0], [0], [1], [0, 0, 1, 1], [], []>} : vector<8x32xf32>, vector<32x32xf32>, vector<8x32xf32> -> vector<8x32xf32>
    %304 = vector.broadcast %220 : vector<1x32xf32> to vector<8x32xf32>
    %305 = arith.addf %303, %304 : vector<8x32xf32>
    %cst_162 = arith.constant 0.000000e+00 : f32
    %306 = vector.broadcast %cst_162 : f32 to vector<8x32xf32>
    %307 = arith.maximumf %305, %306 : vector<8x32xf32>
    %308 = arith.addf %280, %307 : vector<8x32xf32>
    %cst_163 = arith.constant dense<0.000000e+00> : vector<8x32xf32>
    %309 = tpu.matmul %280, %208, %cst_163 {dimension_numbers = #tpu.dot_dimension_numbers<[1], [0], [0], [1], [0, 0, 1, 1], [], []>} : vector<8x32xf32>, vector<32x32xf32>, vector<8x32xf32> -> vector<8x32xf32>
    %310 = arith.addf %194, %309 : vector<8x32xf32>
    %cst_164 = arith.constant dense<0.000000e+00> : vector<8x32xf32>
    %311 = tpu.matmul %308, %210, %cst_164 {dimension_numbers = #tpu.dot_dimension_numbers<[1], [0], [0], [1], [0, 0, 1, 1], [], []>} : vector<8x32xf32>, vector<32x32xf32>, vector<8x32xf32> -> vector<8x32xf32>
    %312 = arith.addf %310, %311 : vector<8x32xf32>
    %313 = vector.broadcast %222 : vector<1x32xf32> to vector<8x32xf32>
    %314 = arith.addf %312, %313 : vector<8x32xf32>
    %cst_165 = arith.constant dense<0.000000e+00> : vector<8xf32>
    %315 = vector.multi_reduction <add>, %314, %cst_165 [1] : vector<8x32xf32> to vector<8xf32>
    %316 = vector.shape_cast %315 : vector<8xf32> to vector<8x1xf32>
    %cst_166 = arith.constant 3.200000e+01 : f32
    %317 = vector.broadcast %cst_166 : f32 to vector<8x1xf32>
    %318 = arith.divf %316, %317 : vector<8x1xf32>
    %319 = arith.mulf %314, %314 : vector<8x32xf32>
    %cst_167 = arith.constant dense<0.000000e+00> : vector<8xf32>
    %320 = vector.multi_reduction <add>, %319, %cst_167 [1] : vector<8x32xf32> to vector<8xf32>
    %321 = vector.shape_cast %320 : vector<8xf32> to vector<8x1xf32>
    %cst_168 = arith.constant 3.200000e+01 : f32
    %322 = vector.broadcast %cst_168 : f32 to vector<8x1xf32>
    %323 = arith.divf %321, %322 : vector<8x1xf32>
    %324 = arith.mulf %318, %318 : vector<8x1xf32>
    %325 = arith.subf %323, %324 : vector<8x1xf32>
    %cst_169 = arith.constant 0.000000e+00 : f32
    %326 = vector.broadcast %cst_169 : f32 to vector<8x1xf32>
    %327 = arith.maximumf %325, %326 : vector<8x1xf32>
    %328 = vector.broadcast %318 : vector<8x1xf32> to vector<8x32xf32>
    %329 = arith.subf %314, %328 : vector<8x32xf32>
    %cst_170 = arith.constant 9.99999974E-6 : f32
    %330 = vector.broadcast %cst_170 : f32 to vector<8x1xf32>
    %331 = arith.addf %327, %330 : vector<8x1xf32>
    %332 = math.rsqrt %331 : vector<8x1xf32>
    %333 = vector.broadcast %332 : vector<8x1xf32> to vector<8x32xf32>
    %334 = arith.mulf %329, %333 : vector<8x32xf32>
    %335 = vector.broadcast %226 : vector<1x32xf32> to vector<8x32xf32>
    %336 = arith.mulf %334, %335 : vector<8x32xf32>
    %337 = vector.broadcast %228 : vector<1x32xf32> to vector<8x32xf32>
    %338 = arith.addf %336, %337 : vector<8x32xf32>
    %cst_171 = arith.constant dense<0.000000e+00> : vector<8x32xf32>
    %339 = tpu.matmul %338, %212, %cst_171 {dimension_numbers = #tpu.dot_dimension_numbers<[1], [0], [0], [1], [0, 0, 1, 1], [], []>} : vector<8x32xf32>, vector<32x32xf32>, vector<8x32xf32> -> vector<8x32xf32>
    %340 = vector.broadcast %224 : vector<1x32xf32> to vector<8x32xf32>
    %341 = arith.addf %339, %340 : vector<8x32xf32>
    %342 = math.exp %341 : vector<8x32xf32>
    %cst_172 = arith.constant 1.000000e+00 : f32
    %343 = vector.broadcast %cst_172 : f32 to vector<8x32xf32>
    %344 = arith.addf %343, %342 : vector<8x32xf32>
    %345 = arith.mulf %344, %344 : vector<8x32xf32>
    %cst_173 = arith.constant 1.000000e+00 : f32
    %346 = vector.broadcast %cst_173 : f32 to vector<8x32xf32>
    %347 = arith.addf %345, %346 : vector<8x32xf32>
    %cst_174 = arith.constant 2.000000e+00 : f32
    %348 = vector.broadcast %cst_174 : f32 to vector<8x32xf32>
    %349 = arith.divf %348, %347 : vector<8x32xf32>
    %cst_175 = arith.constant 1.000000e+00 : f32
    %350 = vector.broadcast %cst_175 : f32 to vector<8x32xf32>
    %351 = arith.subf %350, %349 : vector<8x32xf32>
    %352 = arith.mulf %341, %351 : vector<8x32xf32>
    %353 = arith.addf %314, %352 : vector<8x32xf32>
    %cst_176 = arith.constant dense<0.000000e+00> : vector<8xf32>
    %354 = vector.multi_reduction <add>, %353, %cst_176 [1] : vector<8x32xf32> to vector<8xf32>
    %355 = vector.shape_cast %354 : vector<8xf32> to vector<8x1xf32>
    %cst_177 = arith.constant 3.200000e+01 : f32
    %356 = vector.broadcast %cst_177 : f32 to vector<8x1xf32>
    %357 = arith.divf %355, %356 : vector<8x1xf32>
    %358 = arith.mulf %353, %353 : vector<8x32xf32>
    %cst_178 = arith.constant dense<0.000000e+00> : vector<8xf32>
    %359 = vector.multi_reduction <add>, %358, %cst_178 [1] : vector<8x32xf32> to vector<8xf32>
    %360 = vector.shape_cast %359 : vector<8xf32> to vector<8x1xf32>
    %cst_179 = arith.constant 3.200000e+01 : f32
    %361 = vector.broadcast %cst_179 : f32 to vector<8x1xf32>
    %362 = arith.divf %360, %361 : vector<8x1xf32>
    %363 = arith.mulf %357, %357 : vector<8x1xf32>
    %364 = arith.subf %362, %363 : vector<8x1xf32>
    %cst_180 = arith.constant 0.000000e+00 : f32
    %365 = vector.broadcast %cst_180 : f32 to vector<8x1xf32>
    %366 = arith.maximumf %364, %365 : vector<8x1xf32>
    %367 = vector.broadcast %357 : vector<8x1xf32> to vector<8x32xf32>
    %368 = arith.subf %353, %367 : vector<8x32xf32>
    %cst_181 = arith.constant 9.99999974E-6 : f32
    %369 = vector.broadcast %cst_181 : f32 to vector<8x1xf32>
    %370 = arith.addf %366, %369 : vector<8x1xf32>
    %371 = math.rsqrt %370 : vector<8x1xf32>
    %372 = vector.broadcast %371 : vector<8x1xf32> to vector<8x32xf32>
    %373 = arith.mulf %368, %372 : vector<8x32xf32>
    %374 = vector.broadcast %226 : vector<1x32xf32> to vector<8x32xf32>
    %375 = arith.mulf %373, %374 : vector<8x32xf32>
    %376 = vector.broadcast %228 : vector<1x32xf32> to vector<8x32xf32>
    %377 = arith.addf %375, %376 : vector<8x32xf32>
    %c18_182 = arith.constant 18 : index
    %c0_183 = arith.constant 0 : index
    %c0_184 = arith.constant 0 : index
    %378 = vector.load %arg4[%c18_182, %c0_183, %c0_184] : memref<27x32x32xf32, #tpu.memory_space<vmem>>, vector<1x32x32xf32>
    %379 = vector.shape_cast %378 : vector<1x32x32xf32> to vector<32x32xf32>
    %c19_185 = arith.constant 19 : index
    %c0_186 = arith.constant 0 : index
    %c0_187 = arith.constant 0 : index
    %380 = vector.load %arg4[%c19_185, %c0_186, %c0_187] : memref<27x32x32xf32, #tpu.memory_space<vmem>>, vector<1x32x32xf32>
    %381 = vector.shape_cast %380 : vector<1x32x32xf32> to vector<32x32xf32>
    %c20_188 = arith.constant 20 : index
    %c0_189 = arith.constant 0 : index
    %c0_190 = arith.constant 0 : index
    %382 = vector.load %arg4[%c20_188, %c0_189, %c0_190] : memref<27x32x32xf32, #tpu.memory_space<vmem>>, vector<1x32x32xf32>
    %383 = vector.shape_cast %382 : vector<1x32x32xf32> to vector<32x32xf32>
    %c21 = arith.constant 21 : index
    %c0_191 = arith.constant 0 : index
    %c0_192 = arith.constant 0 : index
    %384 = vector.load %arg4[%c21, %c0_191, %c0_192] : memref<27x32x32xf32, #tpu.memory_space<vmem>>, vector<1x32x32xf32>
    %385 = vector.shape_cast %384 : vector<1x32x32xf32> to vector<32x32xf32>
    %c22 = arith.constant 22 : index
    %c0_193 = arith.constant 0 : index
    %c0_194 = arith.constant 0 : index
    %386 = vector.load %arg4[%c22, %c0_193, %c0_194] : memref<27x32x32xf32, #tpu.memory_space<vmem>>, vector<1x32x32xf32>
    %387 = vector.shape_cast %386 : vector<1x32x32xf32> to vector<32x32xf32>
    %c23 = arith.constant 23 : index
    %c0_195 = arith.constant 0 : index
    %c0_196 = arith.constant 0 : index
    %388 = vector.load %arg4[%c23, %c0_195, %c0_196] : memref<27x32x32xf32, #tpu.memory_space<vmem>>, vector<1x32x32xf32>
    %389 = vector.shape_cast %388 : vector<1x32x32xf32> to vector<32x32xf32>
    %c24 = arith.constant 24 : index
    %c0_197 = arith.constant 0 : index
    %c0_198 = arith.constant 0 : index
    %390 = vector.load %arg4[%c24, %c0_197, %c0_198] : memref<27x32x32xf32, #tpu.memory_space<vmem>>, vector<1x32x32xf32>
    %391 = vector.shape_cast %390 : vector<1x32x32xf32> to vector<32x32xf32>
    %c25 = arith.constant 25 : index
    %c0_199 = arith.constant 0 : index
    %c0_200 = arith.constant 0 : index
    %392 = vector.load %arg4[%c25, %c0_199, %c0_200] : memref<27x32x32xf32, #tpu.memory_space<vmem>>, vector<1x32x32xf32>
    %393 = vector.shape_cast %392 : vector<1x32x32xf32> to vector<32x32xf32>
    %c26 = arith.constant 26 : index
    %c0_201 = arith.constant 0 : index
    %c0_202 = arith.constant 0 : index
    %394 = vector.load %arg4[%c26, %c0_201, %c0_202] : memref<27x32x32xf32, #tpu.memory_space<vmem>>, vector<1x32x32xf32>
    %395 = vector.shape_cast %394 : vector<1x32x32xf32> to vector<32x32xf32>
    %c21_203 = arith.constant 21 : index
    %c0_204 = arith.constant 0 : index
    %c0_205 = arith.constant 0 : index
    %396 = vector.load %arg5[%c21_203, %c0_204, %c0_205] : memref<29x1x32xf32, #tpu.memory_space<vmem>>, vector<1x1x32xf32>
    %397 = vector.shape_cast %396 : vector<1x1x32xf32> to vector<1x32xf32>
    %c22_206 = arith.constant 22 : index
    %c0_207 = arith.constant 0 : index
    %c0_208 = arith.constant 0 : index
    %398 = vector.load %arg5[%c22_206, %c0_207, %c0_208] : memref<29x1x32xf32, #tpu.memory_space<vmem>>, vector<1x1x32xf32>
    %399 = vector.shape_cast %398 : vector<1x1x32xf32> to vector<1x32xf32>
    %c23_209 = arith.constant 23 : index
    %c0_210 = arith.constant 0 : index
    %c0_211 = arith.constant 0 : index
    %400 = vector.load %arg5[%c23_209, %c0_210, %c0_211] : memref<29x1x32xf32, #tpu.memory_space<vmem>>, vector<1x1x32xf32>
    %401 = vector.shape_cast %400 : vector<1x1x32xf32> to vector<1x32xf32>
    %c24_212 = arith.constant 24 : index
    %c0_213 = arith.constant 0 : index
    %c0_214 = arith.constant 0 : index
    %402 = vector.load %arg5[%c24_212, %c0_213, %c0_214] : memref<29x1x32xf32, #tpu.memory_space<vmem>>, vector<1x1x32xf32>
    %403 = vector.shape_cast %402 : vector<1x1x32xf32> to vector<1x32xf32>
    %c25_215 = arith.constant 25 : index
    %c0_216 = arith.constant 0 : index
    %c0_217 = arith.constant 0 : index
    %404 = vector.load %arg5[%c25_215, %c0_216, %c0_217] : memref<29x1x32xf32, #tpu.memory_space<vmem>>, vector<1x1x32xf32>
    %405 = vector.shape_cast %404 : vector<1x1x32xf32> to vector<1x32xf32>
    %c26_218 = arith.constant 26 : index
    %c0_219 = arith.constant 0 : index
    %c0_220 = arith.constant 0 : index
    %406 = vector.load %arg5[%c26_218, %c0_219, %c0_220] : memref<29x1x32xf32, #tpu.memory_space<vmem>>, vector<1x1x32xf32>
    %407 = vector.shape_cast %406 : vector<1x1x32xf32> to vector<1x32xf32>
    %c27 = arith.constant 27 : index
    %c0_221 = arith.constant 0 : index
    %c0_222 = arith.constant 0 : index
    %408 = vector.load %arg5[%c27, %c0_221, %c0_222] : memref<29x1x32xf32, #tpu.memory_space<vmem>>, vector<1x1x32xf32>
    %409 = vector.shape_cast %408 : vector<1x1x32xf32> to vector<1x32xf32>
    %c28 = arith.constant 28 : index
    %c0_223 = arith.constant 0 : index
    %c0_224 = arith.constant 0 : index
    %410 = vector.load %arg5[%c28, %c0_223, %c0_224] : memref<29x1x32xf32, #tpu.memory_space<vmem>>, vector<1x1x32xf32>
    %411 = vector.shape_cast %410 : vector<1x1x32xf32> to vector<1x32xf32>
    %cst_225 = arith.constant dense<0.000000e+00> : vector<8xf32>
    %412 = vector.multi_reduction <add>, %377, %cst_225 [1] : vector<8x32xf32> to vector<8xf32>
    %413 = vector.shape_cast %412 : vector<8xf32> to vector<8x1xf32>
    %cst_226 = arith.constant 3.200000e+01 : f32
    %414 = vector.broadcast %cst_226 : f32 to vector<8x1xf32>
    %415 = arith.divf %413, %414 : vector<8x1xf32>
    %416 = arith.mulf %377, %377 : vector<8x32xf32>
    %cst_227 = arith.constant dense<0.000000e+00> : vector<8xf32>
    %417 = vector.multi_reduction <add>, %416, %cst_227 [1] : vector<8x32xf32> to vector<8xf32>
    %418 = vector.shape_cast %417 : vector<8xf32> to vector<8x1xf32>
    %cst_228 = arith.constant 3.200000e+01 : f32
    %419 = vector.broadcast %cst_228 : f32 to vector<8x1xf32>
    %420 = arith.divf %418, %419 : vector<8x1xf32>
    %421 = arith.mulf %415, %415 : vector<8x1xf32>
    %422 = arith.subf %420, %421 : vector<8x1xf32>
    %cst_229 = arith.constant 0.000000e+00 : f32
    %423 = vector.broadcast %cst_229 : f32 to vector<8x1xf32>
    %424 = arith.maximumf %422, %423 : vector<8x1xf32>
    %425 = vector.broadcast %415 : vector<8x1xf32> to vector<8x32xf32>
    %426 = arith.subf %377, %425 : vector<8x32xf32>
    %cst_230 = arith.constant 9.99999974E-6 : f32
    %427 = vector.broadcast %cst_230 : f32 to vector<8x1xf32>
    %428 = arith.addf %424, %427 : vector<8x1xf32>
    %429 = math.rsqrt %428 : vector<8x1xf32>
    %430 = vector.broadcast %429 : vector<8x1xf32> to vector<8x32xf32>
    %431 = arith.mulf %426, %430 : vector<8x32xf32>
    %432 = vector.broadcast %409 : vector<1x32xf32> to vector<8x32xf32>
    %433 = arith.mulf %431, %432 : vector<8x32xf32>
    %434 = vector.broadcast %411 : vector<1x32xf32> to vector<8x32xf32>
    %435 = arith.addf %433, %434 : vector<8x32xf32>
    %cst_231 = arith.constant dense<0.000000e+00> : vector<8x32xf32>
    %436 = tpu.matmul %435, %379, %cst_231 {dimension_numbers = #tpu.dot_dimension_numbers<[1], [0], [0], [1], [0, 0, 1, 1], [], []>} : vector<8x32xf32>, vector<32x32xf32>, vector<8x32xf32> -> vector<8x32xf32>
    %cst_232 = arith.constant dense<0.000000e+00> : vector<8x8xf32>
    %437 = tpu.matmul %436, %435, %cst_232 {dimension_numbers = #tpu.dot_dimension_numbers<[1], [1], [0], [0], [0, 0, 1, 0], [], []>} : vector<8x32xf32>, vector<8x32xf32>, vector<8x8xf32> -> vector<8x8xf32>
    %cst_233 = arith.constant dense<0.000000e+00> : vector<8x32xf32>
    %438 = tpu.matmul %435, %381, %cst_233 {dimension_numbers = #tpu.dot_dimension_numbers<[1], [0], [0], [1], [0, 0, 1, 1], [], []>} : vector<8x32xf32>, vector<32x32xf32>, vector<8x32xf32> -> vector<8x32xf32>
    %439 = vector.broadcast %397 : vector<1x32xf32> to vector<8x32xf32>
    %440 = arith.addf %438, %439 : vector<8x32xf32>
    %cst_234 = arith.constant dense<0xFF800000> : vector<8xf32>
    %441 = vector.multi_reduction <maximumf>, %437, %cst_234 [1] : vector<8x8xf32> to vector<8xf32>
    %442 = vector.shape_cast %441 : vector<8xf32> to vector<8x1xf32>
    %443 = vector.broadcast %442 : vector<8x1xf32> to vector<8x8xf32>
    %444 = arith.subf %437, %443 : vector<8x8xf32>
    %445 = math.exp %444 : vector<8x8xf32>
    %cst_235 = arith.constant dense<0.000000e+00> : vector<8xf32>
    %446 = vector.multi_reduction <add>, %445, %cst_235 [1] : vector<8x8xf32> to vector<8xf32>
    %447 = vector.shape_cast %446 : vector<8xf32> to vector<8x1xf32>
    %448 = vector.broadcast %447 : vector<8x1xf32> to vector<8x8xf32>
    %449 = arith.divf %445, %448 : vector<8x8xf32>
    %cst_236 = arith.constant dense<0.000000e+00> : vector<8xf32>
    %450 = vector.multi_reduction <add>, %449, %cst_236 [0] : vector<8x8xf32> to vector<8xf32>
    %451 = vector.shape_cast %450 : vector<8xf32> to vector<1x8xf32>
    %cst_237 = arith.constant 9.99999971E-10 : f32
    %452 = vector.broadcast %cst_237 : f32 to vector<1x8xf32>
    %453 = arith.addf %452, %451 : vector<1x8xf32>
    %454 = vector.broadcast %453 : vector<1x8xf32> to vector<8x8xf32>
    %455 = arith.divf %449, %454 : vector<8x8xf32>
    %cst_238 = arith.constant dense<0.000000e+00> : vector<8x32xf32>
    %456 = tpu.matmul %455, %440, %cst_238 {dimension_numbers = #tpu.dot_dimension_numbers<[0], [0], [1], [1], [0, 1, 1, 1], [], []>} : vector<8x8xf32>, vector<8x32xf32>, vector<8x32xf32> -> vector<8x32xf32>
    %457 = arith.subf %435, %456 : vector<8x32xf32>
    %cst_239 = arith.constant dense<0.000000e+00> : vector<8x32xf32>
    %458 = tpu.matmul %457, %383, %cst_239 {dimension_numbers = #tpu.dot_dimension_numbers<[1], [0], [0], [1], [0, 0, 1, 1], [], []>} : vector<8x32xf32>, vector<32x32xf32>, vector<8x32xf32> -> vector<8x32xf32>
    %459 = vector.broadcast %399 : vector<1x32xf32> to vector<8x32xf32>
    %460 = arith.addf %458, %459 : vector<8x32xf32>
    %cst_240 = arith.constant 0.000000e+00 : f32
    %461 = vector.broadcast %cst_240 : f32 to vector<8x32xf32>
    %462 = arith.maximumf %460, %461 : vector<8x32xf32>
    %463 = arith.addf %435, %462 : vector<8x32xf32>
    %cst_241 = arith.constant dense<0.000000e+00> : vector<8x32xf32>
    %464 = tpu.matmul %463, %385, %cst_241 {dimension_numbers = #tpu.dot_dimension_numbers<[1], [0], [0], [1], [0, 0, 1, 1], [], []>} : vector<8x32xf32>, vector<32x32xf32>, vector<8x32xf32> -> vector<8x32xf32>
    %cst_242 = arith.constant dense<0.000000e+00> : vector<8x8xf32>
    %465 = tpu.matmul %464, %463, %cst_242 {dimension_numbers = #tpu.dot_dimension_numbers<[1], [1], [0], [0], [0, 0, 1, 0], [], []>} : vector<8x32xf32>, vector<8x32xf32>, vector<8x8xf32> -> vector<8x8xf32>
    %cst_243 = arith.constant dense<0.000000e+00> : vector<8x32xf32>
    %466 = tpu.matmul %463, %387, %cst_243 {dimension_numbers = #tpu.dot_dimension_numbers<[1], [0], [0], [1], [0, 0, 1, 1], [], []>} : vector<8x32xf32>, vector<32x32xf32>, vector<8x32xf32> -> vector<8x32xf32>
    %467 = vector.broadcast %401 : vector<1x32xf32> to vector<8x32xf32>
    %468 = arith.addf %466, %467 : vector<8x32xf32>
    %cst_244 = arith.constant dense<0xFF800000> : vector<8xf32>
    %469 = vector.multi_reduction <maximumf>, %465, %cst_244 [1] : vector<8x8xf32> to vector<8xf32>
    %470 = vector.shape_cast %469 : vector<8xf32> to vector<8x1xf32>
    %471 = vector.broadcast %470 : vector<8x1xf32> to vector<8x8xf32>
    %472 = arith.subf %465, %471 : vector<8x8xf32>
    %473 = math.exp %472 : vector<8x8xf32>
    %cst_245 = arith.constant dense<0.000000e+00> : vector<8xf32>
    %474 = vector.multi_reduction <add>, %473, %cst_245 [1] : vector<8x8xf32> to vector<8xf32>
    %475 = vector.shape_cast %474 : vector<8xf32> to vector<8x1xf32>
    %476 = vector.broadcast %475 : vector<8x1xf32> to vector<8x8xf32>
    %477 = arith.divf %473, %476 : vector<8x8xf32>
    %cst_246 = arith.constant dense<0.000000e+00> : vector<8xf32>
    %478 = vector.multi_reduction <add>, %477, %cst_246 [0] : vector<8x8xf32> to vector<8xf32>
    %479 = vector.shape_cast %478 : vector<8xf32> to vector<1x8xf32>
    %cst_247 = arith.constant 9.99999971E-10 : f32
    %480 = vector.broadcast %cst_247 : f32 to vector<1x8xf32>
    %481 = arith.addf %480, %479 : vector<1x8xf32>
    %482 = vector.broadcast %481 : vector<1x8xf32> to vector<8x8xf32>
    %483 = arith.divf %477, %482 : vector<8x8xf32>
    %cst_248 = arith.constant dense<0.000000e+00> : vector<8x32xf32>
    %484 = tpu.matmul %483, %468, %cst_248 {dimension_numbers = #tpu.dot_dimension_numbers<[0], [0], [1], [1], [0, 1, 1, 1], [], []>} : vector<8x8xf32>, vector<8x32xf32>, vector<8x32xf32> -> vector<8x32xf32>
    %485 = arith.subf %463, %484 : vector<8x32xf32>
    %cst_249 = arith.constant dense<0.000000e+00> : vector<8x32xf32>
    %486 = tpu.matmul %485, %389, %cst_249 {dimension_numbers = #tpu.dot_dimension_numbers<[1], [0], [0], [1], [0, 0, 1, 1], [], []>} : vector<8x32xf32>, vector<32x32xf32>, vector<8x32xf32> -> vector<8x32xf32>
    %487 = vector.broadcast %403 : vector<1x32xf32> to vector<8x32xf32>
    %488 = arith.addf %486, %487 : vector<8x32xf32>
    %cst_250 = arith.constant 0.000000e+00 : f32
    %489 = vector.broadcast %cst_250 : f32 to vector<8x32xf32>
    %490 = arith.maximumf %488, %489 : vector<8x32xf32>
    %491 = arith.addf %463, %490 : vector<8x32xf32>
    %cst_251 = arith.constant dense<0.000000e+00> : vector<8x32xf32>
    %492 = tpu.matmul %463, %391, %cst_251 {dimension_numbers = #tpu.dot_dimension_numbers<[1], [0], [0], [1], [0, 0, 1, 1], [], []>} : vector<8x32xf32>, vector<32x32xf32>, vector<8x32xf32> -> vector<8x32xf32>
    %493 = arith.addf %377, %492 : vector<8x32xf32>
    %cst_252 = arith.constant dense<0.000000e+00> : vector<8x32xf32>
    %494 = tpu.matmul %491, %393, %cst_252 {dimension_numbers = #tpu.dot_dimension_numbers<[1], [0], [0], [1], [0, 0, 1, 1], [], []>} : vector<8x32xf32>, vector<32x32xf32>, vector<8x32xf32> -> vector<8x32xf32>
    %495 = arith.addf %493, %494 : vector<8x32xf32>
    %496 = vector.broadcast %405 : vector<1x32xf32> to vector<8x32xf32>
    %497 = arith.addf %495, %496 : vector<8x32xf32>
    %cst_253 = arith.constant dense<0.000000e+00> : vector<8xf32>
    %498 = vector.multi_reduction <add>, %497, %cst_253 [1] : vector<8x32xf32> to vector<8xf32>
    %499 = vector.shape_cast %498 : vector<8xf32> to vector<8x1xf32>
    %cst_254 = arith.constant 3.200000e+01 : f32
    %500 = vector.broadcast %cst_254 : f32 to vector<8x1xf32>
    %501 = arith.divf %499, %500 : vector<8x1xf32>
    %502 = arith.mulf %497, %497 : vector<8x32xf32>
    %cst_255 = arith.constant dense<0.000000e+00> : vector<8xf32>
    %503 = vector.multi_reduction <add>, %502, %cst_255 [1] : vector<8x32xf32> to vector<8xf32>
    %504 = vector.shape_cast %503 : vector<8xf32> to vector<8x1xf32>
    %cst_256 = arith.constant 3.200000e+01 : f32
    %505 = vector.broadcast %cst_256 : f32 to vector<8x1xf32>
    %506 = arith.divf %504, %505 : vector<8x1xf32>
    %507 = arith.mulf %501, %501 : vector<8x1xf32>
    %508 = arith.subf %506, %507 : vector<8x1xf32>
    %cst_257 = arith.constant 0.000000e+00 : f32
    %509 = vector.broadcast %cst_257 : f32 to vector<8x1xf32>
    %510 = arith.maximumf %508, %509 : vector<8x1xf32>
    %511 = vector.broadcast %501 : vector<8x1xf32> to vector<8x32xf32>
    %512 = arith.subf %497, %511 : vector<8x32xf32>
    %cst_258 = arith.constant 9.99999974E-6 : f32
    %513 = vector.broadcast %cst_258 : f32 to vector<8x1xf32>
    %514 = arith.addf %510, %513 : vector<8x1xf32>
    %515 = math.rsqrt %514 : vector<8x1xf32>
    %516 = vector.broadcast %515 : vector<8x1xf32> to vector<8x32xf32>
    %517 = arith.mulf %512, %516 : vector<8x32xf32>
    %518 = vector.broadcast %409 : vector<1x32xf32> to vector<8x32xf32>
    %519 = arith.mulf %517, %518 : vector<8x32xf32>
    %520 = vector.broadcast %411 : vector<1x32xf32> to vector<8x32xf32>
    %521 = arith.addf %519, %520 : vector<8x32xf32>
    %cst_259 = arith.constant dense<0.000000e+00> : vector<8x32xf32>
    %522 = tpu.matmul %521, %395, %cst_259 {dimension_numbers = #tpu.dot_dimension_numbers<[1], [0], [0], [1], [0, 0, 1, 1], [], []>} : vector<8x32xf32>, vector<32x32xf32>, vector<8x32xf32> -> vector<8x32xf32>
    %523 = vector.broadcast %407 : vector<1x32xf32> to vector<8x32xf32>
    %524 = arith.addf %522, %523 : vector<8x32xf32>
    %525 = math.exp %524 : vector<8x32xf32>
    %cst_260 = arith.constant 1.000000e+00 : f32
    %526 = vector.broadcast %cst_260 : f32 to vector<8x32xf32>
    %527 = arith.addf %526, %525 : vector<8x32xf32>
    %528 = arith.mulf %527, %527 : vector<8x32xf32>
    %cst_261 = arith.constant 1.000000e+00 : f32
    %529 = vector.broadcast %cst_261 : f32 to vector<8x32xf32>
    %530 = arith.addf %528, %529 : vector<8x32xf32>
    %cst_262 = arith.constant 2.000000e+00 : f32
    %531 = vector.broadcast %cst_262 : f32 to vector<8x32xf32>
    %532 = arith.divf %531, %530 : vector<8x32xf32>
    %cst_263 = arith.constant 1.000000e+00 : f32
    %533 = vector.broadcast %cst_263 : f32 to vector<8x32xf32>
    %534 = arith.subf %533, %532 : vector<8x32xf32>
    %535 = arith.mulf %524, %534 : vector<8x32xf32>
    %536 = arith.addf %497, %535 : vector<8x32xf32>
    %cst_264 = arith.constant dense<0.000000e+00> : vector<8xf32>
    %537 = vector.multi_reduction <add>, %536, %cst_264 [1] : vector<8x32xf32> to vector<8xf32>
    %538 = vector.shape_cast %537 : vector<8xf32> to vector<8x1xf32>
    %cst_265 = arith.constant 3.200000e+01 : f32
    %539 = vector.broadcast %cst_265 : f32 to vector<8x1xf32>
    %540 = arith.divf %538, %539 : vector<8x1xf32>
    %541 = arith.mulf %536, %536 : vector<8x32xf32>
    %cst_266 = arith.constant dense<0.000000e+00> : vector<8xf32>
    %542 = vector.multi_reduction <add>, %541, %cst_266 [1] : vector<8x32xf32> to vector<8xf32>
    %543 = vector.shape_cast %542 : vector<8xf32> to vector<8x1xf32>
    %cst_267 = arith.constant 3.200000e+01 : f32
    %544 = vector.broadcast %cst_267 : f32 to vector<8x1xf32>
    %545 = arith.divf %543, %544 : vector<8x1xf32>
    %546 = arith.mulf %540, %540 : vector<8x1xf32>
    %547 = arith.subf %545, %546 : vector<8x1xf32>
    %cst_268 = arith.constant 0.000000e+00 : f32
    %548 = vector.broadcast %cst_268 : f32 to vector<8x1xf32>
    %549 = arith.maximumf %547, %548 : vector<8x1xf32>
    %550 = vector.broadcast %540 : vector<8x1xf32> to vector<8x32xf32>
    %551 = arith.subf %536, %550 : vector<8x32xf32>
    %cst_269 = arith.constant 9.99999974E-6 : f32
    %552 = vector.broadcast %cst_269 : f32 to vector<8x1xf32>
    %553 = arith.addf %549, %552 : vector<8x1xf32>
    %554 = math.rsqrt %553 : vector<8x1xf32>
    %555 = vector.broadcast %554 : vector<8x1xf32> to vector<8x32xf32>
    %556 = arith.mulf %551, %555 : vector<8x32xf32>
    %557 = vector.broadcast %409 : vector<1x32xf32> to vector<8x32xf32>
    %558 = arith.mulf %556, %557 : vector<8x32xf32>
    %559 = vector.broadcast %411 : vector<1x32xf32> to vector<8x32xf32>
    %560 = arith.addf %558, %559 : vector<8x32xf32>
    %561 = arith.addf %560, %11 : vector<8x32xf32>
    %562 = vector.broadcast %5 : vector<8x1xf32> to vector<8x32xf32>
    %563 = arith.mulf %562, %561 : vector<8x32xf32>
    %cst_270 = arith.constant dense<0.000000e+00> : vector<32xf32>
    %564 = vector.multi_reduction <add>, %563, %cst_270 [0] : vector<8x32xf32> to vector<32xf32>
    %565 = vector.shape_cast %564 : vector<32xf32> to vector<1x32xf32>
    %c1_271 = arith.constant 1 : index
    %c0_272 = arith.constant 0 : index
    %c0_273 = arith.constant 0 : index
    %566 = vector.load %arg5[%c1_271, %c0_272, %c0_273] : memref<29x1x32xf32, #tpu.memory_space<vmem>>, vector<1x1x32xf32>
    %567 = vector.shape_cast %566 : vector<1x1x32xf32> to vector<1x32xf32>
    %c2_274 = arith.constant 2 : index
    %c0_275 = arith.constant 0 : index
    %c0_276 = arith.constant 0 : index
    %568 = vector.load %arg5[%c2_274, %c0_275, %c0_276] : memref<29x1x32xf32, #tpu.memory_space<vmem>>, vector<1x1x32xf32>
    %569 = vector.shape_cast %568 : vector<1x1x32xf32> to vector<1x32xf32>
    %cst_277 = arith.constant dense<0.000000e+00> : vector<1xf32>
    %570 = vector.multi_reduction <add>, %565, %cst_277 [1] : vector<1x32xf32> to vector<1xf32>
    %571 = vector.shape_cast %570 : vector<1xf32> to vector<1x1xf32>
    %cst_278 = arith.constant 3.200000e+01 : f32
    %572 = vector.broadcast %cst_278 : f32 to vector<1x1xf32>
    %573 = arith.divf %571, %572 : vector<1x1xf32>
    %574 = arith.mulf %565, %565 : vector<1x32xf32>
    %cst_279 = arith.constant dense<0.000000e+00> : vector<1xf32>
    %575 = vector.multi_reduction <add>, %574, %cst_279 [1] : vector<1x32xf32> to vector<1xf32>
    %576 = vector.shape_cast %575 : vector<1xf32> to vector<1x1xf32>
    %cst_280 = arith.constant 3.200000e+01 : f32
    %577 = vector.broadcast %cst_280 : f32 to vector<1x1xf32>
    %578 = arith.divf %576, %577 : vector<1x1xf32>
    %579 = arith.mulf %573, %573 : vector<1x1xf32>
    %580 = arith.subf %578, %579 : vector<1x1xf32>
    %cst_281 = arith.constant 0.000000e+00 : f32
    %581 = vector.broadcast %cst_281 : f32 to vector<1x1xf32>
    %582 = arith.maximumf %580, %581 : vector<1x1xf32>
    %583 = vector.broadcast %573 : vector<1x1xf32> to vector<1x32xf32>
    %584 = arith.subf %565, %583 : vector<1x32xf32>
    %cst_282 = arith.constant 9.99999974E-6 : f32
    %585 = vector.broadcast %cst_282 : f32 to vector<1x1xf32>
    %586 = arith.addf %582, %585 : vector<1x1xf32>
    %587 = math.rsqrt %586 : vector<1x1xf32>
    %588 = vector.broadcast %587 : vector<1x1xf32> to vector<1x32xf32>
    %589 = arith.mulf %584, %588 : vector<1x32xf32>
    %590 = arith.mulf %589, %567 : vector<1x32xf32>
    %591 = arith.addf %590, %569 : vector<1x32xf32>
    %c3_283 = arith.constant 3 : index
    %c0_284 = arith.constant 0 : index
    %c0_285 = arith.constant 0 : index
    %592 = vector.load %arg5[%c3_283, %c0_284, %c0_285] : memref<29x1x32xf32, #tpu.memory_space<vmem>>, vector<1x1x32xf32>
    %593 = vector.shape_cast %592 : vector<1x1x32xf32> to vector<1x32xf32>
    %594 = arith.mulf %591, %593 : vector<1x32xf32>
    %cst_286 = arith.constant dense<0.000000e+00> : vector<1xf32>
    %595 = vector.multi_reduction <add>, %594, %cst_286 [1] : vector<1x32xf32> to vector<1xf32>
    %596 = vector.shape_cast %595 : vector<1xf32> to vector<1x1xf32>
    %c4_287 = arith.constant 4 : index
    %c0_288 = arith.constant 0 : index
    %c0_289 = arith.constant 0 : index
    %597 = vector.load %arg5[%c4_287, %c0_288, %c0_289] : memref<29x1x32xf32, #tpu.memory_space<vmem>>, vector<1x1x32xf32>
    %598 = vector.shape_cast %597 : vector<1x1x32xf32> to vector<1x32xf32>
    %599 = vector.extract_strided_slice %598 {offsets = [0, 0], sizes = [1, 1], strides = [1, 1]} : vector<1x32xf32> to vector<1x1xf32>
    %600 = arith.addf %596, %599 : vector<1x1xf32>
    %601 = vector.shape_cast %600 : vector<1x1xf32> to vector<1x1xf32>
    %602 = vector.broadcast %601 : vector<1x1xf32> to vector<1x128xf32>
    %c0_290 = arith.constant 0 : index
    %c0_291 = arith.constant 0 : index
    %c0_292 = arith.constant 0 : index
    %603 = vector.load %arg6[%c0_290, %c0_291, %c0_292] : memref<1x1x128xf32, #tpu.memory_space<vmem>>, vector<1x1x128xf32>
    %604 = vector.shape_cast %603 : vector<1x1x128xf32> to vector<1x128xf32>
    %605 = vector.shape_cast %602 : vector<1x128xf32> to vector<1x1x128xf32>
    tpu.vector_store %arg6[%c0_290, %c0_291, %c0_292], %605 {strides = array<i32>} : memref<1x1x128xf32, #tpu.memory_space<vmem>>, vector<1x1x128xf32>,
    return
  }
  func.func @transform_0(%arg0: i32) -> (i32, i32, i32) {
    %c0_i32 = arith.constant 0 : i32
    %c0_i32_0 = arith.constant 0 : i32
    %c0_i32_1 = arith.constant 0 : i32
    return %arg0, %c0_i32, %c0_i32_0 : i32, i32, i32
  }
  func.func @transform_1(%arg0: i32) -> (i32, i32, i32) {
    %c0_i32 = arith.constant 0 : i32
    %c0_i32_0 = arith.constant 0 : i32
    %c0_i32_1 = arith.constant 0 : i32
    return %arg0, %c0_i32, %c0_i32_0 : i32, i32, i32
  }
  func.func @transform_2(%arg0: i32) -> (i32, i32) {
    %c0_i32 = arith.constant 0 : i32
    %c0_i32_0 = arith.constant 0 : i32
    %c0_i32_1 = arith.constant 0 : i32
    return %c0_i32, %c0_i32_0 : i32, i32
  }
  func.func @transform_3(%arg0: i32) -> (i32, i32, i32) {
    %c0_i32 = arith.constant 0 : i32
    %c0_i32_0 = arith.constant 0 : i32
    %c0_i32_1 = arith.constant 0 : i32
    %c0_i32_2 = arith.constant 0 : i32
    return %c0_i32, %c0_i32_0, %c0_i32_1 : i32, i32, i32
  }
  func.func @transform_4(%arg0: i32) -> (i32, i32, i32) {
    %c0_i32 = arith.constant 0 : i32
    %c0_i32_0 = arith.constant 0 : i32
    %c0_i32_1 = arith.constant 0 : i32
    %c0_i32_2 = arith.constant 0 : i32
    return %c0_i32, %c0_i32_0, %c0_i32_1 : i32, i32, i32
  }
  func.func @transform_5(%arg0: i32) -> (i32, i32, i32) {
    %c0_i32 = arith.constant 0 : i32
    %c0_i32_0 = arith.constant 0 : i32
    %c0_i32_1 = arith.constant 0 : i32
    return %arg0, %c0_i32, %c0_i32_0 : i32, i32, i32
  }
}

</mosaic_0001>

<bundles_post_ra>
// kernel: pst_forward.1
= control target key start
LH: loop header
LB: loop body
LE: loop exit
PB: predicated region body
PF: predicated region fallthrough
CT: control target
= control target key end

     0   :  { %10 = vsyncpa [#allocation3], 0  ;;  %s5131_s18 = smov 0   ;;  %s5632_s0 = inlined_call_operand.vmem [shape: f32[2,8,32], index: 0, kind: input, shape index: {}]   ;;  %s5633_s1 = inlined_call_operand.vmem [shape: f32[2,8,21], index: 1, kind: input, shape index: {}]   ;;  %s5634_s2 = inlined_call_operand.vmem [shape: f32[21,32], index: 2, kind: input, shape index: {}]   ;;  %s5635_s3 = inlined_call_operand.hbm [shape: f32[27,32,32], index: 3, kind: input, shape index: {}]   ;;  %s5636_s4 = inlined_call_operand.vmem [shape: f32[29,1,32], index: 4, kind: input, shape index: {}]   ;;  %s5637_s5 = inlined_call_operand.vmem [shape: f32[2,1,128], index: 5, kind: output, shape index: {}]  }
   0x1 LB: > { %s5137_s19 = sadd.s32 4294967295, %s5091_s18   ;;  %p4152_p0 = scmp.ge.s32.totalorder %s5091_s18, 1  ;;  %s5091_s18 = sphi %s5131_s18, %s16_s18  }
   0x2   : > { %p162_p1 = scmp.lt.s32.totalorder %s5091_s18, 3  ;;  %s5093_s20 = smov [#allocation2]  }
   0x3   : > { %s177_s21 = sshll.u32 %s5093_s20, 4  ;;  %p5638_p3 = scmp.eq.s32.totalorder %s5137_s19, 0  ;;  %s178_s21 = int_to_ptr.vmem [resolvable:$true] %s177_s21 }
   0x4   : > { %p5141_p2 = pnand %p4152_p0, %p162_p1  ;;  %s5053_s26 = scalar_lea.hbm %s5635_s3, 13824 }
   0x5   : > { %p5054_p6 = scmp.ne.s32.totalorder %s5635_s3, %s5053_s26  ;;  %p5060_p10 = scmp.lt.u32.totalorder %s5053_s26, %s5635_s3 }
   0x6   : > { %s5640_s22 = scalar_select %p5141_p2, 1, 0 }
   0x7   : > { %p4959_p4 = pneg %p5141_p2 }
   0x9   : > { %p5150_p5 = pnand %p5638_p3, %p4959_p4 }
   0xb   : > { %p5055_p7 = pneg %p5150_p5 }
   0xd   : > { %p5056_p8 = pnand %p5055_p7, %p5054_p6 }
   0xf   : > { %p5057_p9 = pneg %p5056_p8 }
  0x11   : > { %p5062_p11 = pnand %p5060_p10, %p5057_p9 }
  0x13   : > { %5065 = shalt.err (!%p5062_p11)
}
  0x14   : > { %s5066_s6 = scalar_lea.vmem %s178_s21, 13824  ;;  %p5074_p1 = scmp.lt.s32.totalorder %s178_s21, %s178_s21 }
  0x15   : > { %p5067_p12 = scmp.ne.s32.totalorder %s178_s21, %s5066_s6  ;;  %p5075_p4 = scmp.lt.s32.totalorder %s5066_s6, %s5066_s6 }
  0x17   : > { %p5069_p13 = pnand %p5067_p12, %p5055_p7  ;;  %p5076_p3 = por %p5075_p4, %p5074_p1 }
  0x19   : > { %p5070_p0 = pneg %p5069_p13 }
  0x1b   : > { %p5077_p2 = pnand %p5076_p3, %p5070_p0 }
  0x1d   : > { %5080 = shalt.err (!%p5077_p2)
}
  0x1e   : > { %s5094_s7 = smov 128   ;;  %s5095_s8 = smov 8  }
  0x1f   : > { %4962 = dma.hbm_to_vmem [thread:$0]  (!%p5150_p5), %s5635_s3, 13824, %s178_s21, [#allocation3], %s5094_s7, %s5094_s7, %s5095_s8  }
  0x20   : > { %p5642_p6 = scmp.ne.s32.totalorder %s5640_s22, 0 }
  0x21   : > { %p5643_p8 = scmp.eq.s32.totalorder (!%p5642_p6), %s5137_s19, 0 }
  0x22   : > { %210 = sbr.rel (%p5642_p6) target bundleno = 11635 (0x2d73), region = 40 }
  0x29   : > { %5086 = dma.done.wait (%p5643_p8), [#allocation3], 13824   ;;  %p5644_p7 = pmov %p5643_p8 }
  0x2a   : > { %v5096_v0 = vmov 0.0|0.0   ;;  %vm5097_vm0 = vmmov 0   ;;  %v5098_v1 = vmov 0.0   ;;  %p239_p2 = scmp.lt.s32.totalorder %s5137_s19, 1  ;;  %v250_v2 = vld [vmem:[%s5634_s2] sm:$0xff]  ;;  %v251_v3 = vld [vmem:[%s5634_s2 + $0x8] sm:$0xff] }
  0x2b   : > { %5088 = vsyncadd (%p5644_p7), [#allocation3], 4294953472  ;;  %4790 = vmatprep.subr.bf16.mxu0 %v5096_v0  ;;  %4430 = vmatprep.mubr.msk.f32.mxu0 %vm5097_vm0, %v5098_v1  ;;  %v4791_v4 = vpack.c.bf16 %v251_v3, %v250_v2  ;;  %v252_v5 = vld [vmem:[%s5634_s2 + $0x10] sm:$0x1f]  ;;  %vm259_vm1 = vcmask 1044480   ;;  %vm255_vm2 = vcmask 171008  }
  0x2c   : > { %4793 = vmatprep.subr.bf16.mxu1 %v5096_v0  ;;  %4441 = vmatprep.mubr.msk.f32.mxu1 %vm5097_vm0, %v5098_v1  ;;  %s5646_s19 = smov (!%p239_p2, %s5137_s19), 1  ;;  %v4161_v9 = vld [vmem:[%s5636_s4] ss:$0 sm:$0xff]  ;;  %vm402_vm3 = vcmask 261120   ;;  %v343_v17 = vld [vmem:[#allocation2 + $0x8] sm:$0xff]  ;;  %v344_v19 = vld [vmem:[#allocation2 + $0x10] sm:$0xff] }
  0x2d   : > { %s4157_s11 = sshll.u32 %s5646_s19, 3  ;;  %4792 = vmatpush3.bf16.msra.mxu0 %v4791_v4  ;;  %v342_v16 = vld [vmem:[#allocation2] sm:$0xff]  ;;  %v345_v20 = vld [vmem:[#allocation2 + $0x18] sm:$0xff]  ;;  %v5225_v32 = vld [vmem:[%s5636_s4 + $0xb] ss:$0 sm:$0xff]  ;;  %vm656_vm4 = vcmask 64512   ;;  %s249_s16 = scalar_lea.vmem %s5637_s5, %s5646_s19 }
  0x2e   : > { %s5196_s20 = scalar_lea.vmem %s5633_s1, %s4157_s11  ;;  %4428 = vmatprep.subr.mxu0 %v5098_v1  ;;  %s242_s25 = scalar_lea.vmem %s5632_s0, %s4157_s11  ;;  %v4794_v18 = vpack.c.bf16 %v343_v17, %v342_v16  ;;  %v4797_v21 = vpack.c.bf16 %v345_v20, %v344_v19  ;;  %v347_v34 = vld [vmem:[#allocation2 + $0x20] sm:$0xff]  ;;  %v348_v35 = vld [vmem:[#allocation2 + $0x28] sm:$0xff]  ;;  %v349_v40 = vld [vmem:[#allocation2 + $0x30] sm:$0xff]  ;;  %vm4066_vm5 = vcmask 253952  }
  0x2f   : > { %v254_v6 = vld [vmem:[%s5196_s20] sm:$0xff]  ;;  %v5230_v36 = vld [vmem:[%s5636_s4 + $0xc] ss:$0 sm:$0xff]  ;;  %v4800_v38 = vpack.c.bf16 %v348_v35, %v347_v34  ;;  %v350_v41 = vld [vmem:[#allocation2 + $0x38] sm:$0xff] }
  0x30   : > { %v253_v7 = vld [vmem:[%s242_s25] sm:$0xff]  ;;  %4795 = vmatpush3.bf16.msra.mxu1 %v4794_v18  ;;  %v4803_v42 = vpack.c.bf16 %v350_v41, %v349_v40  ;;  %v358_v17 = vld [vmem:[#allocation2 + $0x68] sm:$0xff]  ;;  %v364_v35 = vld [vmem:[#allocation2 + $0x90] sm:$0xff] }
  0x31   : > { %4429 = vmatpush3.msk.msra.mxu0 %vm259_vm1, %v252_v5  ;;  %4796 = vmatprep.subr.bf16.mxu1 %v5096_v0  ;;  %v4175_v45 = vld [vmem:[%s5636_s4 + $0x5] ss:$0 sm:$0xff]  ;;  %v373_v41 = vld [vmem:[#allocation2 + $0xc8] sm:$0xff] }
  0x32   : > { %4431 = vmatmul.mubr.msk.f32.vlgmr.msra.gmra.mrb[0].mxu0 %vm255_vm2, %v254_v6  ;;  %4444 = vmatprep.subr.mxu0 %v5098_v1  ;;  %v357_v16 = vld [vmem:[#allocation2 + $0x60] sm:$0xff] }
  0x33   : > { %4446 = vmatprep.mubr.msk.f32.mxu0 %vm5097_vm0, %v5098_v1  ;;  %v4812_v18 = vpack.c.bf16 %v358_v17, %v357_v16  ;;  %v372_v40 = vld [vmem:[#allocation2 + $0xc0] sm:$0xff]  ;;  %v369_v17 = vld [vmem:[#allocation2 + $0xb0] sm:$0xff] }
  0x34   : > { %4798 = vmatpush3.bf16.msra.mxu1 %v4797_v21 }
  0x35   : > { %4799 = vmatprep.subr.bf16.mxu1 %v5096_v0 }
 0x105   : > { %v329_v8 = vpop.f32.mrb[0].mxu0 }
 0x106   : > { %v333_v10 = vadd.f32 %v329_v8, %v253_v7  ;;  %v4432_v11 = vpop.f32.mrb[1].mxu0  ;;  %v352_v8 = vld [vmem:[#allocation2 + $0x40] sm:$0xff] }
 0x108   : > { %v5212_v12 = vadd.f32 %v4161_v9, %v333_v10  ;;  %v353_v9 = vld [vmem:[#allocation2 + $0x48] sm:$0xff] }
 0x109   : > { %v4806_v10 = vpack.c.bf16 %v353_v9, %v352_v8 }
 0x10a   : > { %v403_v13 = vsel %vm402_vm3, %v5212_v12, 0.0  ;;  %v408_v14 = vmul.f32 %v5212_v12, %v5212_v12 }
 0x10b   : > { %404 = vadd.xlane.f32.xlu0 %v403_v13  ;;  %v354_v13 = vld [vmem:[#allocation2 + $0x50] sm:$0xff] }
 0x10c   : > { %v409_v15 = vsel %vm402_vm3, %v408_v14, 0.0  ;;  %v355_v14 = vld [vmem:[#allocation2 + $0x58] sm:$0xff] }
 0x10f   : > { %410 = vadd.xlane.f32.xlu0 %v409_v15  ;;  %v4809_v15 = vpack.c.bf16 %v355_v14, %v354_v13  ;;  %v367_v13 = vld [vmem:[#allocation2 + $0xa0] sm:$0xff]  ;;  %v368_v14 = vld [vmem:[#allocation2 + $0xa8] sm:$0xff] }
 0x198   : > { %v405_v22 = vpop.xlane.xlu0 %404 }
 0x199   : > { %v407_v23 = vmul.f32 0.03125, %v405_v22  ;;  %v359_v22 = vld [vmem:[#allocation2 + $0x70] sm:$0xff] }
 0x19b   : > { %v413_v25 = vmul.f32 %v407_v23, %v407_v23  ;;  %v416_v30 = vsub.f32 %v5212_v12, %v407_v23  ;;  %v360_v23 = vld [vmem:[#allocation2 + $0x78] sm:$0xff] }
 0x19c   : > { %v411_v24 = vpop.xlane.xlu0 %410 }
 0x19d   : > { %v412_v26 = vmul.f32 0.03125, %v411_v24  ;;  %v4815_v24 = vpack.c.bf16 %v360_v23, %v359_v22  ;;  %v377_v23 = vld [vmem:[#allocation2 + $0xe0] sm:$0xff] }
 0x19f   : > { %v414_v27 = vsub.f32 %v412_v26, %v413_v25  ;;  %v4178_v25 = vld [vmem:[%s5636_s4 + $0x6] ss:$0 sm:$0xff] }
 0x1a1   : > { %v415_v28 = vmax.f32 %v414_v27, 0.0 }
 0x1a3   : > { %v417_v29 = vadd.f32 1e-05, %v415_v28 }
 0x1a5   : > { %4984 = vrsqrt.f32 %v417_v29  ;;  %v362_v29 = vld [vmem:[#allocation2 + $0x80] sm:$0xff] }
 0x1af   : > { %v4985_v31 = vpop.eup %4984 }
 0x1b0   : > { %v419_v33 = vmul.f32 %v4985_v31, %v416_v30  ;;  %v363_v30 = vld [vmem:[#allocation2 + $0x88] sm:$0xff] }
 0x1b2   : > { %v426_v37 = vmul.f32 %v5225_v32, %v419_v33  ;;  %v4818_v33 = vpack.c.bf16 %v363_v30, %v362_v29  ;;  %v4186_v29 = vld [vmem:[%s5636_s4 + $0x8] ss:$0 sm:$0xff] }
 0x1b4   : > { %v5234_v39 = vadd.f32 %v5230_v36, %v426_v37  ;;  %v365_v37 = vld [vmem:[#allocation2 + $0x98] sm:$0xff] }
 0x1b6   : > { %4442 = vmatmul.mubr.msk.f32.vlgmr.msra.gmra.mrb[0].mxu1 %vm402_vm3, %v5234_v39  ;;  %4445 = vmatpush3.xpose.msk.msra.mxu0 %vm402_vm3, %v5234_v39 }
 0x1b7   : > { %4801 = vmatpush3.bf16.msra.mxu1 %v4800_v38  ;;  %4457 = vmatprep.mubr.msk.f32.mxu1 %vm5097_vm0, %v5098_v1  ;;  %v4821_v38 = vpack.c.bf16 %v365_v37, %v364_v35 }
 0x1b8   : > { %4802 = vmatprep.subr.bf16.mxu1 %v5096_v0  ;;  %4460 = vmatprep.subr.mxu0 %v5098_v1 }
 0x1bb   : > { %4804 = vmatpush3.bf16.msra.mxu1 %v4803_v42  ;;  %v374_v42 = vld [vmem:[#allocation2 + $0xd0] sm:$0xff] }
 0x1bc   : > { %4811 = vmatprep.subr.bf16.mxu1 %v5096_v0 }
 0x1be   : > { %4458 = vmatmul.mubr.msk.f32.vlgmr.msra.gmra.mrb[2].mxu1 %vm402_vm3, %v5234_v39 }
 0x1bf   : > { %4484 = vmatprep.mubr.msk.f32.mxu1 %vm5097_vm0, %v5098_v1  ;;  %4813 = vmatpush3.bf16.msra.mxu1 %v4812_v18  ;;  %v370_v18 = vld [vmem:[#allocation2 + $0xb8] sm:$0xff] }
 0x1c0   : > { %4814 = vmatprep.subr.bf16.mxu1 %v5096_v0 }
 0x1c3   : > { %4816 = vmatpush3.bf16.msra.mxu1 %v4815_v24  ;;  %v378_v24 = vld [vmem:[#allocation2 + $0xe8] sm:$0xff] }
 0x1c4   : > { %4817 = vmatprep.subr.bf16.mxu1 %v5096_v0 }
 0x289   : > { %v503_v43 = vpop.f32.mrb[0].mxu1 }
 0x28a   : > { %v4443_v44 = vpop.f32.mrb[1].mxu1  ;;  %4447 = vmatmul.mubr.msk.f32.vlgmr.msra.gmra.mrb[2].mxu0 %vm402_vm3, %v503_v43  ;;  %v375_v43 = vld [vmem:[#allocation2 + $0xd8] sm:$0xff] }
 0x28b   : > { %4462 = vmatprep.mubr.msk.f32.mxu0 %vm5097_vm0, %v5098_v1  ;;  %v4833_v44 = vpack.c.bf16 %v375_v43, %v374_v42 }
 0x291   : > { %v652_v46 = vpop.f32.mrb[2].mxu1 }
 0x292   : > { %v653_v47 = vadd.f32 %v4175_v45, %v652_v46  ;;  %v4459_v48 = vpop.f32.mrb[3].mxu1 }
 0x294   : > { %4461 = vmatpush3.msra.mxu0 %v653_v47  ;;  %v4183_v47 = vld [vmem:[%s5636_s4 + $0x7] ss:$0 sm:$0xff] }
 0x295   : > { %4805 = vmatprep.subr.bf16.mxu0 %v5096_v0 }
 0x35d   : > { %v576_v49 = vpop.f32.mrb[2].mxu0 }
 0x35e   : > { %v4448_v50 = vpop.f32.mrb[3].mxu0  ;;  %v657_v51 = vsel %vm656_vm4, %v576_v49, -inf }
 0x35f   : > { %658 = vmax.xlane.f32.xlu1 %v657_v51 }
 0x3ec   : > { %v659_v52 = vpop.xlane.xlu1 %658 }
 0x3ed   : > { %v660_v53 = vsub.f32 %v576_v49, %v659_v52 }
 0x3ef   : > { %v661_v54 = vmul.f32 1.442695, %v660_v53 }
 0x3f1   : > { %4986 = vpow2.f32 %v661_v54 }
 0x3fb   : > { %v4987_v55 = vpop.eup %4986 }
 0x3fc   : > { %v663_v56 = vsel %vm656_vm4, %v4987_v55, 0.0 }
 0x3fd   : > { %664 = vadd.xlane.f32.xlu1 %v663_v56 }
 0x48a   : > { %v665_v57 = vpop.xlane.xlu1 %664 }
 0x48b   : > { %4988 = vrcp.f32 %v665_v57 }
 0x495   : > { %v4989_v58 = vpop.eup %4988 }
 0x496   : > { %v667_v59 = vmul.f32 %v4989_v58, %v4987_v55 }
 0x498   : > { %v668_v60 = vsel %vm656_vm4, %v667_v59, 0.0 }
 0x499   : > { %v669_v61 = vrot.slane %v668_v60, 4 }
 0x49b   : > { %v670_v62 = vadd.f32 %v669_v61, %v668_v60 }
 0x49d   : > { %v671_v63 = vrot.slane %v670_v62, 2 }
 0x49f   : > { %v672_v2 = vadd.f32 %v671_v63, %v670_v62 }
 0x4a1   : > { %v673_v3 = vrot.slane %v672_v2, 1 }
 0x4a3   : > { %v674_v4 = vadd.f32 %v673_v3, %v672_v2 }
 0x4a5   : > { %v675_v5 = vadd.f32 1e-09, %v674_v4 }
 0x4a7   : > { %4990 = vrcp.f32 %v675_v5 }
 0x4b1   : > { %v4991_v6 = vpop.eup %4990 }
 0x4b2   : > { %v677_v7 = vmul.f32 %v4991_v6, %v667_v59 }
 0x4b4   : > { %678 = vxpose.xlu0.b32.start.end [1/1] (short) (narrow) %v677_v7, 8 }
 0x534   : > { %v694_v11 = vpop.trf.xlu0 }
 0x535   : > { %4463 = vmatmul.mubr.msk.f32.vlgmr.msra.gmra.mrb[4].mxu0 %vm656_vm4, %v694_v11 }
 0x536   : > { %4807 = vmatpush3.bf16.msra.mxu0 %v4806_v10  ;;  %4473 = vmatprep.mubr.msk.f32.mxu0 %vm5097_vm0, %v5098_v1 }
 0x537   : > { %4808 = vmatprep.subr.bf16.mxu0 %v5096_v0 }
 0x53a   : > { %4810 = vmatpush3.bf16.msra.mxu0 %v4809_v15  ;;  %v4824_v15 = vpack.c.bf16 %v368_v14, %v367_v13 }
 0x53b   : > { %4487 = vmatprep.subr.mxu0 %v5098_v1 }
 0x608   : > { %v779_v19 = vpop.f32.mrb[4].mxu0 }
 0x609   : > { %v783_v20 = vsub.f32 %v5234_v39, %v779_v19  ;;  %v4464_v21 = vpop.f32.mrb[5].mxu0  ;;  %v4827_v19 = vpack.c.bf16 %v370_v18, %v369_v17 }
 0x60b   : > { %4474 = vmatmul.mubr.msk.f32.vlgmr.msra.gmra.mrb[6].mxu0 %vm402_vm3, %v783_v20 }
 0x60c   : > { %4489 = vmatprep.mubr.msk.f32.mxu0 %vm5097_vm0, %v5098_v1 }
 0x6de   : > { %v859_v26 = vpop.f32.mrb[6].mxu0 }
 0x6df   : > { %v860_v27 = vadd.f32 %v4178_v25, %v859_v26  ;;  %v4475_v28 = vpop.f32.mrb[7].mxu0  ;;  %v4836_v25 = vpack.c.bf16 %v378_v24, %v377_v23  ;;  %v379_v26 = vld [vmem:[#allocation2 + $0xf0] sm:$0xff] }
 0x6e1   : > { %v863_v31 = vmax.f32 %v860_v27, 0.0  ;;  %v380_v27 = vld [vmem:[#allocation2 + $0xf8] sm:$0xff] }
 0x6e2   : > { %v4839_v28 = vpack.c.bf16 %v380_v27, %v379_v26 }
 0x6e3   : > { %v5274_v34 = vadd.f32 %v863_v31, %v5234_v39  ;;  %v4830_v39 = vpack.c.bf16 %v373_v41, %v372_v40  ;;  %v4190_v40 = vld [vmem:[%s5636_s4 + $0x9] ss:$0 sm:$0xff] }
 0x6e5   : > { %4485 = vmatmul.mubr.msk.f32.vlgmr.msra.gmra.mrb[4].mxu1 %vm402_vm3, %v5274_v34  ;;  %4488 = vmatpush3.xpose.msk.msra.mxu0 %vm402_vm3, %v5274_v34 }
 0x6e6   : > { %4819 = vmatpush3.bf16.msra.mxu1 %v4818_v33  ;;  %4500 = vmatprep.mubr.msk.f32.mxu1 %vm5097_vm0, %v5098_v1 }
 0x6e7   : > { %4820 = vmatprep.subr.bf16.mxu1 %v5096_v0  ;;  %4503 = vmatprep.subr.mxu0 %v5098_v1 }
 0x6ea   : > { %4822 = vmatpush3.bf16.msra.mxu1 %v4821_v38 }
 0x6eb   : > { %4829 = vmatprep.subr.bf16.mxu1 %v5096_v0 }
 0x6ed   : > { %4501 = vmatmul.mubr.msk.f32.vlgmr.msra.gmra.mrb[6].mxu1 %vm402_vm3, %v5274_v34 }
 0x6ee   : > { %4831 = vmatpush3.bf16.msra.mxu1 %v4830_v39  ;;  %4527 = vmatprep.mubr.msk.f32.mxu1 %vm5097_vm0, %v5098_v1 }
 0x6ef   : > { %4832 = vmatprep.subr.bf16.mxu1 %v5096_v0 }
 0x6f2   : > { %4834 = vmatpush3.bf16.msra.mxu1 %v4833_v44 }
 0x6f3   : > { %4841 = vmatprep.subr.bf16.mxu1 %v5096_v0 }
 0x6f5   : > { %4528 = vmatmul.mubr.msk.f32.vlgmr.msra.gmra.mrb[8].mxu1 %vm402_vm3, %v5274_v34 }
 0x6f6   : > { %4549 = vmatprep.mubr.msk.f32.mxu1 %vm5097_vm0, %v5098_v1 }
 0x7b8   : > { %v934_v45 = vpop.f32.mrb[4].mxu1 }
 0x7b9   : > { %v4486_v46 = vpop.f32.mrb[5].mxu1  ;;  %4490 = vmatmul.mubr.msk.f32.vlgmr.msra.gmra.mrb[8].mxu0 %vm402_vm3, %v934_v45 }
 0x7ba   : > { %4505 = vmatprep.mubr.msk.f32.mxu0 %vm5097_vm0, %v5098_v1  ;;  %v382_v46 = vld [vmem:[#allocation2 + $0x100] sm:$0xff] }
 0x7c0   : > { %v1083_v48 = vpop.f32.mrb[6].mxu1 }
 0x7c1   : > { %v1084_v49 = vadd.f32 %v4183_v47, %v1083_v48  ;;  %v4502_v50 = vpop.f32.mrb[7].mxu1  ;;  %v383_v47 = vld [vmem:[#allocation2 + $0x108] sm:$0xff] }
 0x7c2   : > { %v4842_v48 = vpack.c.bf16 %v383_v47, %v382_v46  ;;  %v385_v50 = vld [vmem:[#allocation2 + $0x118] sm:$0xff] }
 0x7c3   : > { %4504 = vmatpush3.msra.mxu0 %v1084_v49  ;;  %v384_v49 = vld [vmem:[#allocation2 + $0x110] sm:$0xff] }
 0x7c4   : > { %4823 = vmatprep.subr.bf16.mxu0 %v5096_v0  ;;  %4843 = vmatpush3.bf16.msra.mxu1 %v4842_v48 }
 0x7c5   : > { %4844 = vmatprep.subr.bf16.mxu1 %v5096_v0 }
 0x7c8   : > { %v5302_v51 = vpop.f32.mrb[8].mxu1 }
 0x7c9   : > { %v4529_v52 = vpop.f32.mrb[9].mxu1  ;;  %v1365_v38 = vadd.f32 %v5302_v51, %v5212_v12  ;;  %v4845_v51 = vpack.c.bf16 %v385_v50, %v384_v49 }
 0x7cb   : > { %4846 = vmatpush3.bf16.msra.mxu1 %v4845_v51 }
 0x7cc   : > { %4563 = vmatprep.subr.mxu1 %v5098_v1 }
 0x88c   : > { %v1007_v53 = vpop.f32.mrb[8].mxu0 }
 0x88d   : > { %v4491_v54 = vpop.f32.mrb[9].mxu0  ;;  %v1087_v55 = vsel %vm656_vm4, %v1007_v53, -inf }
 0x88e   : > { %1088 = vmax.xlane.f32.xlu1 %v1087_v55 }
 0x91b   : > { %v1089_v56 = vpop.xlane.xlu1 %1088 }
 0x91c   : > { %v1090_v57 = vsub.f32 %v1007_v53, %v1089_v56 }
 0x91e   : > { %v1091_v58 = vmul.f32 1.442695, %v1090_v57 }
 0x920   : > { %4992 = vpow2.f32 %v1091_v58 }
 0x92a   : > { %v4993_v59 = vpop.eup %4992 }
 0x92b   : > { %v1093_v60 = vsel %vm656_vm4, %v4993_v59, 0.0 }
 0x92c   : > { %1094 = vadd.xlane.f32.xlu1 %v1093_v60 }
 0x9b9   : > { %v1095_v61 = vpop.xlane.xlu1 %1094 }
 0x9ba   : > { %4994 = vrcp.f32 %v1095_v61 }
 0x9c4   : > { %v4995_v62 = vpop.eup %4994 }
 0x9c5   : > { %v1097_v63 = vmul.f32 %v4995_v62, %v4993_v59 }
 0x9c7   : > { %v1098_v2 = vsel %vm656_vm4, %v1097_v63, 0.0 }
 0x9c8   : > { %v1099_v3 = vrot.slane %v1098_v2, 4 }
 0x9ca   : > { %v1100_v4 = vadd.f32 %v1099_v3, %v1098_v2  ;;  %v4191_v3 = vld [vmem:[%s5636_s4 + $0xa] ss:$0 sm:$0xff] }
 0x9cc   : > { %v1101_v5 = vrot.slane %v1100_v4, 2 }
 0x9ce   : > { %v1102_v6 = vadd.f32 %v1101_v5, %v1100_v4 }
 0x9d0   : > { %v1103_v7 = vrot.slane %v1102_v6, 1 }
 0x9d2   : > { %v1104_v8 = vadd.f32 %v1103_v7, %v1102_v6 }
 0x9d4   : > { %v1105_v9 = vadd.f32 1e-09, %v1104_v8 }
 0x9d6   : > { %4996 = vrcp.f32 %v1105_v9 }
 0x9e0   : > { %v4997_v10 = vpop.eup %4996 }
 0x9e1   : > { %v1107_v11 = vmul.f32 %v4997_v10, %v1097_v63 }
 0x9e3   : > { %1108 = vxpose.xlu1.b32.start.end [1/1] (short) (narrow) %v1107_v11, 8 }
 0xa63   : > { %v1124_v16 = vpop.trf.xlu1 }
 0xa64   : > { %4506 = vmatmul.mubr.msk.f32.vlgmr.msra.gmra.mrb[10].mxu0 %vm656_vm4, %v1124_v16 }
 0xa65   : > { %4825 = vmatpush3.bf16.msra.mxu0 %v4824_v15  ;;  %4516 = vmatprep.mubr.msk.f32.mxu0 %vm5097_vm0, %v5098_v1 }
 0xa66   : > { %4826 = vmatprep.subr.bf16.mxu0 %v5096_v0 }
 0xa69   : > { %4828 = vmatpush3.bf16.msra.mxu0 %v4827_v19 }
 0xa6a   : > { %4835 = vmatprep.subr.bf16.mxu0 %v5096_v0 }
 0xb37   : > { %v1209_v20 = vpop.f32.mrb[10].mxu0 }
 0xb38   : > { %v1213_v21 = vsub.f32 %v5274_v34, %v1209_v20  ;;  %v4507_v22 = vpop.f32.mrb[11].mxu0 }
 0xb3a   : > { %4517 = vmatmul.mubr.msk.f32.vlgmr.msra.gmra.mrb[12].mxu0 %vm402_vm3, %v1213_v21 }
 0xb3b   : > { %4538 = vmatprep.mubr.msk.f32.mxu0 %vm5097_vm0, %v5098_v1  ;;  %4837 = vmatpush3.bf16.msra.mxu0 %v4836_v25 }
 0xb3c   : > { %4838 = vmatprep.subr.bf16.mxu0 %v5096_v0 }
 0xb3f   : > { %4840 = vmatpush3.bf16.msra.mxu0 %v4839_v28 }
 0xb40   : > { %4847 = vmatprep.subr.bf16.mxu0 %v5096_v0 }
 0xc0d   : > { %v1289_v30 = vpop.f32.mrb[12].mxu0 }
 0xc0e   : > { %v1290_v31 = vadd.f32 %v4186_v29, %v1289_v30  ;;  %v4518_v33 = vpop.f32.mrb[13].mxu0 }
 0xc10   : > { %v1293_v35 = vmax.f32 %v1290_v31, 0.0 }
 0xc12   : > { %v1294_v37 = vadd.f32 %v1293_v35, %v5274_v34 }
 0xc14   : > { %4539 = vmatmul.mubr.msk.f32.vlgmr.msra.gmra.mrb[14].mxu0 %vm402_vm3, %v1294_v37 }
 0xc15   : > { %4560 = vmatprep.mubr.msk.f32.mxu0 %vm5097_vm0, %v5098_v1 }
 0xce7   : > { %v1435_v41 = vpop.f32.mrb[14].mxu0 }
 0xce8   : > { %v1439_v39 = vadd.f32 %v1435_v41, %v1365_v38  ;;  %v4540_v42 = vpop.f32.mrb[15].mxu0  ;;  %v1573_v41 = vld [vmem:[#allocation2 + $0x120] sm:$0xff] }
 0xcea   : > { %v1446_v43 = vadd.f32 %v4190_v40, %v1439_v39  ;;  %v1574_v39 = vld [vmem:[#allocation2 + $0x128] sm:$0xff] }
 0xceb   : > { %v4848_v42 = vpack.c.bf16 %v1574_v39, %v1573_v41  ;;  %v1588_v39 = vld [vmem:[#allocation2 + $0x180] sm:$0xff] }
 0xcec   : > { %v1447_v44 = vsel %vm402_vm3, %v1446_v43, 0.0  ;;  %v1451_v45 = vmul.f32 %v1446_v43, %v1446_v43 }
 0xced   : > { %1448 = vadd.xlane.f32.xlu0 %v1447_v44  ;;  %4849 = vmatpush3.bf16.msra.mxu0 %v4848_v42  ;;  %v1576_v44 = vld [vmem:[#allocation2 + $0x138] sm:$0xff]  ;;  %v1589_v42 = vld [vmem:[#allocation2 + $0x188] sm:$0xff] }
 0xcee   : > { %v1452_v34 = vsel %vm402_vm3, %v1451_v45, 0.0  ;;  %4850 = vmatprep.subr.bf16.mxu0 %v5096_v0 }
 0xcef   : > { %1453 = vadd.xlane.f32.xlu1 %v1452_v34 }
 0xd7a   : > { %v1449_v52 = vpop.xlane.xlu0 %1448 }
 0xd7b   : > { %v1450_v53 = vmul.f32 0.03125, %v1449_v52 }
 0xd7c   : > { %v1454_v54 = vpop.xlane.xlu1 %1453 }
 0xd7d   : > { %v1456_v55 = vmul.f32 %v1450_v53, %v1450_v53  ;;  %v1455_v56 = vmul.f32 0.03125, %v1454_v54  ;;  %v1459_v60 = vsub.f32 %v1446_v43, %v1450_v53  ;;  %v5359_v53 = vld [vmem:[%s5636_s4 + $0x13] ss:$0 sm:$0xff] }
 0xd7f   : > { %v1457_v57 = vsub.f32 %v1455_v56, %v1456_v55  ;;  %v5364_v55 = vld [vmem:[%s5636_s4 + $0x14] ss:$0 sm:$0xff] }
 0xd81   : > { %v1458_v58 = vmax.f32 %v1457_v57, 0.0 }
 0xd83   : > { %v1460_v59 = vadd.f32 1e-05, %v1458_v58  ;;  %v1578_v58 = vld [vmem:[#allocation2 + $0x140] sm:$0xff] }
 0xd85   : > { %4998 = vrsqrt.f32 %v1460_v59  ;;  %v1579_v59 = vld [vmem:[#allocation2 + $0x148] sm:$0xff] }
 0xd8f   : > { %v4999_v61 = vpop.eup %4998 }
 0xd90   : > { %v1462_v62 = vmul.f32 %v4999_v61, %v1459_v60  ;;  %v4854_v60 = vpack.c.bf16 %v1579_v59, %v1578_v58  ;;  %v1580_v61 = vld [vmem:[#allocation2 + $0x150] sm:$0xff] }
 0xd91   : > { %v1595_v59 = vld [vmem:[#allocation2 + $0x1b0] sm:$0xff] }
 0xd92   : > { %v1463_v63 = vmul.f32 %v5225_v32, %v1462_v62  ;;  %v1581_v62 = vld [vmem:[#allocation2 + $0x158] sm:$0xff] }
 0xd94   : > { %v1464_v2 = vadd.f32 %v5230_v36, %v1463_v63 }
 0xd96   : > { %4550 = vmatmul.mubr.msk.f32.vlgmr.msra.gmra.mrb[10].mxu1 %vm402_vm3, %v1464_v2 }
 0xd97   : > { %4565 = vmatprep.mubr.msk.f32.mxu1 %vm5097_vm0, %v5098_v1 }
 0xe69   : > { %v1540_v4 = vpop.f32.mrb[10].mxu1 }
 0xe6a   : > { %v1541_v5 = vadd.f32 %v4191_v3, %v1540_v4  ;;  %v4551_v6 = vpop.f32.mrb[11].mxu1  ;;  %v4857_v3 = vpack.c.bf16 %v1581_v62, %v1580_v61  ;;  %v1603_v62 = vld [vmem:[#allocation2 + $0x1e0] sm:$0xff] }
 0xe6c   : > { %v1544_v7 = vmul.f32 1.442695, %v1541_v5 }
 0xe6e   : > { %5000 = vpow2.f32 %v1544_v7  ;;  %v4206_v7 = vld [vmem:[%s5636_s4 + $0xd] ss:$0 sm:$0xff] }
 0xe78   : > { %v5001_v8 = vpop.eup %5000 }
 0xe79   : > { %v1546_v9 = vadd.f32 1.0, %v5001_v8 }
 0xe7b   : > { %v1547_v10 = vmul.f32 %v1546_v9, %v1546_v9 }
 0xe7d   : > { %v1548_v11 = vadd.f32 1.0, %v1547_v10 }
 0xe7f   : > { %5002 = vrcp.f32 %v1548_v11 }
 0xe89   : > { %v5003_v13 = vpop.eup %5002 }
 0xe8a   : > { %v1550_v14 = vmul.f32 2.0, %v5003_v13 }
 0xe8c   : > { %v1551_v15 = vsub.f32 1.0, %v1550_v14 }
 0xe8e   : > { %v1552_v16 = vmul.f32 %v1551_v15, %v1541_v5 }
 0xe90   : > { %v1553_v17 = vadd.f32 %v1552_v16, %v1446_v43  ;;  %v1575_v43 = vld [vmem:[#allocation2 + $0x130] sm:$0xff] }
 0xe92   : > { %v1554_v18 = vsel %vm402_vm3, %v1553_v17, 0.0  ;;  %v1558_v19 = vmul.f32 %v1553_v17, %v1553_v17 }
 0xe93   : > { %1555 = vadd.xlane.f32.xlu0 %v1554_v18 }
 0xe94   : > { %v1559_v20 = vsel %vm402_vm3, %v1558_v19, 0.0 }
 0xe97   : > { %1560 = vadd.xlane.f32.xlu0 %v1559_v20 }
 0xf20   : > { %v1556_v21 = vpop.xlane.xlu0 %1555 }
 0xf21   : > { %v1557_v22 = vmul.f32 0.03125, %v1556_v21 }
 0xf23   : > { %v1563_v24 = vmul.f32 %v1557_v22, %v1557_v22  ;;  %v1566_v29 = vsub.f32 %v1553_v17, %v1557_v22 }
 0xf24   : > { %v1561_v23 = vpop.xlane.xlu0 %1560 }
 0xf25   : > { %v1562_v25 = vmul.f32 0.03125, %v1561_v23 }
 0xf27   : > { %v1564_v26 = vsub.f32 %v1562_v25, %v1563_v24 }
 0xf29   : > { %v1565_v27 = vmax.f32 %v1564_v26, 0.0 }
 0xf2b   : > { %v1567_v28 = vadd.f32 1e-05, %v1565_v27 }
 0xf2d   : > { %5004 = vrsqrt.f32 %v1567_v28 }
 0xf37   : > { %v5005_v30 = vpop.eup %5004 }
 0xf38   : > { %v1569_v31 = vmul.f32 %v5005_v30, %v1566_v29  ;;  %v1583_v30 = vld [vmem:[#allocation2 + $0x160] sm:$0xff] }
 0xf3a   : > { %v1570_v33 = vmul.f32 %v5225_v32, %v1569_v31  ;;  %v4851_v32 = vpack.c.bf16 %v1576_v44, %v1575_v43  ;;  %v1584_v31 = vld [vmem:[#allocation2 + $0x168] sm:$0xff]  ;;  %v4866_v43 = vpack.c.bf16 %v1589_v42, %v1588_v39 }
 0xf3c   : > { %v5346_v35 = vadd.f32 %v5230_v36, %v1570_v33  ;;  %4852 = vmatpush3.bf16.msra.mxu0 %v4851_v32  ;;  %v4860_v33 = vpack.c.bf16 %v1584_v31, %v1583_v30 }
 0xf3d   : > { %4579 = vmatprep.subr.mxu0 %v5098_v1 }
 0xf3e   : > { %v1633_v37 = vsel %vm402_vm3, %v5346_v35, 0.0  ;;  %v1637_v38 = vmul.f32 %v5346_v35, %v5346_v35 }
 0xf3f   : > { %1634 = vadd.xlane.f32.xlu0 %v1633_v37 }
 0xf40   : > { %v1638_v40 = vsel %vm402_vm3, %v1637_v38, 0.0  ;;  %v1585_v38 = vld [vmem:[#allocation2 + $0x170] sm:$0xff] }
 0xf41   : > { %1639 = vadd.xlane.f32.xlu1 %v1638_v40  ;;  %v1586_v40 = vld [vmem:[#allocation2 + $0x178] sm:$0xff] }
 0xf42   : > { %v4863_v41 = vpack.c.bf16 %v1586_v40, %v1585_v38  ;;  %v1598_v40 = vld [vmem:[#allocation2 + $0x1c0] sm:$0xff] }
 0xfcc   : > { %v1635_v36 = vpop.xlane.xlu0 %1634 }
 0xfcd   : > { %v1636_v45 = vmul.f32 0.03125, %v1635_v36 }
 0xfce   : > { %v1640_v34 = vpop.xlane.xlu1 %1639 }
 0xfcf   : > { %v1642_v46 = vmul.f32 %v1636_v45, %v1636_v45  ;;  %v1641_v47 = vmul.f32 0.03125, %v1640_v34  ;;  %v1645_v51 = vsub.f32 %v5346_v35, %v1636_v45  ;;  %v1590_v45 = vld [vmem:[#allocation2 + $0x190] sm:$0xff]  ;;  %v1591_v34 = vld [vmem:[#allocation2 + $0x198] sm:$0xff] }
 0xfd1   : > { %v1643_v48 = vsub.f32 %v1641_v47, %v1642_v46  ;;  %v4869_v46 = vpack.c.bf16 %v1591_v34, %v1590_v45  ;;  %v4209_v47 = vld [vmem:[%s5636_s4 + $0xe] ss:$0 sm:$0xff] }
 0xfd3   : > { %v1644_v49 = vmax.f32 %v1643_v48, 0.0 }
 0xfd5   : > { %v1646_v50 = vadd.f32 1e-05, %v1644_v49 }
 0xfd7   : > { %5006 = vrsqrt.f32 %v1646_v50 }
 0xfe1   : > { %v5007_v52 = vpop.eup %5006 }
 0xfe2   : > { %v1648_v54 = vmul.f32 %v5007_v52, %v1645_v51  ;;  %v1593_v51 = vld [vmem:[#allocation2 + $0x1a0] sm:$0xff]  ;;  %v1594_v52 = vld [vmem:[#allocation2 + $0x1a8] sm:$0xff] }
 0xfe4   : > { %v1655_v56 = vmul.f32 %v5359_v53, %v1648_v54 }
 0xfe6   : > { %v5368_v57 = vadd.f32 %v5364_v55, %v1655_v56  ;;  %v4872_v56 = vpack.c.bf16 %v1594_v52, %v1593_v51  ;;  %v4217_v52 = vld [vmem:[%s5636_s4 + $0x10] ss:$0 sm:$0xff] }
 0xfe8   : > { %4561 = vmatmul.mubr.msk.f32.vlgmr.msra.gmra.mrb[16].mxu0 %vm402_vm3, %v5368_v57  ;;  %4564 = vmatpush3.xpose.msk.msra.mxu1 %vm402_vm3, %v5368_v57 }
 0xfe9   : > { %4853 = vmatprep.subr.bf16.mxu1 %v5096_v0  ;;  %4581 = vmatprep.mubr.msk.f32.mxu0 %vm5097_vm0, %v5098_v1 }
0x10bb   : > { %v1732_v63 = vpop.f32.mrb[16].mxu0 }
0x10bc   : > { %v4562_v2 = vpop.f32.mrb[17].mxu0  ;;  %4566 = vmatmul.mubr.msk.f32.vlgmr.msra.gmra.mrb[12].mxu1 %vm402_vm3, %v1732_v63  ;;  %v1604_v63 = vld [vmem:[#allocation2 + $0x1e8] sm:$0xff] }
0x10bd   : > { %4855 = vmatpush3.bf16.msra.mxu1 %v4854_v60  ;;  %4576 = vmatprep.mubr.msk.f32.mxu1 %vm5097_vm0, %v5098_v1  ;;  %v1596_v60 = vld [vmem:[#allocation2 + $0x1b8] sm:$0xff]  ;;  %v1605_v2 = vld [vmem:[#allocation2 + $0x1f0] sm:$0xff] }
0x10be   : > { %4856 = vmatprep.subr.bf16.mxu1 %v5096_v0  ;;  %v4875_v61 = vpack.c.bf16 %v1596_v60, %v1595_v59 }
0x10c1   : > { %4858 = vmatpush3.bf16.msra.mxu1 %v4857_v3  ;;  %v1606_v3 = vld [vmem:[#allocation2 + $0x1f8] sm:$0xff] }
0x10c2   : > { %4865 = vmatprep.subr.bf16.mxu1 %v5096_v0 }
0x10c4   : > { %4577 = vmatmul.mubr.msk.f32.vlgmr.msra.gmra.mrb[14].mxu1 %vm402_vm3, %v5368_v57 }
0x10c5   : > { %4603 = vmatprep.mubr.msk.f32.mxu1 %vm5097_vm0, %v5098_v1  ;;  %4867 = vmatpush3.bf16.msra.mxu1 %v4866_v43  ;;  %v1600_v43 = vld [vmem:[#allocation2 + $0x1d0] sm:$0xff] }
0x10c6   : > { %4868 = vmatprep.subr.bf16.mxu1 %v5096_v0 }
0x10c9   : > { %4870 = vmatpush3.bf16.msra.mxu1 %v4869_v46  ;;  %v1608_v46 = vld [vmem:[#allocation2 + $0x200] sm:$0xff] }
0x10ca   : > { %4871 = vmatprep.subr.bf16.mxu1 %v5096_v0 }
0x118f   : > { %v1805_v4 = vpop.f32.mrb[12].mxu1 }
0x1190   : > { %v4567_v5 = vpop.f32.mrb[13].mxu1  ;;  %v1885_v6 = vsel %vm656_vm4, %v1805_v4, -inf }
0x1191   : > { %1886 = vmax.xlane.f32.xlu0 %v1885_v6 }
0x1197   : > { %v1881_v8 = vpop.f32.mrb[14].mxu1 }
0x1198   : > { %v1882_v9 = vadd.f32 %v4206_v7, %v1881_v8  ;;  %v4578_v10 = vpop.f32.mrb[15].mxu1  ;;  %v4214_v7 = vld [vmem:[%s5636_s4 + $0xf] ss:$0 sm:$0xff] }
0x119a   : > { %4580 = vmatpush3.msra.mxu0 %v1882_v9 }
0x119b   : > { %4859 = vmatprep.subr.bf16.mxu0 %v5096_v0 }
0x121e   : > { %v1887_v11 = vpop.xlane.xlu0 %1886 }
0x121f   : > { %v1888_v13 = vsub.f32 %v1805_v4, %v1887_v11  ;;  %v4887_v4 = vpack.c.bf16 %v1606_v3, %v1605_v2 }
0x1221   : > { %v1889_v14 = vmul.f32 1.442695, %v1888_v13 }
0x1223   : > { %5008 = vpow2.f32 %v1889_v14 }
0x122d   : > { %v5009_v15 = vpop.eup %5008 }
0x122e   : > { %v1891_v16 = vsel %vm656_vm4, %v5009_v15, 0.0 }
0x122f   : > { %1892 = vadd.xlane.f32.xlu1 %v1891_v16 }
0x12bc   : > { %v1893_v17 = vpop.xlane.xlu1 %1892 }
0x12bd   : > { %5010 = vrcp.f32 %v1893_v17 }
0x12c7   : > { %v5011_v18 = vpop.eup %5010 }
0x12c8   : > { %v1895_v19 = vmul.f32 %v5011_v18, %v5009_v15 }
0x12ca   : > { %v1896_v20 = vsel %vm656_vm4, %v1895_v19, 0.0 }
0x12cb   : > { %v1897_v21 = vrot.slane %v1896_v20, 4 }
0x12cd   : > { %v1898_v22 = vadd.f32 %v1897_v21, %v1896_v20 }
0x12cf   : > { %v1899_v23 = vrot.slane %v1898_v22, 2 }
0x12d1   : > { %v1900_v24 = vadd.f32 %v1899_v23, %v1898_v22 }
0x12d3   : > { %v1901_v25 = vrot.slane %v1900_v24, 1 }
0x12d5   : > { %v1902_v26 = vadd.f32 %v1901_v25, %v1900_v24 }
0x12d7   : > { %v1903_v27 = vadd.f32 1e-09, %v1902_v26 }
0x12d9   : > { %5012 = vrcp.f32 %v1903_v27 }
0x12e3   : > { %v5013_v28 = vpop.eup %5012 }
0x12e4   : > { %v1905_v29 = vmul.f32 %v5013_v28, %v1895_v19 }
0x12e6   : > { %1906 = vxpose.xlu0.b32.start.end [1/1] (short) (narrow) %v1905_v29, 8 }
0x1366   : > { %v1922_v37 = vpop.trf.xlu0 }
0x1367   : > { %4582 = vmatmul.mubr.msk.f32.vlgmr.msra.gmra.mrb[18].mxu0 %vm656_vm4, %v1922_v37 }
0x1368   : > { %4861 = vmatpush3.bf16.msra.mxu0 %v4860_v33  ;;  %4592 = vmatprep.mubr.msk.f32.mxu0 %vm5097_vm0, %v5098_v1 }
0x1369   : > { %4862 = vmatprep.subr.bf16.mxu0 %v5096_v0 }
0x136c   : > { %4864 = vmatpush3.bf16.msra.mxu0 %v4863_v41  ;;  %v1599_v41 = vld [vmem:[#allocation2 + $0x1c8] sm:$0xff] }
0x136d   : > { %4606 = vmatprep.subr.mxu0 %v5098_v1  ;;  %v4878_v39 = vpack.c.bf16 %v1599_v41, %v1598_v40 }
0x143a   : > { %v2007_v44 = vpop.f32.mrb[18].mxu0 }
0x143b   : > { %v2011_v32 = vsub.f32 %v5368_v57, %v2007_v44  ;;  %v4583_v36 = vpop.f32.mrb[19].mxu0  ;;  %v1601_v44 = vld [vmem:[#allocation2 + $0x1d8] sm:$0xff] }
0x143d   : > { %4593 = vmatmul.mubr.msk.f32.vlgmr.msra.gmra.mrb[20].mxu0 %vm402_vm3, %v2011_v32  ;;  %v4881_v32 = vpack.c.bf16 %v1601_v44, %v1600_v43 }
0x143e   : > { %4608 = vmatprep.mubr.msk.f32.mxu0 %vm5097_vm0, %v5098_v1 }
0x1510   : > { %v2087_v48 = vpop.f32.mrb[20].mxu0 }
0x1511   : > { %v2088_v49 = vadd.f32 %v4209_v47, %v2087_v48  ;;  %v4594_v50 = vpop.f32.mrb[21].mxu0  ;;  %v1609_v47 = vld [vmem:[#allocation2 + $0x208] sm:$0xff] }
0x1512   : > { %v4890_v48 = vpack.c.bf16 %v1609_v47, %v1608_v46  ;;  %v1611_v50 = vld [vmem:[#allocation2 + $0x218] sm:$0xff] }
0x1513   : > { %v2091_v54 = vmax.f32 %v2088_v49, 0.0  ;;  %v1610_v49 = vld [vmem:[#allocation2 + $0x210] sm:$0xff] }
0x1514   : > { %v4893_v51 = vpack.c.bf16 %v1611_v50, %v1610_v49 }
0x1515   : > { %v5408_v58 = vadd.f32 %v2091_v54, %v5368_v57  ;;  %v4884_v57 = vpack.c.bf16 %v1604_v63, %v1603_v62  ;;  %v4221_v63 = vld [vmem:[%s5636_s4 + $0x11] ss:$0 sm:$0xff] }
0x1517   : > { %4604 = vmatmul.mubr.msk.f32.vlgmr.msra.gmra.mrb[16].mxu1 %vm402_vm3, %v5408_v58  ;;  %4607 = vmatpush3.xpose.msk.msra.mxu0 %vm402_vm3, %v5408_v58 }
0x1518   : > { %4873 = vmatpush3.bf16.msra.mxu1 %v4872_v56  ;;  %4619 = vmatprep.mubr.msk.f32.mxu1 %vm5097_vm0, %v5098_v1 }
0x1519   : > { %4874 = vmatprep.subr.bf16.mxu1 %v5096_v0  ;;  %4622 = vmatprep.subr.mxu0 %v5098_v1 }
0x151c   : > { %4876 = vmatpush3.bf16.msra.mxu1 %v4875_v61 }
0x151d   : > { %4883 = vmatprep.subr.bf16.mxu1 %v5096_v0 }
0x151f   : > { %4620 = vmatmul.mubr.msk.f32.vlgmr.msra.gmra.mrb[18].mxu1 %vm402_vm3, %v5408_v58 }
0x1520   : > { %4885 = vmatpush3.bf16.msra.mxu1 %v4884_v57  ;;  %4646 = vmatprep.mubr.msk.f32.mxu1 %vm5097_vm0, %v5098_v1 }
0x1521   : > { %4886 = vmatprep.subr.bf16.mxu1 %v5096_v0 }
0x1524   : > { %4888 = vmatpush3.bf16.msra.mxu1 %v4887_v4 }
0x1525   : > { %4895 = vmatprep.subr.bf16.mxu1 %v5096_v0 }
0x1527   : > { %4647 = vmatmul.mubr.msk.f32.vlgmr.msra.gmra.mrb[20].mxu1 %vm402_vm3, %v5408_v58 }
0x1528   : > { %4668 = vmatprep.mubr.msk.f32.mxu1 %vm5097_vm0, %v5098_v1 }
0x15ea   : > { %v2162_v5 = vpop.f32.mrb[16].mxu1 }
0x15eb   : > { %v4605_v6 = vpop.f32.mrb[17].mxu1  ;;  %4609 = vmatmul.mubr.msk.f32.vlgmr.msra.gmra.mrb[22].mxu0 %vm402_vm3, %v2162_v5 }
0x15ec   : > { %4624 = vmatprep.mubr.msk.f32.mxu0 %vm5097_vm0, %v5098_v1 }
0x15f2   : > { %v2311_v8 = vpop.f32.mrb[18].mxu1 }
0x15f3   : > { %v2312_v9 = vadd.f32 %v4214_v7, %v2311_v8  ;;  %v4621_v10 = vpop.f32.mrb[19].mxu1  ;;  %v1613_v7 = vld [vmem:[#allocation2 + $0x220] sm:$0xff]  ;;  %v1614_v8 = vld [vmem:[#allocation2 + $0x228] sm:$0xff] }
0x15f4   : > { %v1616_v10 = vld [vmem:[#allocation2 + $0x238] sm:$0xff] }
0x15f5   : > { %4623 = vmatpush3.msra.mxu0 %v2312_v9  ;;  %v4896_v9 = vpack.c.bf16 %v1614_v8, %v1613_v7 }
0x15f6   : > { %4877 = vmatprep.subr.bf16.mxu0 %v5096_v0 }
0x15f7   : > { %4897 = vmatpush3.bf16.msra.mxu1 %v4896_v9 }
0x15f8   : > { %4898 = vmatprep.subr.bf16.mxu1 %v5096_v0 }
0x15fa   : > { %v5436_v11 = vpop.f32.mrb[20].mxu1 }
0x15fb   : > { %v4648_v13 = vpop.f32.mrb[21].mxu1  ;;  %v2593_v62 = vadd.f32 %v5436_v11, %v5346_v35  ;;  %v1615_v35 = vld [vmem:[#allocation2 + $0x230] sm:$0xff] }
0x15fc   : > { %v4899_v11 = vpack.c.bf16 %v1616_v10, %v1615_v35 }
0x15fe   : > { %4900 = vmatpush3.bf16.msra.mxu1 %v4899_v11 }
0x15ff   : > { %4682 = vmatprep.subr.mxu1 %v5098_v1 }
0x16be   : > { %v2235_v14 = vpop.f32.mrb[22].mxu0 }
0x16bf   : > { %v4610_v15 = vpop.f32.mrb[23].mxu0  ;;  %v2315_v16 = vsel %vm656_vm4, %v2235_v14, -inf }
0x16c0   : > { %2316 = vmax.xlane.f32.xlu1 %v2315_v16 }
0x174d   : > { %v2317_v17 = vpop.xlane.xlu1 %2316 }
0x174e   : > { %v2318_v18 = vsub.f32 %v2235_v14, %v2317_v17 }
0x1750   : > { %v2319_v19 = vmul.f32 1.442695, %v2318_v18 }
0x1752   : > { %5014 = vpow2.f32 %v2319_v19 }
0x175c   : > { %v5015_v20 = vpop.eup %5014 }
0x175d   : > { %v2321_v21 = vsel %vm656_vm4, %v5015_v20, 0.0 }
0x175e   : > { %2322 = vadd.xlane.f32.xlu1 %v2321_v21 }
0x17eb   : > { %v2323_v22 = vpop.xlane.xlu1 %2322 }
0x17ec   : > { %5016 = vrcp.f32 %v2323_v22 }
0x17f6   : > { %v5017_v23 = vpop.eup %5016 }
0x17f7   : > { %v2325_v24 = vmul.f32 %v5017_v23, %v5015_v20 }
0x17f9   : > { %v2326_v25 = vsel %vm656_vm4, %v2325_v24, 0.0 }
0x17fa   : > { %v2327_v26 = vrot.slane %v2326_v25, 4 }
0x17fc   : > { %v2328_v27 = vadd.f32 %v2327_v26, %v2326_v25  ;;  %v4222_v26 = vld [vmem:[%s5636_s4 + $0x12] ss:$0 sm:$0xff] }
0x17fe   : > { %v2329_v28 = vrot.slane %v2328_v27, 2 }
0x1800   : > { %v2330_v29 = vadd.f32 %v2329_v28, %v2328_v27 }
0x1802   : > { %v2331_v30 = vrot.slane %v2330_v29, 1 }
0x1804   : > { %v2332_v31 = vadd.f32 %v2331_v30, %v2330_v29 }
0x1806   : > { %v2333_v33 = vadd.f32 1e-09, %v2332_v31 }
0x1808   : > { %5018 = vrcp.f32 %v2333_v33 }
0x1812   : > { %v5019_v37 = vpop.eup %5018 }
0x1813   : > { %v2335_v38 = vmul.f32 %v5019_v37, %v2325_v24 }
0x1815   : > { %2336 = vxpose.xlu1.b32.start.end [1/1] (short) (narrow) %v2335_v38, 8 }
0x1895   : > { %v2352_v42 = vpop.trf.xlu1 }
0x1896   : > { %4625 = vmatmul.mubr.msk.f32.vlgmr.msra.gmra.mrb[24].mxu0 %vm656_vm4, %v2352_v42 }
0x1897   : > { %4879 = vmatpush3.bf16.msra.mxu0 %v4878_v39  ;;  %4635 = vmatprep.mubr.msk.f32.mxu0 %vm5097_vm0, %v5098_v1 }
0x1898   : > { %4880 = vmatprep.subr.bf16.mxu0 %v5096_v0 }
0x189b   : > { %4882 = vmatpush3.bf16.msra.mxu0 %v4881_v32 }
0x189c   : > { %4889 = vmatprep.subr.bf16.mxu0 %v5096_v0 }
0x1969   : > { %v2437_v36 = vpop.f32.mrb[24].mxu0 }
0x196a   : > { %v2441_v45 = vsub.f32 %v5408_v58, %v2437_v36  ;;  %v4626_v34 = vpop.f32.mrb[25].mxu0 }
0x196c   : > { %4636 = vmatmul.mubr.msk.f32.vlgmr.msra.gmra.mrb[26].mxu0 %vm402_vm3, %v2441_v45 }
0x196d   : > { %4657 = vmatprep.mubr.msk.f32.mxu0 %vm5097_vm0, %v5098_v1  ;;  %4891 = vmatpush3.bf16.msra.mxu0 %v4890_v48 }
0x196e   : > { %4892 = vmatprep.subr.bf16.mxu0 %v5096_v0 }
0x1971   : > { %4894 = vmatpush3.bf16.msra.mxu0 %v4893_v51 }
0x1972   : > { %4901 = vmatprep.subr.bf16.mxu0 %v5096_v0 }
0x1a3f   : > { %v2517_v54 = vpop.f32.mrb[26].mxu0 }
0x1a40   : > { %v2518_v56 = vadd.f32 %v4217_v52, %v2517_v54  ;;  %v4637_v59 = vpop.f32.mrb[27].mxu0 }
0x1a42   : > { %v2521_v60 = vmax.f32 %v2518_v56, 0.0 }
0x1a44   : > { %v2522_v61 = vadd.f32 %v2521_v60, %v5408_v58 }
0x1a46   : > { %4658 = vmatmul.mubr.msk.f32.vlgmr.msra.gmra.mrb[28].mxu0 %vm402_vm3, %v2522_v61 }
0x1a47   : > { %4679 = vmatprep.mubr.msk.f32.mxu0 %vm5097_vm0, %v5098_v1 }
0x1b19   : > { %v2663_v57 = vpop.f32.mrb[28].mxu0 }
0x1b1a   : > { %v2667_v2 = vadd.f32 %v2663_v57, %v2593_v62  ;;  %v4659_v3 = vpop.f32.mrb[29].mxu0  ;;  %v2801_v57 = vld [vmem:[#allocation2 + $0x240] sm:$0xff] }
0x1b1c   : > { %v2674_v4 = vadd.f32 %v4221_v63, %v2667_v2  ;;  %v2802_v2 = vld [vmem:[#allocation2 + $0x248] sm:$0xff] }
0x1b1d   : > { %v4902_v3 = vpack.c.bf16 %v2802_v2, %v2801_v57  ;;  %v2816_v2 = vld [vmem:[#allocation2 + $0x2a0] sm:$0xff] }
0x1b1e   : > { %v2675_v5 = vsel %vm402_vm3, %v2674_v4, 0.0  ;;  %v2679_v6 = vmul.f32 %v2674_v4, %v2674_v4 }
0x1b1f   : > { %2676 = vadd.xlane.f32.xlu0 %v2675_v5  ;;  %4903 = vmatpush3.bf16.msra.mxu0 %v4902_v3  ;;  %v2804_v5 = vld [vmem:[#allocation2 + $0x258] sm:$0xff]  ;;  %v2817_v3 = vld [vmem:[#allocation2 + $0x2a8] sm:$0xff] }
0x1b20   : > { %v2680_v58 = vsel %vm402_vm3, %v2679_v6, 0.0  ;;  %4904 = vmatprep.subr.bf16.mxu0 %v5096_v0 }
0x1b21   : > { %2681 = vadd.xlane.f32.xlu1 %v2680_v58 }
0x1bac   : > { %v2677_v13 = vpop.xlane.xlu0 %2676 }
0x1bad   : > { %v2678_v14 = vmul.f32 0.03125, %v2677_v13 }
0x1bae   : > { %v2682_v15 = vpop.xlane.xlu1 %2681 }
0x1baf   : > { %v2684_v16 = vmul.f32 %v2678_v14, %v2678_v14  ;;  %v2683_v17 = vmul.f32 0.03125, %v2682_v15  ;;  %v2687_v21 = vsub.f32 %v2674_v4, %v2678_v14  ;;  %v5493_v14 = vld [vmem:[%s5636_s4 + $0x1b] ss:$0 sm:$0xff] }
0x1bb1   : > { %v2685_v18 = vsub.f32 %v2683_v17, %v2684_v16  ;;  %v5498_v16 = vld [vmem:[%s5636_s4 + $0x1c] ss:$0 sm:$0xff] }
0x1bb3   : > { %v2686_v19 = vmax.f32 %v2685_v18, 0.0 }
0x1bb5   : > { %v2688_v20 = vadd.f32 1e-05, %v2686_v19  ;;  %v2806_v19 = vld [vmem:[#allocation2 + $0x260] sm:$0xff] }
0x1bb7   : > { %5020 = vrsqrt.f32 %v2688_v20  ;;  %v2807_v20 = vld [vmem:[#allocation2 + $0x268] sm:$0xff] }
0x1bc1   : > { %v5021_v22 = vpop.eup %5020 }
0x1bc2   : > { %v2690_v23 = vmul.f32 %v5021_v22, %v2687_v21  ;;  %v4908_v21 = vpack.c.bf16 %v2807_v20, %v2806_v19  ;;  %v2808_v22 = vld [vmem:[#allocation2 + $0x270] sm:$0xff] }
0x1bc3   : > { %v2823_v20 = vld [vmem:[#allocation2 + $0x2d0] sm:$0xff] }
0x1bc4   : > { %v2691_v24 = vmul.f32 %v5359_v53, %v2690_v23  ;;  %v2809_v23 = vld [vmem:[#allocation2 + $0x278] sm:$0xff] }
0x1bc6   : > { %v2692_v25 = vadd.f32 %v5364_v55, %v2691_v24 }
0x1bc8   : > { %4669 = vmatmul.mubr.msk.f32.vlgmr.msra.gmra.mrb[22].mxu1 %vm402_vm3, %v2692_v25 }
0x1bc9   : > { %4684 = vmatprep.mubr.msk.f32.mxu1 %vm5097_vm0, %v5098_v1 }
0x1c9b   : > { %v2768_v27 = vpop.f32.mrb[22].mxu1 }
0x1c9c   : > { %v2769_v28 = vadd.f32 %v4222_v26, %v2768_v27  ;;  %v4670_v29 = vpop.f32.mrb[23].mxu1  ;;  %v4911_v26 = vpack.c.bf16 %v2809_v23, %v2808_v22  ;;  %v2831_v23 = vld [vmem:[#allocation2 + $0x300] sm:$0xff] }
0x1c9e   : > { %v2772_v30 = vmul.f32 1.442695, %v2769_v28 }
0x1ca0   : > { %5022 = vpow2.f32 %v2772_v30  ;;  %v4237_v30 = vld [vmem:[%s5636_s4 + $0x15] ss:$0 sm:$0xff] }
0x1caa   : > { %v5023_v31 = vpop.eup %5022 }
0x1cab   : > { %v2774_v33 = vadd.f32 1.0, %v5023_v31 }
0x1cad   : > { %v2775_v37 = vmul.f32 %v2774_v33, %v2774_v33 }
0x1caf   : > { %v2776_v38 = vadd.f32 1.0, %v2775_v37 }
0x1cb1   : > { %5024 = vrcp.f32 %v2776_v38 }
0x1cbb   : > { %v5025_v40 = vpop.eup %5024 }
0x1cbc   : > { %v2778_v41 = vmul.f32 2.0, %v5025_v40 }
0x1cbe   : > { %v2779_v39 = vsub.f32 1.0, %v2778_v41 }
0x1cc0   : > { %v2780_v42 = vmul.f32 %v2779_v39, %v2769_v28 }
0x1cc2   : > { %v2781_v43 = vadd.f32 %v2780_v42, %v2674_v4  ;;  %v2803_v4 = vld [vmem:[#allocation2 + $0x250] sm:$0xff] }
0x1cc4   : > { %v2782_v44 = vsel %vm402_vm3, %v2781_v43, 0.0  ;;  %v2786_v32 = vmul.f32 %v2781_v43, %v2781_v43 }
0x1cc5   : > { %2783 = vadd.xlane.f32.xlu0 %v2782_v44 }
0x1cc6   : > { %v2787_v36 = vsel %vm402_vm3, %v2786_v32, 0.0 }
0x1cc9   : > { %2788 = vadd.xlane.f32.xlu0 %v2787_v36 }
0x1d52   : > { %v2784_v45 = vpop.xlane.xlu0 %2783 }
0x1d53   : > { %v2785_v34 = vmul.f32 0.03125, %v2784_v45 }
0x1d55   : > { %v2791_v47 = vmul.f32 %v2785_v34, %v2785_v34  ;;  %v2794_v52 = vsub.f32 %v2781_v43, %v2785_v34 }
0x1d56   : > { %v2789_v46 = vpop.xlane.xlu0 %2788 }
0x1d57   : > { %v2790_v48 = vmul.f32 0.03125, %v2789_v46 }
0x1d59   : > { %v2792_v49 = vsub.f32 %v2790_v48, %v2791_v47 }
0x1d5b   : > { %v2793_v50 = vmax.f32 %v2792_v49, 0.0 }
0x1d5d   : > { %v2795_v51 = vadd.f32 1e-05, %v2793_v50 }
0x1d5f   : > { %5026 = vrsqrt.f32 %v2795_v51 }
0x1d69   : > { %v5027_v54 = vpop.eup %5026 }
0x1d6a   : > { %v2797_v56 = vmul.f32 %v5027_v54, %v2794_v52  ;;  %v2811_v54 = vld [vmem:[#allocation2 + $0x280] sm:$0xff] }
0x1d6c   : > { %v2798_v59 = vmul.f32 %v5359_v53, %v2797_v56  ;;  %v4905_v53 = vpack.c.bf16 %v2804_v5, %v2803_v4  ;;  %v2812_v56 = vld [vmem:[#allocation2 + $0x288] sm:$0xff]  ;;  %v4920_v4 = vpack.c.bf16 %v2817_v3, %v2816_v2 }
0x1d6e   : > { %v5480_v60 = vadd.f32 %v5364_v55, %v2798_v59  ;;  %4906 = vmatpush3.bf16.msra.mxu0 %v4905_v53  ;;  %v4914_v59 = vpack.c.bf16 %v2812_v56, %v2811_v54 }
0x1d6f   : > { %4698 = vmatprep.subr.mxu0 %v5098_v1 }
0x1d70   : > { %v2861_v61 = vsel %vm402_vm3, %v5480_v60, 0.0  ;;  %v2865_v62 = vmul.f32 %v5480_v60, %v5480_v60 }
0x1d71   : > { %2862 = vadd.xlane.f32.xlu0 %v2861_v61 }
0x1d72   : > { %v2866_v63 = vsel %vm402_vm3, %v2865_v62, 0.0  ;;  %v2813_v62 = vld [vmem:[#allocation2 + $0x290] sm:$0xff] }
0x1d73   : > { %2867 = vadd.xlane.f32.xlu1 %v2866_v63  ;;  %v2814_v63 = vld [vmem:[#allocation2 + $0x298] sm:$0xff] }
0x1d74   : > { %v4917_v57 = vpack.c.bf16 %v2814_v63, %v2813_v62  ;;  %v2826_v63 = vld [vmem:[#allocation2 + $0x2e0] sm:$0xff] }
0x1dfe   : > { %v2863_v55 = vpop.xlane.xlu0 %2862 }
0x1dff   : > { %v2864_v6 = vmul.f32 0.03125, %v2863_v55 }
0x1e00   : > { %v2868_v58 = vpop.xlane.xlu1 %2867 }
0x1e01   : > { %v2870_v7 = vmul.f32 %v2864_v6, %v2864_v6  ;;  %v2869_v8 = vmul.f32 0.03125, %v2868_v58  ;;  %v2873_v11 = vsub.f32 %v5480_v60, %v2864_v6  ;;  %v2818_v6 = vld [vmem:[#allocation2 + $0x2b0] sm:$0xff]  ;;  %v2819_v58 = vld [vmem:[#allocation2 + $0x2b8] sm:$0xff] }
0x1e03   : > { %v2871_v9 = vsub.f32 %v2869_v8, %v2870_v7  ;;  %v4923_v7 = vpack.c.bf16 %v2819_v58, %v2818_v6  ;;  %v4240_v8 = vld [vmem:[%s5636_s4 + $0x16] ss:$0 sm:$0xff] }
0x1e05   : > { %v2872_v35 = vmax.f32 %v2871_v9, 0.0 }
0x1e07   : > { %v2874_v10 = vadd.f32 1e-05, %v2872_v35 }
0x1e09   : > { %5028 = vrsqrt.f32 %v2874_v10 }
0x1e13   : > { %v5029_v13 = vpop.eup %5028 }
0x1e14   : > { %v2876_v15 = vmul.f32 %v5029_v13, %v2873_v11  ;;  %v2821_v11 = vld [vmem:[#allocation2 + $0x2c0] sm:$0xff]  ;;  %v2822_v13 = vld [vmem:[#allocation2 + $0x2c8] sm:$0xff] }
0x1e16   : > { %v2883_v17 = vmul.f32 %v5493_v14, %v2876_v15 }
0x1e18   : > { %v5502_v18 = vadd.f32 %v5498_v16, %v2883_v17  ;;  %v4926_v17 = vpack.c.bf16 %v2822_v13, %v2821_v11  ;;  %v4248_v13 = vld [vmem:[%s5636_s4 + $0x18] ss:$0 sm:$0xff] }
0x1e1a   : > { %4680 = vmatmul.mubr.msk.f32.vlgmr.msra.gmra.mrb[30].mxu0 %vm402_vm3, %v5502_v18  ;;  %4683 = vmatpush3.xpose.msk.msra.mxu1 %vm402_vm3, %v5502_v18 }
0x1e1b   : > { %4907 = vmatprep.subr.bf16.mxu1 %v5096_v0  ;;  %4700 = vmatprep.mubr.msk.f32.mxu0 %vm5097_vm0, %v5098_v1 }
0x1eed   : > { %v2960_v24 = vpop.f32.mrb[30].mxu0 }
0x1eee   : > { %v4681_v25 = vpop.f32.mrb[31].mxu0  ;;  %4685 = vmatmul.mubr.msk.f32.vlgmr.msra.gmra.mrb[24].mxu1 %vm402_vm3, %v2960_v24  ;;  %v2832_v24 = vld [vmem:[#allocation2 + $0x308] sm:$0xff] }
0x1eef   : > { %4909 = vmatpush3.bf16.msra.mxu1 %v4908_v21  ;;  %4695 = vmatprep.mubr.msk.f32.mxu1 %vm5097_vm0, %v5098_v1  ;;  %v2824_v21 = vld [vmem:[#allocation2 + $0x2d8] sm:$0xff]  ;;  %v2833_v25 = vld [vmem:[#allocation2 + $0x310] sm:$0xff] }
0x1ef0   : > { %4910 = vmatprep.subr.bf16.mxu1 %v5096_v0  ;;  %v4929_v22 = vpack.c.bf16 %v2824_v21, %v2823_v20 }
0x1ef3   : > { %4912 = vmatpush3.bf16.msra.mxu1 %v4911_v26  ;;  %v2834_v26 = vld [vmem:[#allocation2 + $0x318] sm:$0xff] }
0x1ef4   : > { %4919 = vmatprep.subr.bf16.mxu1 %v5096_v0 }
0x1ef6   : > { %4696 = vmatmul.mubr.msk.f32.vlgmr.msra.gmra.mrb[26].mxu1 %vm402_vm3, %v5502_v18 }
0x1ef7   : > { %4722 = vmatprep.mubr.msk.f32.mxu1 %vm5097_vm0, %v5098_v1  ;;  %4921 = vmatpush3.bf16.msra.mxu1 %v4920_v4  ;;  %v2828_v4 = vld [vmem:[#allocation2 + $0x2f0] sm:$0xff] }
0x1ef8   : > { %4922 = vmatprep.subr.bf16.mxu1 %v5096_v0 }
0x1efb   : > { %4924 = vmatpush3.bf16.msra.mxu1 %v4923_v7  ;;  %v2836_v7 = vld [vmem:[#allocation2 + $0x320] sm:$0xff] }
0x1efc   : > { %4925 = vmatprep.subr.bf16.mxu1 %v5096_v0 }
0x1fc1   : > { %v3033_v27 = vpop.f32.mrb[24].mxu1 }
0x1fc2   : > { %v4686_v28 = vpop.f32.mrb[25].mxu1  ;;  %v3113_v29 = vsel %vm656_vm4, %v3033_v27, -inf }
0x1fc3   : > { %3114 = vmax.xlane.f32.xlu0 %v3113_v29 }
0x1fc9   : > { %v3109_v31 = vpop.f32.mrb[26].mxu1 }
0x1fca   : > { %v3110_v33 = vadd.f32 %v4237_v30, %v3109_v31  ;;  %v4697_v37 = vpop.f32.mrb[27].mxu1  ;;  %v4245_v30 = vld [vmem:[%s5636_s4 + $0x17] ss:$0 sm:$0xff] }
0x1fcc   : > { %4699 = vmatpush3.msra.mxu0 %v3110_v33 }
0x1fcd   : > { %4913 = vmatprep.subr.bf16.mxu0 %v5096_v0 }
0x2050   : > { %v3115_v38 = vpop.xlane.xlu0 %3114 }
0x2051   : > { %v3116_v40 = vsub.f32 %v3033_v27, %v3115_v38  ;;  %v4941_v27 = vpack.c.bf16 %v2834_v26, %v2833_v25 }
0x2053   : > { %v3117_v41 = vmul.f32 1.442695, %v3116_v40 }
0x2055   : > { %5030 = vpow2.f32 %v3117_v41 }
0x205f   : > { %v5031_v39 = vpop.eup %5030 }
0x2060   : > { %v3119_v42 = vsel %vm656_vm4, %v5031_v39, 0.0 }
0x2061   : > { %3120 = vadd.xlane.f32.xlu1 %v3119_v42 }
0x20ee   : > { %v3121_v43 = vpop.xlane.xlu1 %3120 }
0x20ef   : > { %5032 = vrcp.f32 %v3121_v43 }
0x20f9   : > { %v5033_v44 = vpop.eup %5032 }
0x20fa   : > { %v3123_v32 = vmul.f32 %v5033_v44, %v5031_v39 }
0x20fc   : > { %v3124_v36 = vsel %vm656_vm4, %v3123_v32, 0.0 }
0x20fd   : > { %v3125_v45 = vrot.slane %v3124_v36, 4 }
0x20ff   : > { %v3126_v34 = vadd.f32 %v3125_v45, %v3124_v36 }
0x2101   : > { %v3127_v46 = vrot.slane %v3126_v34, 2 }
0x2103   : > { %v3128_v47 = vadd.f32 %v3127_v46, %v3126_v34 }
0x2105   : > { %v3129_v48 = vrot.slane %v3128_v47, 1 }
0x2107   : > { %v3130_v49 = vadd.f32 %v3129_v48, %v3128_v47 }
0x2109   : > { %v3131_v50 = vadd.f32 1e-09, %v3130_v49 }
0x210b   : > { %5034 = vrcp.f32 %v3131_v50 }
0x2115   : > { %v5035_v51 = vpop.eup %5034 }
0x2116   : > { %v3133_v52 = vmul.f32 %v5035_v51, %v3123_v32 }
0x2118   : > { %3134 = vxpose.xlu0.b32.start.end [1/1] (short) (narrow) %v3133_v52, 8 }
0x2198   : > { %v3150_v61 = vpop.trf.xlu0 }
0x2199   : > { %4701 = vmatmul.mubr.msk.f32.vlgmr.msra.gmra.mrb[32].mxu0 %vm656_vm4, %v3150_v61 }
0x219a   : > { %4915 = vmatpush3.bf16.msra.mxu0 %v4914_v59  ;;  %4711 = vmatprep.mubr.msk.f32.mxu0 %vm5097_vm0, %v5098_v1 }
0x219b   : > { %4916 = vmatprep.subr.bf16.mxu0 %v5096_v0 }
0x219e   : > { %4918 = vmatpush3.bf16.msra.mxu0 %v4917_v57  ;;  %v2827_v57 = vld [vmem:[#allocation2 + $0x2e8] sm:$0xff] }
0x219f   : > { %4725 = vmatprep.subr.mxu0 %v5098_v1  ;;  %v4932_v2 = vpack.c.bf16 %v2827_v57, %v2826_v63 }
0x226c   : > { %v3235_v5 = vpop.f32.mrb[32].mxu0 }
0x226d   : > { %v3239_v53 = vsub.f32 %v5502_v18, %v3235_v5  ;;  %v4702_v55 = vpop.f32.mrb[33].mxu0  ;;  %v2829_v5 = vld [vmem:[#allocation2 + $0x2f8] sm:$0xff] }
0x226f   : > { %4712 = vmatmul.mubr.msk.f32.vlgmr.msra.gmra.mrb[34].mxu0 %vm402_vm3, %v3239_v53  ;;  %v4935_v53 = vpack.c.bf16 %v2829_v5, %v2828_v4 }
0x2270   : > { %4727 = vmatprep.mubr.msk.f32.mxu0 %vm5097_vm0, %v5098_v1 }
0x2342   : > { %v3315_v9 = vpop.f32.mrb[34].mxu0 }
0x2343   : > { %v3316_v35 = vadd.f32 %v4240_v8, %v3315_v9  ;;  %v4713_v10 = vpop.f32.mrb[35].mxu0  ;;  %v2837_v8 = vld [vmem:[#allocation2 + $0x328] sm:$0xff] }
0x2344   : > { %v4944_v9 = vpack.c.bf16 %v2837_v8, %v2836_v7  ;;  %v2839_v10 = vld [vmem:[#allocation2 + $0x338] sm:$0xff] }
0x2345   : > { %v3319_v15 = vmax.f32 %v3316_v35, 0.0  ;;  %v2838_v35 = vld [vmem:[#allocation2 + $0x330] sm:$0xff] }
0x2346   : > { %v4947_v11 = vpack.c.bf16 %v2839_v10, %v2838_v35 }
0x2347   : > { %v5542_v19 = vadd.f32 %v3319_v15, %v5502_v18  ;;  %v4938_v18 = vpack.c.bf16 %v2832_v24, %v2831_v23  ;;  %v4252_v23 = vld [vmem:[%s5636_s4 + $0x19] ss:$0 sm:$0xff] }
0x2349   : > { %4723 = vmatmul.mubr.msk.f32.vlgmr.msra.gmra.mrb[28].mxu1 %vm402_vm3, %v5542_v19  ;;  %4726 = vmatpush3.xpose.msk.msra.mxu0 %vm402_vm3, %v5542_v19 }
0x234a   : > { %4927 = vmatpush3.bf16.msra.mxu1 %v4926_v17  ;;  %4738 = vmatprep.mubr.msk.f32.mxu1 %vm5097_vm0, %v5098_v1 }
0x234b   : > { %4928 = vmatprep.subr.bf16.mxu1 %v5096_v0  ;;  %4741 = vmatprep.subr.mxu0 %v5098_v1 }
0x234e   : > { %4930 = vmatpush3.bf16.msra.mxu1 %v4929_v22 }
0x234f   : > { %4937 = vmatprep.subr.bf16.mxu1 %v5096_v0 }
0x2351   : > { %4739 = vmatmul.mubr.msk.f32.vlgmr.msra.gmra.mrb[30].mxu1 %vm402_vm3, %v5542_v19 }
0x2352   : > { %4939 = vmatpush3.bf16.msra.mxu1 %v4938_v18  ;;  %4765 = vmatprep.mubr.msk.f32.mxu1 %vm5097_vm0, %v5098_v1 }
0x2353   : > { %4940 = vmatprep.subr.bf16.mxu1 %v5096_v0 }
0x2356   : > { %4942 = vmatpush3.bf16.msra.mxu1 %v4941_v27 }
0x2357   : > { %4949 = vmatprep.subr.bf16.mxu1 %v5096_v0 }
0x2359   : > { %4766 = vmatmul.mubr.msk.f32.vlgmr.msra.gmra.mrb[32].mxu1 %vm402_vm3, %v5542_v19 }
0x235a   : > { %4787 = vmatprep.mubr.msk.f32.mxu1 %vm5097_vm0, %v5098_v1 }
0x241c   : > { %v3390_v28 = vpop.f32.mrb[28].mxu1 }
0x241d   : > { %v4724_v29 = vpop.f32.mrb[29].mxu1  ;;  %4728 = vmatmul.mubr.msk.f32.vlgmr.msra.gmra.mrb[36].mxu0 %vm402_vm3, %v3390_v28 }
0x241e   : > { %4743 = vmatprep.mubr.msk.f32.mxu0 %vm5097_vm0, %v5098_v1 }
0x2424   : > { %v3539_v31 = vpop.f32.mrb[30].mxu1 }
0x2425   : > { %v3540_v33 = vadd.f32 %v4245_v30, %v3539_v31  ;;  %v4740_v37 = vpop.f32.mrb[31].mxu1  ;;  %v2842_v30 = vld [vmem:[#allocation2 + $0x348] sm:$0xff] }
0x2427   : > { %4742 = vmatpush3.msra.mxu0 %v3540_v33  ;;  %v2844_v33 = vld [vmem:[#allocation2 + $0x358] sm:$0xff] }
0x2428   : > { %4931 = vmatprep.subr.bf16.mxu0 %v5096_v0 }
0x242c   : > { %v5570_v38 = vpop.f32.mrb[32].mxu1 }
0x242d   : > { %v4767_v40 = vpop.f32.mrb[33].mxu1  ;;  %v3821_v22 = vadd.f32 %v5570_v38, %v5480_v60  ;;  %v2843_v60 = vld [vmem:[#allocation2 + $0x350] sm:$0xff] }
0x242e   : > { %v4953_v37 = vpack.c.bf16 %v2844_v33, %v2843_v60 }
0x24f0   : > { %v3463_v41 = vpop.f32.mrb[36].mxu0 }
0x24f1   : > { %v4729_v39 = vpop.f32.mrb[37].mxu0  ;;  %v3543_v42 = vsel %vm656_vm4, %v3463_v41, -inf }
0x24f2   : > { %3544 = vmax.xlane.f32.xlu1 %v3543_v42 }
0x257f   : > { %v3545_v43 = vpop.xlane.xlu1 %3544 }
0x2580   : > { %v3546_v44 = vsub.f32 %v3463_v41, %v3545_v43 }
0x2582   : > { %v3547_v32 = vmul.f32 1.442695, %v3546_v44 }
0x2584   : > { %5036 = vpow2.f32 %v3547_v32 }
0x258e   : > { %v5037_v36 = vpop.eup %5036 }
0x258f   : > { %v3549_v45 = vsel %vm656_vm4, %v5037_v36, 0.0 }
0x2590   : > { %3550 = vadd.xlane.f32.xlu1 %v3549_v45 }
0x261d   : > { %v3551_v34 = vpop.xlane.xlu1 %3550 }
0x261e   : > { %5038 = vrcp.f32 %v3551_v34 }
0x2628   : > { %v5039_v46 = vpop.eup %5038 }
0x2629   : > { %v3553_v47 = vmul.f32 %v5039_v46, %v5037_v36 }
0x262b   : > { %v3554_v48 = vsel %vm656_vm4, %v3553_v47, 0.0 }
0x262c   : > { %v3555_v49 = vrot.slane %v3554_v48, 4 }
0x262e   : > { %v3556_v50 = vadd.f32 %v3555_v49, %v3554_v48  ;;  %v4253_v48 = vld [vmem:[%s5636_s4 + $0x1a] ss:$0 sm:$0xff] }
0x2630   : > { %v3557_v51 = vrot.slane %v3556_v50, 2 }
0x2632   : > { %v3558_v52 = vadd.f32 %v3557_v51, %v3556_v50 }
0x2634   : > { %v3559_v54 = vrot.slane %v3558_v52, 1 }
0x2636   : > { %v3560_v56 = vadd.f32 %v3559_v54, %v3558_v52 }
0x2638   : > { %v3561_v59 = vadd.f32 1e-09, %v3560_v56 }
0x263a   : > { %5040 = vrcp.f32 %v3561_v59 }
0x2644   : > { %v5041_v61 = vpop.eup %5040 }
0x2645   : > { %v3563_v62 = vmul.f32 %v5041_v61, %v3553_v47 }
0x2647   : > { %3564 = vxpose.xlu1.b32.start.end [1/1] (short) (narrow) %v3563_v62, 8 }
0x26c7   : > { %v3580_v3 = vpop.trf.xlu1 }
0x26c8   : > { %4744 = vmatmul.mubr.msk.f32.vlgmr.msra.gmra.mrb[38].mxu0 %vm656_vm4, %v3580_v3 }
0x26c9   : > { %4933 = vmatpush3.bf16.msra.mxu0 %v4932_v2  ;;  %4754 = vmatprep.mubr.msk.f32.mxu0 %vm5097_vm0, %v5098_v1 }
0x26ca   : > { %4934 = vmatprep.subr.bf16.mxu0 %v5096_v0 }
0x26cd   : > { %4936 = vmatpush3.bf16.msra.mxu0 %v4935_v53 }
0x26ce   : > { %4943 = vmatprep.subr.bf16.mxu0 %v5096_v0 }
0x279b   : > { %v3665_v55 = vpop.f32.mrb[38].mxu0 }
0x279c   : > { %v3669_v6 = vsub.f32 %v5542_v19, %v3665_v55  ;;  %v4745_v58 = vpop.f32.mrb[39].mxu0  ;;  %v5052_v55 = vld [vmem:[%s5196_s20] sm:$0xff] }
0x279e   : > { %4755 = vmatmul.mubr.msk.f32.vlgmr.msra.gmra.mrb[40].mxu0 %vm402_vm3, %v3669_v6 }
0x279f   : > { %4776 = vmatprep.mubr.msk.f32.mxu0 %vm5097_vm0, %v5098_v1  ;;  %4945 = vmatpush3.bf16.msra.mxu0 %v4944_v9 }
0x27a0   : > { %4946 = vmatprep.subr.bf16.mxu0 %v5096_v0 }
0x27a3   : > { %4948 = vmatpush3.bf16.msra.mxu0 %v4947_v11 }
0x2871   : > { %v3745_v15 = vpop.f32.mrb[40].mxu0 }
0x2872   : > { %v3746_v17 = vadd.f32 %v4248_v13, %v3745_v15  ;;  %v4756_v20 = vpop.f32.mrb[41].mxu0 }
0x2874   : > { %v3749_v21 = vmax.f32 %v3746_v17, 0.0 }
0x2876   : > { %v3750_v1 = vadd.f32 %v3749_v21, %v5542_v19  ;;  %v2841_v19 = vld [vmem:[#allocation2 + $0x340] sm:$0xff] }
0x2877   : > { %v4950_v31 = vpack.c.bf16 %v2842_v30, %v2841_v19 }
0x2878   : > { %4777 = vmatmul.mubr.msk.f32.vlgmr.msra.gmra.mrb[42].mxu0 %vm402_vm3, %v3750_v1 }
0x2879   : > { %4951 = vmatpush3.bf16.msra.mxu1 %v4950_v31 }
0x287a   : > { %4952 = vmatprep.subr.bf16.mxu1 %v5096_v0  ;;  %v5099_v0 = vmov 20  }
0x287b   : > { %4981 = vset.pattern.permute.xlu0 %v5099_v0  ;;  %v4258_v0 = vld [vmem:[%s5636_s4 + $0x4] sm:$0x1] }
0x287d   : > { %4954 = vmatpush3.bf16.msra.mxu1 %v4953_v37 }
0x294b   : > { %v3891_v24 = vpop.f32.mrb[42].mxu0 }
0x294c   : > { %v3895_v18 = vadd.f32 %v3891_v24, %v3821_v22  ;;  %v4778_v25 = vpop.f32.mrb[43].mxu0 }
0x294e   : > { %v3902_v26 = vadd.f32 %v4252_v23, %v3895_v18 }
0x2950   : > { %v3903_v27 = vsel %vm402_vm3, %v3902_v26, 0.0  ;;  %v3907_v28 = vmul.f32 %v3902_v26, %v3902_v26 }
0x2951   : > { %3904 = vadd.xlane.f32.xlu0 %v3903_v27 }
0x2952   : > { %v3908_v29 = vsel %vm402_vm3, %v3907_v28, 0.0 }
0x2953   : > { %3909 = vadd.xlane.f32.xlu1 %v3908_v29 }
0x29de   : > { %v3905_v38 = vpop.xlane.xlu0 %3904 }
0x29df   : > { %v3906_v40 = vmul.f32 0.03125, %v3905_v38 }
0x29e0   : > { %v3910_v41 = vpop.xlane.xlu1 %3909 }
0x29e1   : > { %v3912_v39 = vmul.f32 %v3906_v40, %v3906_v40  ;;  %v3911_v42 = vmul.f32 0.03125, %v3910_v41  ;;  %v3915_v36 = vsub.f32 %v3902_v26, %v3906_v40 }
0x29e3   : > { %v3913_v43 = vsub.f32 %v3911_v42, %v3912_v39  ;;  %v4255_v42 = vld [vmem:[%s5636_s4 + $0x1] sm:$0x1] }
0x29e5   : > { %v3914_v44 = vmax.f32 %v3913_v43, 0.0 }
0x29e7   : > { %v3916_v32 = vadd.f32 1e-05, %v3914_v44  ;;  %v4256_v44 = vld [vmem:[%s5636_s4 + $0x2] sm:$0x1] }
0x29e9   : > { %5042 = vrsqrt.f32 %v3916_v32 }
0x29f3   : > { %v5043_v45 = vpop.eup %5042 }
0x29f4   : > { %v3918_v34 = vmul.f32 %v5043_v45, %v3915_v36  ;;  %v4257_v36 = vld [vmem:[%s5636_s4 + $0x3] sm:$0x1] }
0x29f6   : > { %v3919_v46 = vmul.f32 %v5493_v14, %v3918_v34 }
0x29f8   : > { %v3920_v47 = vadd.f32 %v5498_v16, %v3919_v46 }
0x29fa   : > { %4788 = vmatmul.mubr.msk.f32.vlgmr.msra.gmra.mrb[34].mxu1 %vm402_vm3, %v3920_v47  ;;  %v5100_v47 = vmov 0  }
0x29fb   : > { %4982 = vset.pattern.permute.xlu1 %v5100_v47 }
0x2acd   : > { %v3996_v49 = vpop.f32.mrb[34].mxu1 }
0x2ace   : > { %v3997_v50 = vadd.f32 %v4253_v48, %v3996_v49  ;;  %v4789_v51 = vpop.f32.mrb[35].mxu1 }
0x2ad0   : > { %v4000_v52 = vmul.f32 1.442695, %v3997_v50 }
0x2ad2   : > { %5044 = vpow2.f32 %v4000_v52 }
0x2adc   : > { %v5045_v54 = vpop.eup %5044 }
0x2add   : > { %v4002_v56 = vadd.f32 1.0, %v5045_v54 }
0x2adf   : > { %v4003_v59 = vmul.f32 %v4002_v56, %v4002_v56 }
0x2ae1   : > { %v4004_v61 = vadd.f32 1.0, %v4003_v59 }
0x2ae3   : > { %5046 = vrcp.f32 %v4004_v61 }
0x2aed   : > { %v5047_v62 = vpop.eup %5046 }
0x2aee   : > { %v4006_v63 = vmul.f32 2.0, %v5047_v62 }
0x2af0   : > { %v4007_v57 = vsub.f32 1.0, %v4006_v63 }
0x2af2   : > { %v4008_v2 = vmul.f32 %v4007_v57, %v3997_v50 }
0x2af4   : > { %v4009_v3 = vadd.f32 %v4008_v2, %v3902_v26 }
0x2af6   : > { %v4010_v4 = vsel %vm402_vm3, %v4009_v3, 0.0  ;;  %v4014_v5 = vmul.f32 %v4009_v3, %v4009_v3 }
0x2af7   : > { %4011 = vadd.xlane.f32.xlu0 %v4010_v4 }
0x2af8   : > { %v4015_v53 = vsel %vm402_vm3, %v4014_v5, 0.0 }
0x2afb   : > { %4016 = vadd.xlane.f32.xlu0 %v4015_v53 }
0x2b11   : > { %4030 = vperm.xlu0 %4981, %v5052_v55  }
0x2b15   : > { %4983 = vset.pattern.permute.xlu0 %v5100_v47 }
0x2b84   : > { %v4012_v6 = vpop.xlane.xlu0 %4011 }
0x2b85   : > { %v4013_v58 = vmul.f32 0.03125, %v4012_v6 }
0x2b87   : > { %v4019_v8 = vmul.f32 %v4013_v58, %v4013_v58  ;;  %v4022_v13 = vsub.f32 %v4009_v3, %v4013_v58 }
0x2b88   : > { %v4017_v7 = vpop.xlane.xlu0 %4016 }
0x2b89   : > { %v4018_v9 = vmul.f32 0.03125, %v4017_v7 }
0x2b8b   : > { %v4020_v35 = vsub.f32 %v4018_v9, %v4019_v8 }
0x2b8d   : > { %v4021_v10 = vmax.f32 %v4020_v35, 0.0 }
0x2b8f   : > { %v4023_v11 = vadd.f32 1e-05, %v4021_v10 }
0x2b90   : > { %v4031_v1 = vpop.permute.xlu0 %4030 }
0x2b91   : > { %5048 = vrsqrt.f32 %v4023_v11 }
0x2b9b   : > { %v5049_v15 = vpop.eup %5048 }
0x2b9c   : > { %v4025_v17 = vmul.f32 %v5049_v15, %v4022_v13 }
0x2b9e   : > { %v4026_v20 = vmul.f32 %v5493_v14, %v4025_v17 }
0x2ba0   : > { %v4027_v21 = vadd.f32 %v5498_v16, %v4026_v20 }
0x2ba2   : > { %v4028_v22 = vadd.f32 %v4027_v21, %v5212_v12 }
0x2ba4   : > { %v4033_v23 = vmul.f32 %v4031_v1, %v4028_v22 }
0x2ba6   : > { %v4034_v24 = vsel %vm402_vm3, %v4033_v23, 0.0 }
0x2ba7   : > { %v4035_v18 = vrot.slane %v4034_v24, 4 }
0x2ba9   : > { %v4036_v25 = vadd.f32 %v4035_v18, %v4034_v24 }
0x2bab   : > { %v4037_v26 = vrot.slane %v4036_v25, 2 }
0x2bad   : > { %v4038_v27 = vadd.f32 %v4037_v26, %v4036_v25 }
0x2baf   : > { %v4039_v28 = vrot.slane %v4038_v27, 1 }
0x2bb1   : > { %v4040_v29 = vadd.f32 %v4039_v28, %v4038_v27 }
0x2bb3   : > { %v4045_v19 = vsel %vm402_vm3, %v4040_v29, 0.0  ;;  %v4049_v30 = vmul.f32 %v4040_v29, %v4040_v29 }
0x2bb4   : > { %4046 = vadd.xlane.f32.xlu1 %v4045_v19 }
0x2bb5   : > { %v4050_v14 = vsel %vm402_vm3, %v4049_v30, 0.0 }
0x2bb8   : > { %4051 = vadd.xlane.f32.xlu1 %v4050_v14 }
0x2c41   : > { %v4047_v16 = vpop.xlane.xlu1 %4046 }
0x2c42   : > { %v4048_v31 = vmul.f32 0.03125, %v4047_v16 }
0x2c44   : > { %v4054_v12 = vmul.f32 %v4048_v31, %v4048_v31  ;;  %v4057_v41 = vsub.f32 %v4040_v29, %v4048_v31 }
0x2c45   : > { %v4052_v60 = vpop.xlane.xlu1 %4051 }
0x2c46   : > { %v4053_v33 = vmul.f32 0.03125, %v4052_v60 }
0x2c48   : > { %v4055_v37 = vsub.f32 %v4053_v33, %v4054_v12 }
0x2c4a   : > { %v4056_v38 = vmax.f32 %v4055_v37, 0.0 }
0x2c4c   : > { %v4058_v40 = vadd.f32 1e-05, %v4056_v38 }
0x2c4e   : > { %5050 = vrsqrt.f32 %v4058_v40 }
0x2c58   : > { %v5051_v39 = vpop.eup %5050 }
0x2c59   : > { %v4060_v43 = vmul.f32 %v5051_v39, %v4057_v41 }
0x2c5b   : > { %v4061_v32 = vmul.f32 %v4255_v42, %v4060_v43 }
0x2c5d   : > { %v4062_v45 = vadd.f32 %v4256_v44, %v4061_v32 }
0x2c5f   : > { %v4065_v34 = vmul.f32 %v4257_v36, %v4062_v45 }
0x2c61   : > { %v4067_v46 = vsel %vm4066_vm5, %v4065_v34, 0.0 }
0x2c62   : > { %4068 = vadd.xlane.f32.xlu1 %v4067_v46 }
0x2cef   : > { %v4069_v48 = vpop.xlane.xlu1 %4068 }
0x2cf0   : > { %v4072_v49 = vadd.f32 %v4258_v0, %v4069_v48 }
0x2cf2   : > { %4075 = vperm.xlu1 %4982, %v4072_v49  }
0x2d71   : > { %v4076_v50 = vpop.permute.xlu1 %4075 }
0x2d72   : > { %4078 = vst [vmem:[%s249_s16] sm:$0x1] %v4076_v50 }
0x2d73 PF: > { %s16_s18 = sadd.s32 1, %s5091_s18  }
0x2d74   : > { %p13_p3 = scmp.ge.s32.totalorder %s16_s18, 4  }
0x2d76   :  { %15 = sbr.rel (!%p13_p3) target bundleno = 1 (0x1), region = 132 }
0x2d7d   :  { %4096 = vsyncpa [#allocation3], 1 }
0x2d7e   :  { %4098 = vsyncpa [#allocation3 + $0x1], 1 }

</bundles_post_ra>
